<compile_context>
chip_gen: v7x
topology: tpu7x:2x2x1
jax: 0.10.0
libtpu: 0.0.40
codegen_flags: <defaults>
</compile_context>

<pallas_src>
import functools
import math

import jax
import jax.numpy as jnp
from jax.experimental import pallas as pl
from jax.experimental.pallas import tpu as pltpu


def _round_up(x, m):
    return (x + m - 1) // m * m


def _apply_act(y, act, slope):
    if act == "leaky_relu":
        return jnp.where(y >= 0, y, slope * y)
    if act == "sigmoid":
        return jax.nn.sigmoid(y)
    return y


# -------------------- tiled matmul + bias + activation kernel ----------------
def _matmul_bias_act_kernel(x_ref, w_ref, b_ref, o_ref, acc_ref, *, act, slope):
    """o = act(x @ w + b); K is tiled as the reduction grid axis (axis 2)."""

    @pl.when(pl.program_id(2) == 0)
    def _init():
        acc_ref[...] = jnp.zeros_like(acc_ref)

    acc_ref[...] += jnp.dot(
        x_ref[...], w_ref[...], preferred_element_type=jnp.float32
    )

    # Bias + activation only on the final K step (correct with a K-reduction grid).
    @pl.when(pl.program_id(2) == pl.num_programs(2) - 1)
    def _finalize():
        y = acc_ref[...] + b_ref[...]
        o_ref[...] = _apply_act(y, act, slope).astype(o_ref.dtype)


def pallas_matmul_bias_act(x, w, b, *, act="none", slope=0.01,
                           out_dtype=jnp.float32, tm=256, tn=256, tk=512):
    """act(x @ w + b) with x:(M,K), w:(K,N), b:(N,).

    bf16 operands / f32 accumulation (tolerance trade-off per review).  Operands are
    zero-padded up to tile multiples: zero K-padding contributes nothing, padded M
    rows / N columns are sliced off afterwards.
    """
    M, K = x.shape
    K2, N = w.shape
    assert K == K2 and b.shape == (N,)

    tm = max(16, min(tm, _round_up(M, 16)))
    tn = max(128, min(tn, _round_up(N, 128)))
    tk = max(128, min(tk, _round_up(K, 128)))
    Mp, Kp, Np = _round_up(M, tm), _round_up(K, tk), _round_up(N, tn)

    xp = jnp.pad(x.astype(jnp.bfloat16), ((0, Mp - M), (0, Kp - K)))
    wp = jnp.pad(w.astype(jnp.bfloat16), ((0, Kp - K), (0, Np - N)))
    bp = jnp.pad(b.astype(jnp.float32), (0, Np - N)).reshape(1, Np)

    grid = (Mp // tm, Np // tn, Kp // tk)
    kernel = functools.partial(_matmul_bias_act_kernel, act=act, slope=slope)
    out = pl.pallas_call(
        kernel,
        out_shape=jax.ShapeDtypeStruct((Mp, Np), out_dtype),
        grid_spec=pltpu.PrefetchScalarGridSpec(
            num_scalar_prefetch=0,
            grid=grid,
            in_specs=[
                pl.BlockSpec((tm, tk), lambda i, j, k: (i, k)),
                pl.BlockSpec((tk, tn), lambda i, j, k: (k, j)),
                pl.BlockSpec((1, tn), lambda i, j, k: (0, j)),
            ],
            out_specs=pl.BlockSpec((tm, tn), lambda i, j, k: (i, j)),
            scratch_shapes=[pltpu.VMEM((tm, tn), jnp.float32)],
        ),
        compiler_params=pltpu.CompilerParams(
            dimension_semantics=("parallel", "parallel", "arbitrary"),
        ),
    )(xp, wp, bp)
    return out[:M, :N]


# -------- fused head: Linear + BatchNorm1d(folded) + LeakyReLU + Linear + LeakyReLU --------
def _mlp_head_kernel(z_ref, w1_ref, b1_ref, w2_ref, b2_ref, o_ref, *, slope):
    h = jnp.dot(z_ref[...], w1_ref[...], preferred_element_type=jnp.float32)
    h = _apply_act(h + b1_ref[...], "leaky_relu", slope)
    y = jnp.dot(h.astype(w2_ref.dtype), w2_ref[...],
                preferred_element_type=jnp.float32)
    o_ref[...] = _apply_act(y + b2_ref[...], "leaky_relu", slope).astype(o_ref.dtype)


def pallas_mlp_head(z, w1, b1, w2, b2, *, slope=0.01):
    """LeakyReLU(LeakyReLU(z @ w1 + b1) @ w2 + b2) in a single whole-block kernel.

    All operands are tiny (M = batch, widths of a few hundred); tiling would only add
    per-step launch overhead, so everything lives in one VMEM block.  Padded hidden
    columns stay exactly zero through LeakyReLU, so they do not perturb the second matmul.
    """
    M, K1 = z.shape
    H = w1.shape[1]
    N = w2.shape[1]
    Mp = _round_up(max(M, 16), 16)
    K1p = _round_up(max(K1, 128), 128)
    Hp = _round_up(max(H, 128), 128)
    Np = _round_up(max(N, 128), 128)

    zp = jnp.pad(z.astype(jnp.bfloat16), ((0, Mp - M), (0, K1p - K1)))
    w1p = jnp.pad(w1.astype(jnp.bfloat16), ((0, K1p - K1), (0, Hp - H)))
    b1p = jnp.pad(b1.astype(jnp.float32), (0, Hp - H)).reshape(1, Hp)
    w2p = jnp.pad(w2.astype(jnp.bfloat16), ((0, Hp - H), (0, Np - N)))
    b2p = jnp.pad(b2.astype(jnp.float32), (0, Np - N)).reshape(1, Np)

    out = pl.pallas_call(
        functools.partial(_mlp_head_kernel, slope=slope),
        out_shape=jax.ShapeDtypeStruct((Mp, Np), jnp.float32),
        grid=(1,),
        in_specs=[
            pl.BlockSpec((Mp, K1p), lambda i: (0, 0)),
            pl.BlockSpec((K1p, Hp), lambda i: (0, 0)),
            pl.BlockSpec((1, Hp), lambda i: (0, 0)),
            pl.BlockSpec((Hp, Np), lambda i: (0, 0)),
            pl.BlockSpec((1, Np), lambda i: (0, 0)),
        ],
        out_specs=pl.BlockSpec((Mp, Np), lambda i: (0, 0)),
        compiler_params=pltpu.CompilerParams(dimension_semantics=("arbitrary",)),
    )(zp, w1p, b1p, w2p, b2p)
    return out[:M, :N]


# ----------------------- ConvTranspose3d(k=4, s=2, p=1) ----------------------
# (a = position inside the 3-wide input window, p = output parity) -> kernel tap k,
# derived from od = 2*id - 1 + k with id = j - 1 + a and od = 2*j + p.
_KMAP = {(0, 0): 3, (1, 0): 1, (1, 1): 2, (2, 1): 0}


def _phase_tap_matrix():
    tbl = [[[0.0] * 4 for _ in range(2)] for _ in range(3)]
    for (a, p), k in _KMAP.items():
        tbl[a][p][k] = 1.0
    return jnp.asarray(tbl, jnp.float32)          # (a=3, p=2, k=4)


def deconv_weight_to_matmul(w_ct):
    """PyTorch ConvTranspose3d weight (Cin, Cout, 4, 4, 4) -> (27*Cin, 8*Cout).

    Rows are ordered (a, b, c, Cin) to match the channel-last 3x3x3 im2col patches;
    columns are ordered (pd, ph, pw, Cout), i.e. the 8 stride-2 output phases, so the
    matmul output minor dim is 8*Cout (lane-dense) instead of Cout.
    """
    S = _phase_tap_matrix().astype(w_ct.dtype)
    w_big = jnp.einsum("apk,bql,crm,ioklm->abcipqro", S, S, S, w_ct)
    cin, cout = w_ct.shape[0], w_ct.shape[1]
    return w_big.reshape(27 * cin, 8 * cout)


def pallas_deconv3d(x, w_mat, b_big, *, act, out_dtype):
    """ConvTranspose3d(k=4, s=2, p=1) + activation.

    x: channel-last (N, D, H, W, Cin); returns channel-last (N, 2D, 2H, 2W, Cout).
    """
    N, D, H, W, C = x.shape
    cout = w_mat.shape[1] // 8
    # TODO(synk): the 3x3x3 im2col and the depth-to-space interleave still run as XLA glue;
    # fully fusing them into the kernel (halo DMA per output tile) would also remove the
    # 27x patch materialization in HBM.
    xp = jnp.pad(x, ((0, 0), (1, 1), (1, 1), (1, 1), (0, 0)))
    cols = []
    for a in range(3):
        for b in range(3):
            for c in range(3):
                cols.append(xp[:, a:a + D, b:b + H, c:c + W, :])
    patches = jnp.stack(cols, axis=4).reshape(N * D * H * W, 27 * C)

    y = pallas_matmul_bias_act(patches, w_mat, b_big, act=act, out_dtype=out_dtype)

    # Depth-to-space: interleave the 8 output phases -> (N, 2D, 2H, 2W, Cout).
    y = y.reshape(N, D, H, W, 2, 2, 2, cout)
    y = y.transpose(0, 1, 4, 2, 5, 3, 6, 7).reshape(N, 2 * D, 2 * H, 2 * W, cout)
    return y


# ------------------------------ parameters -----------------------------------
def _kaiming_uniform(key, shape, fan_in, a=0.0):
    # Mirrors init.kaiming_uniform_(mode='fan_in', nonlinearity='leaky_relu').
    gain = math.sqrt(2.0 / (1.0 + a * a))
    bound = gain * math.sqrt(3.0 / fan_in)
    return jax.random.uniform(key, shape, jnp.float32, -bound, bound)


def init_video_decoder_params(key, latent_dim, input_shape, hidden_shape, hidden_dim):
    """Parameters in PyTorch layouts: Linear (out,in); ConvTranspose3d (Cin,Cout,4,4,4)."""
    n_frames, height, width, n_channel = input_shape
    hs = hidden_shape
    flat = hs[3] * width * height * n_frames // (16 ** 3)
    keys = jax.random.split(key, 6)
    p = {}
    p["lin1_w"] = _kaiming_uniform(keys[0], (hidden_dim, latent_dim), latent_dim)
    p["lin1_b"] = jnp.zeros((hidden_dim,), jnp.float32)
    p["bn_gamma"] = jnp.ones((hidden_dim,), jnp.float32)
    p["bn_beta"] = jnp.zeros((hidden_dim,), jnp.float32)
    p["bn_mean"] = jnp.zeros((hidden_dim,), jnp.float32)
    p["bn_var"] = jnp.ones((hidden_dim,), jnp.float32)
    p["lin2_w"] = _kaiming_uniform(keys[1], (flat, hidden_dim), hidden_dim)
    p["lin2_b"] = jnp.zeros((flat,), jnp.float32)
    chans = [hs[3], hs[2], hs[1], hs[0], n_channel]
    for i in range(4):
        cin, cout = chans[i], chans[i + 1]
        p[f"deconv{i}_w"] = _kaiming_uniform(keys[2 + i], (cin, cout, 4, 4, 4), cout * 64)
        p[f"deconv{i}_b"] = jnp.zeros((cout,), jnp.float32)
    return p


def prepare_params(params, input_shape, hidden_shape, bn_eps=1e-5):
    """One-time conversion to matmul-ready layouts (BN folded, transposes done once)."""
    n_frames, height, width, n_channel = input_shape
    hs = hidden_shape
    d0, w0, h0 = n_frames // 16, width // 16, height // 16
    hidden_dim = params["lin1_w"].shape[0]
    prep = {}
    # Fold eval-mode BatchNorm1d into the first Linear: y = (z - mean)/sqrt(var+eps)*g + b.
    # TODO(synk): training-mode BatchNorm1d (batch statistics) is not implemented.
    s = params["bn_gamma"] / jnp.sqrt(params["bn_var"] + bn_eps)
    prep["w1"] = params["lin1_w"].T * s[None, :]
    prep["b1"] = (params["lin1_b"] - params["bn_mean"]) * s + params["bn_beta"]
    # Second Linear: reorder output features (C, D, W, H) -> (D, W, H, C) so the Reshape
    # lands directly in channel-last layout; stored pre-transposed as (K, N).
    w2 = params["lin2_w"].reshape(hs[3], d0, w0, h0, hidden_dim)
    prep["w2"] = w2.transpose(4, 1, 2, 3, 0).reshape(hidden_dim, -1)
    prep["b2"] = params["lin2_b"].reshape(hs[3], d0, w0, h0).transpose(1, 2, 3, 0).reshape(-1)
    for i in range(4):
        prep[f"dw{i}"] = deconv_weight_to_matmul(params[f"deconv{i}_w"]).astype(jnp.bfloat16)
        prep[f"db{i}"] = jnp.tile(params[f"deconv{i}_b"], 8)   # (phase, Cout) -> (8*Cout,)
    return prep


# ------------------------------- forward pass --------------------------------
def video_decoder_forward(prep, z, *, decode_shape):
    """z: (N, latent_dim) -> video (N, n_channel, n_frames, width, height)."""
    d0, w0, h0, c0 = decode_shape
    n = z.shape[0]
    # Linear -> BatchNorm1d(eval, folded) -> LeakyReLU -> Linear -> LeakyReLU, one kernel.
    h = pallas_mlp_head(z, prep["w1"], prep["b1"], prep["w2"], prep["b2"])
    # TODO(synk): nn.Dropout is identity in eval mode; no-op here.
    x = h.reshape(n, d0, w0, h0, c0)            # channel-last (N, D, W, H, C)
    for i in range(4):
        last = i == 3
        x = pallas_deconv3d(
            x, prep[f"dw{i}"], prep[f"db{i}"],
            act="sigmoid" if last else "leaky_relu",
            out_dtype=jnp.float32 if last else jnp.bfloat16,  # bf16 intermediates halve HBM traffic
        )
    # Back to PyTorch NCDHW: (N, n_channel, n_frames, width, height).
    return x.transpose(0, 4, 1, 2, 3)


# ----------------------------------- main -------------------------------------
if __name__ == "__main__":
    latent_dim = 16
    hidden_dim = 32
    input_shape = (16, 32, 32, 3)       # (n_frames, height, width, n_channel); dims / 16 must be int
    hidden_shape = (8, 16, 16, 32)      # hs[0..3]
    batch = 2

    key = jax.random.PRNGKey(0)
    pkey, zkey = jax.random.split(key)
    params = init_video_decoder_params(pkey, latent_dim, input_shape, hidden_shape, hidden_dim)
    prep = prepare_params(params, input_shape, hidden_shape)

    z = jax.random.normal(zkey, (batch, latent_dim), dtype=jnp.float32)

    n_frames, height, width, n_channel = input_shape
    decode_shape = (n_frames // 16, width // 16, height // 16, hidden_shape[3])
    fwd = jax.jit(functools.partial(video_decoder_forward, decode_shape=decode_shape))
    out = jax.block_until_ready(fwd(prep, z))

    assert out.shape == (batch, n_channel, n_frames, width, height), out.shape
    assert out.dtype == jnp.float32
    assert bool(jnp.all((out >= 0.0) & (out <= 1.0)))   # Sigmoid output range
    print("KERNEL_OK")
</pallas_src>

<mosaic_0001>
module attributes {stable_mosaic.version = 11 : i64} {
  func.func @_mlp_head_kernel(%arg0: i32, %arg1: memref<16x128xbf16, #tpu.memory_space<vmem>>, %arg2: memref<128x128xbf16, #tpu.memory_space<vmem>>, %arg3: memref<1x128xf32, #tpu.memory_space<vmem>>, %arg4: memref<128x128xbf16, #tpu.memory_space<vmem>>, %arg5: memref<1x128xf32, #tpu.memory_space<vmem>>, %arg6: memref<16x128xf32, #tpu.memory_space<vmem>>) attributes {dimension_semantics = [#tpu.dimension_semantics<arbitrary>], iteration_bounds = array<i64: 1>, scalar_prefetch = 0 : i64, scratch_operands = 0 : i64, tpu.core_type = #tpu.core_type<tc>, window_params = [{pipeline_mode = #tpu.pipeline_mode<synchronous>, transform_indices = @transform_0, window_bounds = array<i64: 16, 128>}, {pipeline_mode = #tpu.pipeline_mode<synchronous>, transform_indices = @transform_1, window_bounds = array<i64: 128, 128>}, {pipeline_mode = #tpu.pipeline_mode<synchronous>, transform_indices = @transform_2, window_bounds = array<i64: 1, 128>}, {pipeline_mode = #tpu.pipeline_mode<synchronous>, transform_indices = @transform_3, window_bounds = array<i64: 128, 128>}, {pipeline_mode = #tpu.pipeline_mode<synchronous>, transform_indices = @transform_4, window_bounds = array<i64: 1, 128>}, {pipeline_mode = #tpu.pipeline_mode<synchronous>, transform_indices = @transform_5, window_bounds = array<i64: 16, 128>}]} {
    %c0 = arith.constant 0 : index
    %c0_0 = arith.constant 0 : index
    %0 = vector.load %arg1[%c0, %c0_0] : memref<16x128xbf16, #tpu.memory_space<vmem>>, vector<16x128xbf16>
    %c0_1 = arith.constant 0 : index
    %c0_2 = arith.constant 0 : index
    %1 = vector.load %arg2[%c0_1, %c0_2] : memref<128x128xbf16, #tpu.memory_space<vmem>>, vector<128x128xbf16>
    %cst = arith.constant dense<0.000000e+00> : vector<16x128xf32>
    %2 = tpu.matmul %0, %1, %cst {dimension_numbers = #tpu.dot_dimension_numbers<[1], [0], [0], [1], [0, 0, 1, 1], [], []>} : vector<16x128xbf16>, vector<128x128xbf16>, vector<16x128xf32> -> vector<16x128xf32>
    %c0_3 = arith.constant 0 : index
    %c0_4 = arith.constant 0 : index
    %3 = vector.load %arg3[%c0_3, %c0_4] : memref<1x128xf32, #tpu.memory_space<vmem>>, vector<1x128xf32>
    %4 = vector.broadcast %3 : vector<1x128xf32> to vector<16x128xf32>
    %5 = arith.addf %2, %4 : vector<16x128xf32>
    %cst_5 = arith.constant 0.000000e+00 : f32
    %6 = vector.broadcast %cst_5 : f32 to vector<16x128xf32>
    %7 = arith.cmpf oge, %5, %6 : vector<16x128xf32>
    %cst_6 = arith.constant 0.00999999977 : f32
    %8 = vector.broadcast %cst_6 : f32 to vector<16x128xf32>
    %9 = arith.mulf %8, %5 : vector<16x128xf32>
    %10 = arith.select %7, %5, %9 : vector<16x128xi1>, vector<16x128xf32>
    %11 = arith.truncf %10 : vector<16x128xf32> to vector<16x128xbf16>
    %c0_7 = arith.constant 0 : index
    %c0_8 = arith.constant 0 : index
    %12 = vector.load %arg4[%c0_7, %c0_8] : memref<128x128xbf16, #tpu.memory_space<vmem>>, vector<128x128xbf16>
    %cst_9 = arith.constant dense<0.000000e+00> : vector<16x128xf32>
    %13 = tpu.matmul %11, %12, %cst_9 {dimension_numbers = #tpu.dot_dimension_numbers<[1], [0], [0], [1], [0, 0, 1, 1], [], []>} : vector<16x128xbf16>, vector<128x128xbf16>, vector<16x128xf32> -> vector<16x128xf32>
    %c0_10 = arith.constant 0 : index
    %c0_11 = arith.constant 0 : index
    %14 = vector.load %arg5[%c0_10, %c0_11] : memref<1x128xf32, #tpu.memory_space<vmem>>, vector<1x128xf32>
    %15 = vector.broadcast %14 : vector<1x128xf32> to vector<16x128xf32>
    %16 = arith.addf %13, %15 : vector<16x128xf32>
    %cst_12 = arith.constant 0.000000e+00 : f32
    %17 = vector.broadcast %cst_12 : f32 to vector<16x128xf32>
    %18 = arith.cmpf oge, %16, %17 : vector<16x128xf32>
    %cst_13 = arith.constant 0.00999999977 : f32
    %19 = vector.broadcast %cst_13 : f32 to vector<16x128xf32>
    %20 = arith.mulf %19, %16 : vector<16x128xf32>
    %21 = arith.select %18, %16, %20 : vector<16x128xi1>, vector<16x128xf32>
    %c0_14 = arith.constant 0 : index
    %c0_15 = arith.constant 0 : index
    %22 = vector.load %arg6[%c0_14, %c0_15] : memref<16x128xf32, #tpu.memory_space<vmem>>, vector<16x128xf32>
    tpu.vector_store %arg6[%c0_14, %c0_15], %21 {strides = array<i32>} : memref<16x128xf32, #tpu.memory_space<vmem>>, vector<16x128xf32>,
    return
  }
  func.func @transform_0(%arg0: i32) -> (i32, i32) {
    %c0_i32 = arith.constant 0 : i32
    %c0_i32_0 = arith.constant 0 : i32
    %c0_i32_1 = arith.constant 0 : i32
    return %c0_i32, %c0_i32_0 : i32, i32
  }
  func.func @transform_1(%arg0: i32) -> (i32, i32) {
    %c0_i32 = arith.constant 0 : i32
    %c0_i32_0 = arith.constant 0 : i32
    %c0_i32_1 = arith.constant 0 : i32
    return %c0_i32, %c0_i32_0 : i32, i32
  }
  func.func @transform_2(%arg0: i32) -> (i32, i32) {
    %c0_i32 = arith.constant 0 : i32
    %c0_i32_0 = arith.constant 0 : i32
    %c0_i32_1 = arith.constant 0 : i32
    return %c0_i32, %c0_i32_0 : i32, i32
  }
  func.func @transform_3(%arg0: i32) -> (i32, i32) {
    %c0_i32 = arith.constant 0 : i32
    %c0_i32_0 = arith.constant 0 : i32
    %c0_i32_1 = arith.constant 0 : i32
    return %c0_i32, %c0_i32_0 : i32, i32
  }
  func.func @transform_4(%arg0: i32) -> (i32, i32) {
    %c0_i32 = arith.constant 0 : i32
    %c0_i32_0 = arith.constant 0 : i32
    %c0_i32_1 = arith.constant 0 : i32
    return %c0_i32, %c0_i32_0 : i32, i32
  }
  func.func @transform_5(%arg0: i32) -> (i32, i32) {
    %c0_i32 = arith.constant 0 : i32
    %c0_i32_0 = arith.constant 0 : i32
    %c0_i32_1 = arith.constant 0 : i32
    return %c0_i32, %c0_i32_0 : i32, i32
  }
}

module attributes {stable_mosaic.version = 11 : i64} {
  func.func @_matmul_bias_act_kernel(%arg0: i32, %arg1: i32, %arg2: i32, %arg3: memref<16x512xbf16, #tpu.memory_space<vmem>>, %arg4: memref<512x128xbf16, #tpu.memory_space<vmem>>, %arg5: memref<1x128xf32, #tpu.memory_space<vmem>>, %arg6: memref<16x128xbf16, #tpu.memory_space<vmem>>, %arg7: memref<16x128xf32, #tpu.memory_space<vmem>>) attributes {dimension_semantics = [#tpu.dimension_semantics<parallel>, #tpu.dimension_semantics<parallel>, #tpu.dimension_semantics<arbitrary>], iteration_bounds = array<i64: 1, 1, 2>, scalar_prefetch = 0 : i64, scratch_operands = 1 : i64, tpu.core_type = #tpu.core_type<tc>, window_params = [{transform_indices = @transform_0, window_bounds = array<i64: 16, 512>}, {transform_indices = @transform_1, window_bounds = array<i64: 512, 128>}, {transform_indices = @transform_2, window_bounds = array<i64: 1, 128>}, {transform_indices = @transform_3, window_bounds = array<i64: 16, 128>}]} {
    %c0_i32 = arith.constant 0 : i32
    %0 = arith.cmpi eq, %arg2, %c0_i32 : i32
    %1 = arith.extui %0 : i1 to i32
    %c0_i32_0 = arith.constant 0 : i32
    %2 = arith.cmpi ne, %1, %c0_i32_0 : i32
    scf.if %2 {
      %cst_9 = arith.constant 0.000000e+00 : f32
      %12 = vector.broadcast %cst_9 : f32 to vector<16x128xf32>
      %c0_10 = arith.constant 0 : index
      %c0_11 = arith.constant 0 : index
      %13 = vector.load %arg7[%c0_10, %c0_11] : memref<16x128xf32, #tpu.memory_space<vmem>>, vector<16x128xf32>
      tpu.vector_store %arg7[%c0_10, %c0_11], %12 {strides = array<i32>} : memref<16x128xf32, #tpu.memory_space<vmem>>, vector<16x128xf32>,
    } else {
    }
    %c0 = arith.constant 0 : index
    %c0_1 = arith.constant 0 : index
    %3 = vector.load %arg7[%c0, %c0_1] : memref<16x128xf32, #tpu.memory_space<vmem>>, vector<16x128xf32>
    %c0_2 = arith.constant 0 : index
    %c0_3 = arith.constant 0 : index
    %4 = vector.load %arg3[%c0_2, %c0_3] : memref<16x512xbf16, #tpu.memory_space<vmem>>, vector<16x512xbf16>
    %c0_4 = arith.constant 0 : index
    %c0_5 = arith.constant 0 : index
    %5 = vector.load %arg4[%c0_4, %c0_5] : memref<512x128xbf16, #tpu.memory_space<vmem>>, vector<512x128xbf16>
    %cst = arith.constant dense<0.000000e+00> : vector<16x128xf32>
    %6 = tpu.matmul %4, %5, %cst {dimension_numbers = #tpu.dot_dimension_numbers<[1], [0], [0], [1], [0, 0, 1, 1], [], []>} : vector<16x512xbf16>, vector<512x128xbf16>, vector<16x128xf32> -> vector<16x128xf32>
    %7 = arith.addf %3, %6 : vector<16x128xf32>
    %c0_6 = arith.constant 0 : index
    %c0_7 = arith.constant 0 : index
    %8 = vector.load %arg7[%c0_6, %c0_7] : memref<16x128xf32, #tpu.memory_space<vmem>>, vector<16x128xf32>
    tpu.vector_store %arg7[%c0_6, %c0_7], %7 {strides = array<i32>} : memref<16x128xf32, #tpu.memory_space<vmem>>, vector<16x128xf32>,
    %c1_i32 = arith.constant 1 : i32
    %9 = arith.cmpi eq, %arg2, %c1_i32 : i32
    %10 = arith.extui %9 : i1 to i32
    %c0_i32_8 = arith.constant 0 : i32
    %11 = arith.cmpi ne, %10, %c0_i32_8 : i32
    scf.if %11 {
      %c0_9 = arith.constant 0 : index
      %c0_10 = arith.constant 0 : index
      %12 = vector.load %arg7[%c0_9, %c0_10] : memref<16x128xf32, #tpu.memory_space<vmem>>, vector<16x128xf32>
      %c0_11 = arith.constant 0 : index
      %c0_12 = arith.constant 0 : index
      %13 = vector.load %arg5[%c0_11, %c0_12] : memref<1x128xf32, #tpu.memory_space<vmem>>, vector<1x128xf32>
      %14 = vector.broadcast %13 : vector<1x128xf32> to vector<16x128xf32>
      %15 = arith.addf %12, %14 : vector<16x128xf32>
      %cst_13 = arith.constant 0.000000e+00 : f32
      %16 = vector.broadcast %cst_13 : f32 to vector<16x128xf32>
      %17 = arith.cmpf oge, %15, %16 : vector<16x128xf32>
      %cst_14 = arith.constant 0.00999999977 : f32
      %18 = vector.broadcast %cst_14 : f32 to vector<16x128xf32>
      %19 = arith.mulf %18, %15 : vector<16x128xf32>
      %20 = arith.select %17, %15, %19 : vector<16x128xi1>, vector<16x128xf32>
      %21 = arith.truncf %20 : vector<16x128xf32> to vector<16x128xbf16>
      %c0_15 = arith.constant 0 : index
      %c0_16 = arith.constant 0 : index
      %22 = vector.load %arg6[%c0_15, %c0_16] : memref<16x128xbf16, #tpu.memory_space<vmem>>, vector<16x128xbf16>
      tpu.vector_store %arg6[%c0_15, %c0_16], %21 {strides = array<i32>} : memref<16x128xbf16, #tpu.memory_space<vmem>>, vector<16x128xbf16>,
    } else {
    }
    return
  }
  func.func @transform_0(%arg0: i32, %arg1: i32, %arg2: i32) -> (i32, i32) {
    %c0_i32 = arith.constant 0 : i32
    return %arg0, %arg2 : i32, i32
  }
  func.func @transform_1(%arg0: i32, %arg1: i32, %arg2: i32) -> (i32, i32) {
    %c0_i32 = arith.constant 0 : i32
    return %arg2, %arg1 : i32, i32
  }
  func.func @transform_2(%arg0: i32, %arg1: i32, %arg2: i32) -> (i32, i32) {
    %c0_i32 = arith.constant 0 : i32
    %c0_i32_0 = arith.constant 0 : i32
    return %c0_i32, %arg1 : i32, i32
  }
  func.func @transform_3(%arg0: i32, %arg1: i32, %arg2: i32) -> (i32, i32) {
    %c0_i32 = arith.constant 0 : i32
    return %arg0, %arg1 : i32, i32
  }
}

module attributes {stable_mosaic.version = 11 : i64} {
  func.func @_matmul_bias_act_kernel(%arg0: i32, %arg1: i32, %arg2: i32, %arg3: memref<64x512xbf16, #tpu.memory_space<vmem>>, %arg4: memref<512x128xbf16, #tpu.memory_space<vmem>>, %arg5: memref<1x128xf32, #tpu.memory_space<vmem>>, %arg6: memref<64x128xbf16, #tpu.memory_space<vmem>>, %arg7: memref<64x128xf32, #tpu.memory_space<vmem>>) attributes {dimension_semantics = [#tpu.dimension_semantics<parallel>, #tpu.dimension_semantics<parallel>, #tpu.dimension_semantics<arbitrary>], iteration_bounds = array<i64: 1, 1, 1>, scalar_prefetch = 0 : i64, scratch_operands = 1 : i64, tpu.core_type = #tpu.core_type<tc>, window_params = [{transform_indices = @transform_0, window_bounds = array<i64: 64, 512>}, {transform_indices = @transform_1, window_bounds = array<i64: 512, 128>}, {transform_indices = @transform_2, window_bounds = array<i64: 1, 128>}, {transform_indices = @transform_3, window_bounds = array<i64: 64, 128>}]} {
    %c0_i32 = arith.constant 0 : i32
    %0 = arith.cmpi eq, %arg2, %c0_i32 : i32
    %1 = arith.extui %0 : i1 to i32
    %c0_i32_0 = arith.constant 0 : i32
    %2 = arith.cmpi ne, %1, %c0_i32_0 : i32
    scf.if %2 {
      %cst_10 = arith.constant 0.000000e+00 : f32
      %12 = vector.broadcast %cst_10 : f32 to vector<64x128xf32>
      %c0_11 = arith.constant 0 : index
      %c0_12 = arith.constant 0 : index
      %13 = vector.load %arg7[%c0_11, %c0_12] : memref<64x128xf32, #tpu.memory_space<vmem>>, vector<64x128xf32>
      tpu.vector_store %arg7[%c0_11, %c0_12], %12 {strides = array<i32>} : memref<64x128xf32, #tpu.memory_space<vmem>>, vector<64x128xf32>,
    } else {
    }
    %c0 = arith.constant 0 : index
    %c0_1 = arith.constant 0 : index
    %3 = vector.load %arg7[%c0, %c0_1] : memref<64x128xf32, #tpu.memory_space<vmem>>, vector<64x128xf32>
    %c0_2 = arith.constant 0 : index
    %c0_3 = arith.constant 0 : index
    %4 = vector.load %arg3[%c0_2, %c0_3] : memref<64x512xbf16, #tpu.memory_space<vmem>>, vector<64x512xbf16>
    %c0_4 = arith.constant 0 : index
    %c0_5 = arith.constant 0 : index
    %5 = vector.load %arg4[%c0_4, %c0_5] : memref<512x128xbf16, #tpu.memory_space<vmem>>, vector<512x128xbf16>
    %cst = arith.constant dense<0.000000e+00> : vector<64x128xf32>
    %6 = tpu.matmul %4, %5, %cst {dimension_numbers = #tpu.dot_dimension_numbers<[1], [0], [0], [1], [0, 0, 1, 1], [], []>} : vector<64x512xbf16>, vector<512x128xbf16>, vector<64x128xf32> -> vector<64x128xf32>
    %7 = arith.addf %3, %6 : vector<64x128xf32>
    %c0_6 = arith.constant 0 : index
    %c0_7 = arith.constant 0 : index
    %8 = vector.load %arg7[%c0_6, %c0_7] : memref<64x128xf32, #tpu.memory_space<vmem>>, vector<64x128xf32>
    tpu.vector_store %arg7[%c0_6, %c0_7], %7 {strides = array<i32>} : memref<64x128xf32, #tpu.memory_space<vmem>>, vector<64x128xf32>,
    %c0_i32_8 = arith.constant 0 : i32
    %9 = arith.cmpi eq, %arg2, %c0_i32_8 : i32
    %10 = arith.extui %9 : i1 to i32
    %c0_i32_9 = arith.constant 0 : i32
    %11 = arith.cmpi ne, %10, %c0_i32_9 : i32
    scf.if %11 {
      %c0_10 = arith.constant 0 : index
      %c0_11 = arith.constant 0 : index
      %12 = vector.load %arg7[%c0_10, %c0_11] : memref<64x128xf32, #tpu.memory_space<vmem>>, vector<64x128xf32>
      %c0_12 = arith.constant 0 : index
      %c0_13 = arith.constant 0 : index
      %13 = vector.load %arg5[%c0_12, %c0_13] : memref<1x128xf32, #tpu.memory_space<vmem>>, vector<1x128xf32>
      %14 = vector.broadcast %13 : vector<1x128xf32> to vector<64x128xf32>
      %15 = arith.addf %12, %14 : vector<64x128xf32>
      %cst_14 = arith.constant 0.000000e+00 : f32
      %16 = vector.broadcast %cst_14 : f32 to vector<64x128xf32>
      %17 = arith.cmpf oge, %15, %16 : vector<64x128xf32>
      %cst_15 = arith.constant 0.00999999977 : f32
      %18 = vector.broadcast %cst_15 : f32 to vector<64x128xf32>
      %19 = arith.mulf %18, %15 : vector<64x128xf32>
      %20 = arith.select %17, %15, %19 : vector<64x128xi1>, vector<64x128xf32>
      %21 = arith.truncf %20 : vector<64x128xf32> to vector<64x128xbf16>
      %c0_16 = arith.constant 0 : index
      %c0_17 = arith.constant 0 : index
      %22 = vector.load %arg6[%c0_16, %c0_17] : memref<64x128xbf16, #tpu.memory_space<vmem>>, vector<64x128xbf16>
      tpu.vector_store %arg6[%c0_16, %c0_17], %21 {strides = array<i32>} : memref<64x128xbf16, #tpu.memory_space<vmem>>, vector<64x128xbf16>,
    } else {
    }
    return
  }
  func.func @transform_0(%arg0: i32, %arg1: i32, %arg2: i32) -> (i32, i32) {
    %c0_i32 = arith.constant 0 : i32
    return %arg0, %arg2 : i32, i32
  }
  func.func @transform_1(%arg0: i32, %arg1: i32, %arg2: i32) -> (i32, i32) {
    %c0_i32 = arith.constant 0 : i32
    return %arg2, %arg1 : i32, i32
  }
  func.func @transform_2(%arg0: i32, %arg1: i32, %arg2: i32) -> (i32, i32) {
    %c0_i32 = arith.constant 0 : i32
    %c0_i32_0 = arith.constant 0 : i32
    return %c0_i32, %arg1 : i32, i32
  }
  func.func @transform_3(%arg0: i32, %arg1: i32, %arg2: i32) -> (i32, i32) {
    %c0_i32 = arith.constant 0 : i32
    return %arg0, %arg1 : i32, i32
  }
}

module attributes {stable_mosaic.version = 11 : i64} {
  func.func @_matmul_bias_act_kernel(%arg0: i32, %arg1: i32, %arg2: i32, %arg3: memref<256x512xbf16, #tpu.memory_space<vmem>>, %arg4: memref<512x128xbf16, #tpu.memory_space<vmem>>, %arg5: memref<1x128xf32, #tpu.memory_space<vmem>>, %arg6: memref<256x128xbf16, #tpu.memory_space<vmem>>, %arg7: memref<256x128xf32, #tpu.memory_space<vmem>>) attributes {dimension_semantics = [#tpu.dimension_semantics<parallel>, #tpu.dimension_semantics<parallel>, #tpu.dimension_semantics<arbitrary>], iteration_bounds = array<i64: 2, 1, 1>, scalar_prefetch = 0 : i64, scratch_operands = 1 : i64, tpu.core_type = #tpu.core_type<tc>, window_params = [{transform_indices = @transform_0, window_bounds = array<i64: 256, 512>}, {transform_indices = @transform_1, window_bounds = array<i64: 512, 128>}, {transform_indices = @transform_2, window_bounds = array<i64: 1, 128>}, {transform_indices = @transform_3, window_bounds = array<i64: 256, 128>}]} {
    %c0_i32 = arith.constant 0 : i32
    %0 = arith.cmpi eq, %arg2, %c0_i32 : i32
    %1 = arith.extui %0 : i1 to i32
    %c0_i32_0 = arith.constant 0 : i32
    %2 = arith.cmpi ne, %1, %c0_i32_0 : i32
    scf.if %2 {
      %cst_10 = arith.constant 0.000000e+00 : f32
      %12 = vector.broadcast %cst_10 : f32 to vector<256x128xf32>
      %c0_11 = arith.constant 0 : index
      %c0_12 = arith.constant 0 : index
      %13 = vector.load %arg7[%c0_11, %c0_12] : memref<256x128xf32, #tpu.memory_space<vmem>>, vector<256x128xf32>
      tpu.vector_store %arg7[%c0_11, %c0_12], %12 {strides = array<i32>} : memref<256x128xf32, #tpu.memory_space<vmem>>, vector<256x128xf32>,
    } else {
    }
    %c0 = arith.constant 0 : index
    %c0_1 = arith.constant 0 : index
    %3 = vector.load %arg7[%c0, %c0_1] : memref<256x128xf32, #tpu.memory_space<vmem>>, vector<256x128xf32>
    %c0_2 = arith.constant 0 : index
    %c0_3 = arith.constant 0 : index
    %4 = vector.load %arg3[%c0_2, %c0_3] : memref<256x512xbf16, #tpu.memory_space<vmem>>, vector<256x512xbf16>
    %c0_4 = arith.constant 0 : index
    %c0_5 = arith.constant 0 : index
    %5 = vector.load %arg4[%c0_4, %c0_5] : memref<512x128xbf16, #tpu.memory_space<vmem>>, vector<512x128xbf16>
    %cst = arith.constant dense<0.000000e+00> : vector<256x128xf32>
    %6 = tpu.matmul %4, %5, %cst {dimension_numbers = #tpu.dot_dimension_numbers<[1], [0], [0], [1], [0, 0, 1, 1], [], []>} : vector<256x512xbf16>, vector<512x128xbf16>, vector<256x128xf32> -> vector<256x128xf32>
    %7 = arith.addf %3, %6 : vector<256x128xf32>
    %c0_6 = arith.constant 0 : index
    %c0_7 = arith.constant 0 : index
    %8 = vector.load %arg7[%c0_6, %c0_7] : memref<256x128xf32, #tpu.memory_space<vmem>>, vector<256x128xf32>
    tpu.vector_store %arg7[%c0_6, %c0_7], %7 {strides = array<i32>} : memref<256x128xf32, #tpu.memory_space<vmem>>, vector<256x128xf32>,
    %c0_i32_8 = arith.constant 0 : i32
    %9 = arith.cmpi eq, %arg2, %c0_i32_8 : i32
    %10 = arith.extui %9 : i1 to i32
    %c0_i32_9 = arith.constant 0 : i32
    %11 = arith.cmpi ne, %10, %c0_i32_9 : i32
    scf.if %11 {
      %c0_10 = arith.constant 0 : index
      %c0_11 = arith.constant 0 : index
      %12 = vector.load %arg7[%c0_10, %c0_11] : memref<256x128xf32, #tpu.memory_space<vmem>>, vector<256x128xf32>
      %c0_12 = arith.constant 0 : index
      %c0_13 = arith.constant 0 : index
      %13 = vector.load %arg5[%c0_12, %c0_13] : memref<1x128xf32, #tpu.memory_space<vmem>>, vector<1x128xf32>
      %14 = vector.broadcast %13 : vector<1x128xf32> to vector<256x128xf32>
      %15 = arith.addf %12, %14 : vector<256x128xf32>
      %cst_14 = arith.constant 0.000000e+00 : f32
      %16 = vector.broadcast %cst_14 : f32 to vector<256x128xf32>
      %17 = arith.cmpf oge, %15, %16 : vector<256x128xf32>
      %cst_15 = arith.constant 0.00999999977 : f32
      %18 = vector.broadcast %cst_15 : f32 to vector<256x128xf32>
      %19 = arith.mulf %18, %15 : vector<256x128xf32>
      %20 = arith.select %17, %15, %19 : vector<256x128xi1>, vector<256x128xf32>
      %21 = arith.truncf %20 : vector<256x128xf32> to vector<256x128xbf16>
      %c0_16 = arith.constant 0 : index
      %c0_17 = arith.constant 0 : index
      %22 = vector.load %arg6[%c0_16, %c0_17] : memref<256x128xbf16, #tpu.memory_space<vmem>>, vector<256x128xbf16>
      tpu.vector_store %arg6[%c0_16, %c0_17], %21 {strides = array<i32>} : memref<256x128xbf16, #tpu.memory_space<vmem>>, vector<256x128xbf16>,
    } else {
    }
    return
  }
  func.func @transform_0(%arg0: i32, %arg1: i32, %arg2: i32) -> (i32, i32) {
    %c0_i32 = arith.constant 0 : i32
    return %arg0, %arg2 : i32, i32
  }
  func.func @transform_1(%arg0: i32, %arg1: i32, %arg2: i32) -> (i32, i32) {
    %c0_i32 = arith.constant 0 : i32
    return %arg2, %arg1 : i32, i32
  }
  func.func @transform_2(%arg0: i32, %arg1: i32, %arg2: i32) -> (i32, i32) {
    %c0_i32 = arith.constant 0 : i32
    %c0_i32_0 = arith.constant 0 : i32
    return %c0_i32, %arg1 : i32, i32
  }
  func.func @transform_3(%arg0: i32, %arg1: i32, %arg2: i32) -> (i32, i32) {
    %c0_i32 = arith.constant 0 : i32
    return %arg0, %arg1 : i32, i32
  }
}

module attributes {stable_mosaic.version = 11 : i64} {
  func.func @_matmul_bias_act_kernel(%arg0: i32, %arg1: i32, %arg2: i32, %arg3: memref<256x256xbf16, #tpu.memory_space<vmem>>, %arg4: memref<256x128xbf16, #tpu.memory_space<vmem>>, %arg5: memref<1x128xf32, #tpu.memory_space<vmem>>, %arg6: memref<256x128xf32, #tpu.memory_space<vmem>>, %arg7: memref<256x128xf32, #tpu.memory_space<vmem>>) attributes {dimension_semantics = [#tpu.dimension_semantics<parallel>, #tpu.dimension_semantics<parallel>, #tpu.dimension_semantics<arbitrary>], iteration_bounds = array<i64: 16, 1, 1>, scalar_prefetch = 0 : i64, scratch_operands = 1 : i64, tpu.core_type = #tpu.core_type<tc>, window_params = [{transform_indices = @transform_0, window_bounds = array<i64: 256, 256>}, {transform_indices = @transform_1, window_bounds = array<i64: 256, 128>}, {transform_indices = @transform_2, window_bounds = array<i64: 1, 128>}, {transform_indices = @transform_3, window_bounds = array<i64: 256, 128>}]} {
    %c0_i32 = arith.constant 0 : i32
    %0 = arith.cmpi eq, %arg2, %c0_i32 : i32
    %1 = arith.extui %0 : i1 to i32
    %c0_i32_0 = arith.constant 0 : i32
    %2 = arith.cmpi ne, %1, %c0_i32_0 : i32
    scf.if %2 {
      %cst_10 = arith.constant 0.000000e+00 : f32
      %12 = vector.broadcast %cst_10 : f32 to vector<256x128xf32>
      %c0_11 = arith.constant 0 : index
      %c0_12 = arith.constant 0 : index
      %13 = vector.load %arg7[%c0_11, %c0_12] : memref<256x128xf32, #tpu.memory_space<vmem>>, vector<256x128xf32>
      tpu.vector_store %arg7[%c0_11, %c0_12], %12 {strides = array<i32>} : memref<256x128xf32, #tpu.memory_space<vmem>>, vector<256x128xf32>,
    } else {
    }
    %c0 = arith.constant 0 : index
    %c0_1 = arith.constant 0 : index
    %3 = vector.load %arg7[%c0, %c0_1] : memref<256x128xf32, #tpu.memory_space<vmem>>, vector<256x128xf32>
    %c0_2 = arith.constant 0 : index
    %c0_3 = arith.constant 0 : index
    %4 = vector.load %arg3[%c0_2, %c0_3] : memref<256x256xbf16, #tpu.memory_space<vmem>>, vector<256x256xbf16>
    %c0_4 = arith.constant 0 : index
    %c0_5 = arith.constant 0 : index
    %5 = vector.load %arg4[%c0_4, %c0_5] : memref<256x128xbf16, #tpu.memory_space<vmem>>, vector<256x128xbf16>
    %cst = arith.constant dense<0.000000e+00> : vector<256x128xf32>
    %6 = tpu.matmul %4, %5, %cst {dimension_numbers = #tpu.dot_dimension_numbers<[1], [0], [0], [1], [0, 0, 1, 1], [], []>} : vector<256x256xbf16>, vector<256x128xbf16>, vector<256x128xf32> -> vector<256x128xf32>
    %7 = arith.addf %3, %6 : vector<256x128xf32>
    %c0_6 = arith.constant 0 : index
    %c0_7 = arith.constant 0 : index
    %8 = vector.load %arg7[%c0_6, %c0_7] : memref<256x128xf32, #tpu.memory_space<vmem>>, vector<256x128xf32>
    tpu.vector_store %arg7[%c0_6, %c0_7], %7 {strides = array<i32>} : memref<256x128xf32, #tpu.memory_space<vmem>>, vector<256x128xf32>,
    %c0_i32_8 = arith.constant 0 : i32
    %9 = arith.cmpi eq, %arg2, %c0_i32_8 : i32
    %10 = arith.extui %9 : i1 to i32
    %c0_i32_9 = arith.constant 0 : i32
    %11 = arith.cmpi ne, %10, %c0_i32_9 : i32
    scf.if %11 {
      %c0_10 = arith.constant 0 : index
      %c0_11 = arith.constant 0 : index
      %12 = vector.load %arg7[%c0_10, %c0_11] : memref<256x128xf32, #tpu.memory_space<vmem>>, vector<256x128xf32>
      %c0_12 = arith.constant 0 : index
      %c0_13 = arith.constant 0 : index
      %13 = vector.load %arg5[%c0_12, %c0_13] : memref<1x128xf32, #tpu.memory_space<vmem>>, vector<1x128xf32>
      %14 = vector.broadcast %13 : vector<1x128xf32> to vector<256x128xf32>
      %15 = arith.addf %12, %14 : vector<256x128xf32>
      %16 = arith.negf %15 : vector<256x128xf32>
      %17 = math.exp %16 : vector<256x128xf32>
      %cst_14 = arith.constant 1.000000e+00 : f32
      %18 = vector.broadcast %cst_14 : f32 to vector<256x128xf32>
      %19 = arith.addf %18, %17 : vector<256x128xf32>
      %20 = arith.divf %18, %19 : vector<256x128xf32>
      %c0_15 = arith.constant 0 : index
      %c0_16 = arith.constant 0 : index
      %21 = vector.load %arg6[%c0_15, %c0_16] : memref<256x128xf32, #tpu.memory_space<vmem>>, vector<256x128xf32>
      tpu.vector_store %arg6[%c0_15, %c0_16], %20 {strides = array<i32>} : memref<256x128xf32, #tpu.memory_space<vmem>>, vector<256x128xf32>,
    } else {
    }
    return
  }
  func.func @transform_0(%arg0: i32, %arg1: i32, %arg2: i32) -> (i32, i32) {
    %c0_i32 = arith.constant 0 : i32
    return %arg0, %arg2 : i32, i32
  }
  func.func @transform_1(%arg0: i32, %arg1: i32, %arg2: i32) -> (i32, i32) {
    %c0_i32 = arith.constant 0 : i32
    return %arg2, %arg1 : i32, i32
  }
  func.func @transform_2(%arg0: i32, %arg1: i32, %arg2: i32) -> (i32, i32) {
    %c0_i32 = arith.constant 0 : i32
    %c0_i32_0 = arith.constant 0 : i32
    return %c0_i32, %arg1 : i32, i32
  }
  func.func @transform_3(%arg0: i32, %arg1: i32, %arg2: i32) -> (i32, i32) {
    %c0_i32 = arith.constant 0 : i32
    return %arg0, %arg1 : i32, i32
  }
}

</mosaic_0001>

<bundles_post_ra>
// kernel: video_decoder_forward.5
= control target key start
LH: loop header
LB: loop body
LE: loop exit
PB: predicated region body
PF: predicated region fallthrough
CT: control target
= control target key end

     0   :  { %10 = vsyncpa [#allocation3], 0  ;;  %s406_s18 = smov [#allocation2]   ;;  %s511_s0 = inlined_call_operand.vmem [shape: bf16[16,128], index: 0, kind: input, shape index: {}]   ;;  %s512_s1 = inlined_call_operand.vmem [shape: bf16[128,128], index: 1, kind: input, shape index: {}]   ;;  %s513_s2 = inlined_call_operand.vmem [shape: f32[1,128], index: 2, kind: input, shape index: {}]   ;;  %s514_s3 = inlined_call_operand.vmem [shape: bf16[128,128], index: 3, kind: input, shape index: {}]   ;;  %s515_s4 = inlined_call_operand.hbm [shape: f32[1,128], index: 4, kind: input, shape index: {}]   ;;  %s516_s5 = inlined_call_operand.vmem [shape: f32[16,128], index: 5, kind: output, shape index: {}]  }
   0x1   :  { %s25_s19 = sshll.u32 %s406_s18, 4  ;;  %s382_s22 = scalar_lea.hbm %s515_s4, 16  ;;  %s26_s19 = int_to_ptr.vmem [resolvable:$true] %s25_s19 }
   0x2   :  { %p383_p0 = scmp.ne.s32.totalorder %s515_s4, %s382_s22  ;;  %p386_p1 = scmp.lt.u32.totalorder %s382_s22, %s515_s4 }
   0x4   :  { %p388_p2 = pnand %p386_p1, %p383_p0 }
   0x6   :  { %391 = shalt.err (!%p388_p2)
}
   0x7   :  { %s392_s27 = scalar_lea.vmem %s26_s19, 16  ;;  %s396_s28 = scalar_lea.vmem %s26_s19, 32 }
   0x8   :  { %p393_p3 = scmp.ne.s32.totalorder %s26_s19, %s392_s27  ;;  %p397_p4 = scmp.lt.s32.totalorder %s26_s19, %s26_s19 }
   0x9   :  { %p398_p5 = scmp.lt.s32.totalorder %s396_s28, %s392_s27 }
   0xb   :  { %p399_p6 = por %p398_p5, %p397_p4 }
   0xd   :  { %p400_p7 = pnand %p399_p6, %p393_p3 }
   0xf   :  { %403 = shalt.err (!%p400_p7)
}
  0x10   :  { %28 = dma.hbm_to_vmem [thread:$0]  %s515_s4, 16, %s26_s19, [#allocation3]  }
  0x11   :  { %404 = dma.done.wait [#allocation3], 16  }
  0x12   :  { %405 = vsyncadd [#allocation3], 4294967280  ;;  %v407_v0 = vmov 0.0   ;;  %vm408_vm0 = vmmov 0   ;;  %v365_v1 = vld [vmem:[%s512_s1] sm:$0xff]   ;;  %v366_v2 = vld [vmem:[%s512_s1 + $0x8] sm:$0xff]  }
  0x13   :  { %322 = vmatprep.subr.bf16.mxu0 %v407_v0  ;;  %338 = vmatprep.mubr.msk.bf16.mxu0 %vm408_vm0, %v407_v0  ;;  %v367_v3 = vld [vmem:[%s512_s1 + $0x10] sm:$0xff]   ;;  %v374_v4 = vld [vmem:[%s514_s3] sm:$0xff]   ;;  %v368_v5 = vld [vmem:[%s512_s1 + $0x18] sm:$0xff]  }
  0x14   :  { %342 = vmatprep.subr.bf16.mxu1 %v407_v0  ;;  %358 = vmatprep.mubr.msk.bf16.mxu1 %vm408_vm0, %v407_v0  ;;  %v375_v6 = vld [vmem:[%s514_s3 + $0x8] sm:$0xff]   ;;  %v369_v7 = vld [vmem:[%s512_s1 + $0x20] sm:$0xff]   ;;  %v376_v8 = vld [vmem:[%s514_s3 + $0x10] sm:$0xff]  }
  0x15   :  { %323 = vmatpush3.bf16.msra.mxu0 %v365_v1  ;;  %343 = vmatpush3.bf16.msra.mxu1 %v374_v4  ;;  %v370_v9 = vld [vmem:[%s512_s1 + $0x28] sm:$0xff]   ;;  %v377_v10 = vld [vmem:[%s514_s3 + $0x18] sm:$0xff]   ;;  %v371_v11 = vld [vmem:[%s512_s1 + $0x30] sm:$0xff]  }
  0x16   :  { %324 = vmatprep.subr.bf16.mxu0 %v407_v0  ;;  %344 = vmatprep.subr.bf16.mxu1 %v407_v0  ;;  %v378_v12 = vld [vmem:[%s514_s3 + $0x20] sm:$0xff]   ;;  %v372_v13 = vld [vmem:[%s512_s1 + $0x38] sm:$0xff]   ;;  %v379_v14 = vld [vmem:[%s514_s3 + $0x28] sm:$0xff]  }
  0x17   :  { %v373_v15 = vld [vmem:[%s511_s0] sm:$0xff]   ;;  %v380_v16 = vld [vmem:[%s514_s3 + $0x30] sm:$0xff]   ;;  %v381_v17 = vld [vmem:[%s514_s3 + $0x38] sm:$0xff]  }
  0x18   :  { %v285_v18 = vld [vmem:[%s513_s2] ss:$0 sm:$0xff] }
  0x19   :  { %325 = vmatpush3.bf16.msra.mxu0 %v366_v2  ;;  %345 = vmatpush3.bf16.msra.mxu1 %v375_v6  ;;  %v295_v30 = vld [vmem:[#allocation2] ss:$0 sm:$0xff] }
  0x1a   :  { %326 = vmatprep.subr.bf16.mxu0 %v407_v0  ;;  %346 = vmatprep.subr.bf16.mxu1 %v407_v0 }
  0x1d   :  { %327 = vmatpush3.bf16.msra.mxu0 %v367_v3  ;;  %347 = vmatpush3.bf16.msra.mxu1 %v376_v8 }
  0x1e   :  { %328 = vmatprep.subr.bf16.mxu0 %v407_v0  ;;  %348 = vmatprep.subr.bf16.mxu1 %v407_v0 }
  0x21   :  { %329 = vmatpush3.bf16.msra.mxu0 %v368_v5  ;;  %349 = vmatpush3.bf16.msra.mxu1 %v377_v10 }
  0x22   :  { %330 = vmatprep.subr.bf16.mxu0 %v407_v0  ;;  %350 = vmatprep.subr.bf16.mxu1 %v407_v0 }
  0x25   :  { %331 = vmatpush3.bf16.msra.mxu0 %v369_v7  ;;  %351 = vmatpush3.bf16.msra.mxu1 %v378_v12 }
  0x26   :  { %332 = vmatprep.subr.bf16.mxu0 %v407_v0  ;;  %352 = vmatprep.subr.bf16.mxu1 %v407_v0 }
  0x29   :  { %333 = vmatpush3.bf16.msra.mxu0 %v370_v9  ;;  %353 = vmatpush3.bf16.msra.mxu1 %v379_v14 }
  0x2a   :  { %334 = vmatprep.subr.bf16.mxu0 %v407_v0  ;;  %354 = vmatprep.subr.bf16.mxu1 %v407_v0 }
  0x2d   :  { %335 = vmatpush3.bf16.msra.mxu0 %v371_v11  ;;  %355 = vmatpush3.bf16.msra.mxu1 %v380_v16 }
  0x2e   :  { %336 = vmatprep.subr.bf16.mxu0 %v407_v0  ;;  %356 = vmatprep.subr.bf16.mxu1 %v407_v0 }
  0x31   :  { %337 = vmatpush3.bf16.msra.mxu0 %v372_v13  ;;  %357 = vmatpush3.bf16.msra.mxu1 %v381_v17 }
  0x34   :  { %339 = vmatmul.mubr.bf16.vlgmr.msra.gmra.mrb[0].mxu0 %v373_v15 }
 0x107   :  { %v146_v19 = vpop.f32.mrb[0].mxu0 }
 0x108   :  { %v147_v20 = vadd.f32 %v285_v18, %v146_v19  ;;  %v340_v21 = vpop.f32.mrb[1].mxu0 }
 0x109   :  { %v149_v22 = vpop.f32.mrb[2].mxu0 }
 0x10a   :  { %v155_v23 = vmul.f32 0.01, %v147_v20  ;;  %v150_v24 = vadd.f32 %v285_v18, %v149_v22  ;;  %v341_v25 = vpop.f32.mrb[3].mxu0  ;;  %vm153_vm1 = vcmp.ge.f32.partialorder %v147_v20, 0.0 }
 0x10c   :  { %vm154_vm2 = vcmp.ge.f32.partialorder %v150_v24, 0.0  ;;  %v156_v26 = vmul.f32 0.01, %v150_v24  ;;  %v157_v27 = vsel %vm153_vm1, %v147_v20, %v155_v23 }
 0x10e   :  { %v158_v28 = vsel %vm154_vm2, %v150_v24, %v156_v26 }
 0x10f   :  { %v159_v29 = vpack.c.bf16 %v158_v28, %v157_v27 }
 0x111   :  { %359 = vmatmul.mubr.bf16.vlgmr.msra.gmra.mrb[0].mxu1 %v159_v29 }
 0x1e4   :  { %v265_v31 = vpop.f32.mrb[0].mxu1 }
 0x1e5   :  { %v266_v32 = vadd.f32 %v295_v30, %v265_v31  ;;  %v360_v33 = vpop.f32.mrb[1].mxu1 }
 0x1e6   :  { %v268_v34 = vpop.f32.mrb[2].mxu1 }
 0x1e7   :  { %vm272_vm3 = vcmp.ge.f32.partialorder %v266_v32, 0.0  ;;  %v274_v35 = vmul.f32 0.01, %v266_v32  ;;  %v269_v36 = vadd.f32 %v295_v30, %v268_v34  ;;  %v361_v37 = vpop.f32.mrb[3].mxu1 }
 0x1e9   :  { %v276_v38 = vsel %vm272_vm3, %v266_v32, %v274_v35  ;;  %vm273_vm4 = vcmp.ge.f32.partialorder %v269_v36, 0.0  ;;  %v275_v39 = vmul.f32 0.01, %v269_v36 }
 0x1ea   :  { %278 = vst [vmem:[%s516_s5] sm:$0xff] %v276_v38 }
 0x1eb   :  { %v277_v40 = vsel %vm273_vm4, %v269_v36, %v275_v39 }
 0x1ec   :  { %279 = vst [vmem:[%s516_s5 + $0x8] sm:$0xff] %v277_v40 }
 0x1ed   :  { %284 = vsyncpa [#allocation3], 1 }

// kernel: video_decoder_forward.6
= control target key start
LH: loop header
LB: loop body
LE: loop exit
PB: predicated region body
PF: predicated region fallthrough
CT: control target
= control target key end

     0   :  { %8 = vsyncpa [#allocation5], 0  ;;  %s1097_s12 = smov 0   ;;  %s1099_s13 = smov 0   ;;  %s1252_s0 = inlined_call_operand.vmem [shape: bf16[16,1024], index: 0, kind: input, shape index: {}]   ;;  %s1253_s1 = inlined_call_operand.vmem [shape: bf16[1024,128], index: 1, kind: input, shape index: {}]   ;;  %s1254_s2 = inlined_call_operand.hbm [shape: f32[1,128], index: 2, kind: input, shape index: {}]   ;;  %s1255_s3 = inlined_call_operand.vmem [shape: bf16[16,128], index: 3, kind: output, shape index: {}]  }
   0x1   :  { %s1101_s14 = smov 0   ;;  %s1103_s15 = smov 0  }
   0x2   :  { %s1105_s16 = smov 0  }
   0x3 LB: > { %s804_s17 = sadd.s32 4294967295, %s1073_s16   ;;  %s26_s18 = sadd.s32 1, %s1069_s15  ;;  %s1073_s16 = sphi %s1105_s16, %s14_s16   ;;  %s1069_s15 = sphi %s1103_s15, %s1269_s15   ;;  %s1065_s14 = sphi %s1101_s14, %s1268_s14   ;;  %s1061_s13 = sphi %s1099_s13, %s1267_s13   ;;  %s1057_s12 = sphi %s1097_s12, %s1266_s12  }
   0x4   : > { %p27_p0 = scmp.ge.s32.totalorder %s26_s18, 2  ;;  %s42_s19 = sadd.s32 1, %s1061_s13 }
   0x5   : > { %p49_p1 = scmp.ne.s32.totalorder %s1061_s13, %s1057_s12  ;;  %p50_p2 = scmp.eq.s32.totalorder %s1073_s16, 0 }
   0x6   : > { %s1271_s18 = smov (%p27_p0, %s26_s18), 0  ;;  %p805_p4 = scmp.ge.s32.totalorder %s1073_s16, 1 }
   0x7   : > { %p1130_p3 = por %p50_p2, %p49_p1  ;;  %s38_s21 = ssub.s32 %s1069_s15, %s1271_s18 }
   0x8   : > { %p148_p5 = scmp.lt.s32.totalorder %s1073_s16, 3  ;;  %p40_p6 = scmp.eq.s32.totalorder %s38_s21, 0 }
   0x9   : > { %s1259_s20 = scalar_select %p1130_p3, 1, 0 }
   0xa   : > { %p1138_p7 = pnand %p805_p4, %p148_p5  ;;  %p1142_p8 = scmp.eq.s32.totalorder %s804_s17, 0 }
   0xb   : > { %s1147_s24 = scalar_select %p40_p6, %s1061_s13, %s42_s19  }
   0xc   : > { %s1260_s22 = scalar_select %p1138_p7, 1, 0 }
   0xd   : > { %s1261_s23 = scalar_select %p1142_p8, 1, 0 }
   0xe   : > { %p917_p9 = pneg %p1138_p7  ;;  %s1075_s25 = smov [#allocation4]  }
   0xf   : > { %s163_s26 = sshll.u32 %s1075_s25, 4  ;;  %s1003_s30 = scalar_lea.hbm %s1254_s2, 16  ;;  %s164_s26 = int_to_ptr.vmem [resolvable:$true] %s163_s26 }
  0x10   : > { %p1153_p10 = pnand %p1142_p8, %p917_p9  ;;  %p1004_p11 = scmp.ne.s32.totalorder %s1254_s2, %s1003_s30 }
  0x11   : > { %p1010_p1 = scmp.lt.u32.totalorder %s1003_s30, %s1254_s2 }
  0x12   : > { %p1005_p12 = pneg %p1153_p10 }
  0x14   : > { %p1006_p13 = pnand %p1005_p12, %p1004_p11 }
  0x16   : > { %p1007_p0 = pneg %p1006_p13 }
  0x18   : > { %p1012_p2 = pnand %p1010_p1, %p1007_p0 }
  0x1a   : > { %1015 = shalt.err (!%p1012_p2)
}
  0x1b   : > { %s1016_s8 = scalar_lea.vmem %s164_s26, 16  ;;  %s1023_s9 = scalar_lea.vmem %s164_s26, 32 }
  0x1c   : > { %p1017_p4 = scmp.ne.s32.totalorder %s164_s26, %s1016_s8  ;;  %p1024_p9 = scmp.lt.s32.totalorder %s164_s26, %s164_s26 }
  0x1d   : > { %p1025_p8 = scmp.lt.s32.totalorder %s1023_s9, %s1016_s8 }
  0x1e   : > { %p1019_p5 = pnand %p1017_p4, %p1005_p12 }
  0x1f   : > { %p1026_p7 = por %p1025_p8, %p1024_p9 }
  0x20   : > { %p1020_p6 = pneg %p1019_p5 }
  0x22   : > { %p1027_p3 = pnand %p1026_p7, %p1020_p6 }
  0x24   : > { %1030 = shalt.err (!%p1027_p3)
}
  0x25   : > { %920 = dma.hbm_to_vmem [thread:$0]  (!%p1153_p10), %s1254_s2, 16, %s164_s26, [#allocation5]  }
  0x26   : > { %p807_p11 = scmp.ge.s32.totalorder %s1073_s16, 2 }
  0x27   : > { %p1263_p13 = scmp.ne.s32.totalorder (!%p807_p11), %s1259_s20, 0 }
  0x28   : > { %170 = sbr.rel (%p807_p11) target bundleno = 54 (0x36), region = 20 }
  0x2f   : > { %173 = sbr.rel (!%p1263_p13) target bundleno = 54 (0x36), region = 24  ;;  %s175_s17 = sand.u32 (%p1263_p13), 1, %s1061_s13  }
  0x30   : > { %s861_s19 = sshll.u32 (%p1263_p13), %s1069_s15, 4  ;;  %s808_s21 = sshll.u32 (%p1263_p13), %s175_s17, 5 }
  0x31   : > { %s183_s29 = scalar_lea.vmem (%p1263_p13), %s1252_s0, %s861_s19  ;;  %s177_s27 = scalar_lea.vmem (%p1263_p13), [#allocation3], %s808_s21 }
  0x32   : > { %v196_v0 = vld [vmem:[%s183_s29] sm:$0xff] (%p1263_p13)  ;;  %v198_v1 = vld [vmem:[%s183_s29 + $0x8] sm:$0xff] (%p1263_p13) }
  0x33   : > { %v200_v2 = vld [vmem:[%s183_s29 + $0x20] sm:$0xff] (%p1263_p13)  ;;  %197 = vst [vmem:[%s177_s27] sm:$0xff] (%p1263_p13), %v196_v0  ;;  %199 = vst [vmem:[%s177_s27 + $0x8] sm:$0xff] (%p1263_p13), %v198_v1  ;;  %v202_v3 = vld [vmem:[%s183_s29 + $0x28] sm:$0xff] (%p1263_p13) }
  0x34   : > { %201 = vst [vmem:[%s177_s27 + $0x10] sm:$0xff] (%p1263_p13), %v200_v2  ;;  %203 = vst [vmem:[%s177_s27 + $0x18] sm:$0xff] (%p1263_p13), %v202_v3 }
  0x36 PF: > { %p1264_p3 = scmp.ne.s32.totalorder %s1260_s22, 0 }
  0x37   : > { %s227_s20 = sand.u32 (!%p1264_p3), 1, %s1057_s12   ;;  %p1265_p7 = scmp.ne.s32.totalorder (!%p1264_p3), %s1261_s23, 0 }
  0x38   : > { %224 = sbr.rel (%p1264_p3) target bundleno = 345 (0x159), region = 51  ;;  %s812_s26 = sshll.u32 (!%p1264_p3), %s227_s20, 5 }
  0x39   : > { %s1184_s30 = scalar_lea.vmem (!%p1264_p3), [#allocation3], %s812_s26 }
  0x3f   : > { %1052 = dma.done.wait (%p1265_p7), [#allocation5], 16  }
  0x40   : > { %1054 = vsyncadd (%p1265_p7), [#allocation5], 4294967280  ;;  %s814_s4 = sshll.u32 %s1065_s14, 6  ;;  %p816_p10 = scmp.ne.s32.totalorder %s1065_s14, 0 }
  0x41   : > { %p268_p8 = scmp.lt.s32.totalorder %s814_s4, 127  ;;  %v1076_v4 = vmov (!%p816_p10), 0.0  }
  0x42   : > { %289 = sbr.rel (%p816_p10) target bundleno = 73 (0x49), region = 63  ;;  %290 = vst [vmem:[#allocation2] sm:$0xff] (!%p816_p10), %v1076_v4  ;;  %291 = vst [vmem:[#allocation2 + $0x8] sm:$0xff] (!%p816_p10), %v1076_v4 }
  0x43   : > { %s1273_s4 = smov (!%p268_p8, %s814_s4), 127 }
  0x44   : > { %s815_s5 = sshll.u32 %s1273_s4, 2 }
  0x45   : > { %s1194_s22 = scalar_lea.vmem %s1253_s1, %s815_s5 }
  0x49 PF: > { %v965_v5 = vld [vmem:[%s1194_s22 + $0x40] sm:$0xff]   ;;  %v969_v9 = vld [vmem:[%s1194_s22 + $0x48] sm:$0xff]   ;;  %v973_v13 = vld [vmem:[%s1194_s22 + $0x50] sm:$0xff]   ;;  %p853_p12 = scmp.ne.s32.totalorder %s1065_s14, 1 }
  0x4a   : > { %v966_v6 = vld [vmem:[%s1194_s22 + $0xc0] sm:$0xff]   ;;  %869 = vmatprep.subr.bf16.mxu0 %v965_v5  ;;  %v970_v10 = vld [vmem:[%s1194_s22 + $0xc8] sm:$0xff]   ;;  %v974_v14 = vld [vmem:[%s1194_s22 + $0xd0] sm:$0xff]  }
  0x4b   : > { %v967_v7 = vld [vmem:[%s1194_s22] sm:$0xff]   ;;  %891 = vmatprep.subr.bf16.mxu1 %v966_v6  ;;  %v971_v11 = vld [vmem:[%s1194_s22 + $0x8] sm:$0xff]   ;;  %v975_v15 = vld [vmem:[%s1194_s22 + $0x10] sm:$0xff]  }
  0x4c   : > { %v968_v8 = vld [vmem:[%s1194_s22 + $0x80] sm:$0xff]   ;;  %870 = vmatpush3.bf16.msra.mxu0 %v967_v7  ;;  %v972_v12 = vld [vmem:[%s1194_s22 + $0x88] sm:$0xff]   ;;  %v976_v16 = vld [vmem:[%s1194_s22 + $0x90] sm:$0xff]  }
  0x4d   : > { %892 = vmatpush3.bf16.msra.mxu1 %v968_v8  ;;  %871 = vmatprep.subr.bf16.mxu0 %v969_v9  ;;  %v977_v17 = vld [vmem:[%s1194_s22 + $0x58] sm:$0xff]   ;;  %v981_v21 = vld [vmem:[%s1194_s22 + $0x60] sm:$0xff]   ;;  %v985_v25 = vld [vmem:[%s1194_s22 + $0x68] sm:$0xff]  }
  0x4e   : > { %893 = vmatprep.subr.bf16.mxu1 %v970_v10  ;;  %v978_v18 = vld [vmem:[%s1194_s22 + $0xd8] sm:$0xff]   ;;  %v982_v22 = vld [vmem:[%s1194_s22 + $0xe0] sm:$0xff]   ;;  %v986_v26 = vld [vmem:[%s1194_s22 + $0xe8] sm:$0xff]  }
  0x4f   : > { %v979_v19 = vld [vmem:[%s1194_s22 + $0x18] sm:$0xff]   ;;  %v983_v23 = vld [vmem:[%s1194_s22 + $0x20] sm:$0xff]   ;;  %v987_v27 = vld [vmem:[%s1194_s22 + $0x28] sm:$0xff]  }
  0x50   : > { %872 = vmatpush3.bf16.msra.mxu0 %v971_v11  ;;  %v980_v20 = vld [vmem:[%s1194_s22 + $0x98] sm:$0xff]   ;;  %v984_v24 = vld [vmem:[%s1194_s22 + $0xa0] sm:$0xff]   ;;  %v988_v28 = vld [vmem:[%s1194_s22 + $0xa8] sm:$0xff]  }
  0x51   : > { %894 = vmatpush3.bf16.msra.mxu1 %v972_v12  ;;  %873 = vmatprep.subr.bf16.mxu0 %v973_v13  ;;  %v989_v29 = vld [vmem:[%s1194_s22 + $0x70] sm:$0xff]   ;;  %v993_v33 = vld [vmem:[%s1194_s22 + $0x78] sm:$0xff]   ;;  %v292_v50 = vld [vmem:[#allocation2] sm:$0xff] }
  0x52   : > { %895 = vmatprep.subr.bf16.mxu1 %v974_v14  ;;  %v990_v30 = vld [vmem:[%s1194_s22 + $0xf0] sm:$0xff]   ;;  %v994_v34 = vld [vmem:[%s1194_s22 + $0xf8] sm:$0xff]   ;;  %v293_v55 = vld [vmem:[#allocation2 + $0x8] sm:$0xff] }
  0x53   : > { %v991_v31 = vld [vmem:[%s1194_s22 + $0x30] sm:$0xff]   ;;  %v995_v35 = vld [vmem:[%s1194_s22 + $0x38] sm:$0xff]  }
  0x54   : > { %874 = vmatpush3.bf16.msra.mxu0 %v975_v15  ;;  %v992_v32 = vld [vmem:[%s1194_s22 + $0xb0] sm:$0xff]   ;;  %v996_v36 = vld [vmem:[%s1194_s22 + $0xb8] sm:$0xff]  }
  0x55   : > { %896 = vmatpush3.bf16.msra.mxu1 %v976_v16  ;;  %875 = vmatprep.subr.bf16.mxu0 %v977_v17  ;;  %v997_v37 = vld [vmem:[%s1184_s30] ss:$16 sps:$4 sm:$0xff]   ;;  %v999_v38 = vld [vmem:[%s1184_s30 + $0x4] ss:$16 sps:$4 sm:$0xff]   ;;  %v1000_v39 = vld [vmem:[%s1184_s30 + $0x8] ss:$16 sps:$4 sm:$0xff]  }
  0x56   : > { %897 = vmatprep.subr.bf16.mxu1 %v978_v18  ;;  %v1002_v40 = vld [vmem:[%s1184_s30 + $0xc] ss:$16 sps:$4 sm:$0xff]   ;;  %606 = vmatprep.mubr.bf16.mxu0 %v999_v38  ;;  %v854_v61 = vld [vmem:[#allocation4] ss:$0 sm:$0xff] (!%p853_p12) }
  0x57   : > { %647 = vmatprep.mubr.bf16.mxu1 %v1002_v40 }
  0x58   : > { %876 = vmatpush3.bf16.msra.mxu0 %v979_v19 }
  0x59   : > { %898 = vmatpush3.bf16.msra.mxu1 %v980_v20  ;;  %877 = vmatprep.subr.bf16.mxu0 %v981_v21 }
  0x5a   : > { %899 = vmatprep.subr.bf16.mxu1 %v982_v22 }
  0x5c   : > { %878 = vmatpush3.bf16.msra.mxu0 %v983_v23 }
  0x5d   : > { %900 = vmatpush3.bf16.msra.mxu1 %v984_v24  ;;  %879 = vmatprep.subr.bf16.mxu0 %v985_v25 }
  0x5e   : > { %901 = vmatprep.subr.bf16.mxu1 %v986_v26 }
  0x60   : > { %880 = vmatpush3.bf16.msra.mxu0 %v987_v27 }
  0x61   : > { %902 = vmatpush3.bf16.msra.mxu1 %v988_v28  ;;  %881 = vmatprep.subr.bf16.mxu0 %v989_v29 }
  0x62   : > { %903 = vmatprep.subr.bf16.mxu1 %v990_v30 }
  0x64   : > { %882 = vmatpush3.bf16.msra.mxu0 %v991_v31 }
  0x65   : > { %904 = vmatpush3.bf16.msra.mxu1 %v992_v32  ;;  %883 = vmatprep.subr.bf16.mxu0 %v993_v33 }
  0x66   : > { %905 = vmatprep.subr.bf16.mxu1 %v994_v34 }
  0x68   : > { %884 = vmatpush3.bf16.msra.mxu0 %v995_v35 }
  0x69   : > { %906 = vmatpush3.bf16.msra.mxu1 %v996_v36 }
  0x6b   : > { %607 = vmatmul.mubr.bf16.vlgmr.msra.gmra.mrb[0].mxu0 %v997_v37 }
  0x6c   : > { %648 = vmatmul.mubr.bf16.vlgmr.msra.gmra.mrb[0].mxu1 %v1000_v39 }
 0x13e   : > { %v885_v41 = vpop.f32.mrb[0].mxu0 }
 0x13f   : > { %v907_v42 = vpop.f32.mrb[0].mxu1  ;;  %v886_v43 = vpop.f32.mrb[1].mxu0 }
 0x140   : > { %v887_v44 = vadd.f32 %v886_v43, %v885_v41  ;;  %v908_v45 = vpop.f32.mrb[1].mxu1  ;;  %v888_v46 = vpop.f32.mrb[2].mxu0 }
 0x141   : > { %v909_v47 = vadd.f32 %v908_v45, %v907_v42  ;;  %v910_v48 = vpop.f32.mrb[2].mxu1  ;;  %v889_v49 = vpop.f32.mrb[3].mxu0 }
 0x142   : > { %v890_v51 = vadd.f32 %v889_v49, %v888_v46  ;;  %v911_v52 = vpop.f32.mrb[3].mxu1 }
 0x143   : > { %v650_v53 = vadd.f32 %v909_v47, %v887_v44  ;;  %v912_v54 = vadd.f32 %v911_v52, %v910_v48  ;;  %663 = sbr.rel (%p853_p12) target bundleno = 345 (0x159), region = 67 }
 0x145   : > { %v656_v56 = vadd.f32 %v650_v53, %v292_v50  ;;  %v653_v57 = vadd.f32 %v912_v54, %v890_v51 }
 0x147   : > { %658 = vst [vmem:[#allocation2] sm:$0xff] %v656_v56  ;;  %v657_v58 = vadd.f32 %v653_v57, %v293_v55 }
 0x149   : > { %659 = vst [vmem:[#allocation2 + $0x8] sm:$0xff] %v657_v58 }
 0x14e   : > { %v664_v59 = vld [vmem:[#allocation2] sm:$0xff] }
 0x14f   : > { %v673_v62 = vadd.f32 %v854_v61, %v664_v59 }
 0x150   : > { %v665_v60 = vld [vmem:[#allocation2 + $0x8] sm:$0xff] }
 0x151   : > { %v674_v63 = vadd.f32 %v854_v61, %v665_v60  ;;  %vm675_vm0 = vcmp.ge.f32.partialorder %v673_v62, 0.0  ;;  %v677_v0 = vmul.f32 0.01, %v673_v62 }
 0x153   : > { %vm676_vm1 = vcmp.ge.f32.partialorder %v674_v63, 0.0  ;;  %v678_v1 = vmul.f32 0.01, %v674_v63  ;;  %v679_v2 = vsel %vm675_vm0, %v673_v62, %v677_v0 }
 0x155   : > { %v680_v3 = vsel %vm676_vm1, %v674_v63, %v678_v1 }
 0x156   : > { %v867_v4 = vpack.c.bf16 %v680_v3, %v679_v2 }
 0x158   : > { %868 = vst [vmem:[%s1255_s3] sm:$0xff] %v867_v4  }
 0x159 PF: > { %s14_s16 = sadd.s32 1, %s1073_s16   ;;  %s1266_s12 = smov %s1061_s13 }
 0x15a   : > { %p11_p0 = scmp.ge.s32.totalorder %s14_s16, 4   ;;  %s1267_s13 = smov %s1147_s24 }
 0x15b   : > { %s1268_s14 = smov %s1069_s15  ;;  %s1269_s15 = smov %s1271_s18 }
 0x15c   :  { %13 = sbr.rel (!%p11_p0) target bundleno = 3 (0x3), region = 107 }
 0x163   :  { %719 = vsyncpa [#allocation5], 1 }
 0x164   :  { %721 = vsyncpa [#allocation5 + $0x1], 1 }

// kernel: video_decoder_forward.7
= control target key start
LH: loop header
LB: loop body
LE: loop exit
PB: predicated region body
PF: predicated region fallthrough
CT: control target
= control target key end

     0   :  { %s1040_s1 = inlined_call_operand.vmem [shape: bf16[512,128], index: 1, kind: input, shape index: {}]   ;;  %s1041_s0 = inlined_call_operand.vmem [shape: bf16[64,512], index: 0, kind: input, shape index: {}]   ;;  %s1042_s2 = inlined_call_operand.vmem [shape: f32[1,128], index: 2, kind: input, shape index: {}]   ;;  %s1043_s3 = inlined_call_operand.vmem [shape: bf16[64,128], index: 3, kind: output, shape index: {}]  }
   0x1   :  { %v795_v0 = vld [vmem:[%s1040_s1 + $0x40] sm:$0xff]   ;;  %v799_v4 = vld [vmem:[%s1040_s1 + $0x48] sm:$0xff]   ;;  %v803_v8 = vld [vmem:[%s1040_s1 + $0x50] sm:$0xff]  }
   0x2   :  { %v796_v1 = vld [vmem:[%s1040_s1 + $0xc0] sm:$0xff]   ;;  %715 = vmatprep.subr.bf16.mxu0 %v795_v0  ;;  %v800_v5 = vld [vmem:[%s1040_s1 + $0xc8] sm:$0xff]   ;;  %v804_v9 = vld [vmem:[%s1040_s1 + $0xd0] sm:$0xff]  }
   0x3   :  { %v797_v2 = vld [vmem:[%s1040_s1] sm:$0xff]   ;;  %755 = vmatprep.subr.bf16.mxu1 %v796_v1  ;;  %v801_v6 = vld [vmem:[%s1040_s1 + $0x8] sm:$0xff]   ;;  %v805_v10 = vld [vmem:[%s1040_s1 + $0x10] sm:$0xff]  }
   0x4   :  { %v798_v3 = vld [vmem:[%s1040_s1 + $0x80] sm:$0xff]   ;;  %716 = vmatpush3.bf16.msra.mxu0 %v797_v2  ;;  %v802_v7 = vld [vmem:[%s1040_s1 + $0x88] sm:$0xff]   ;;  %v806_v11 = vld [vmem:[%s1040_s1 + $0x90] sm:$0xff]  }
   0x5   :  { %756 = vmatpush3.bf16.msra.mxu1 %v798_v3  ;;  %717 = vmatprep.subr.bf16.mxu0 %v799_v4  ;;  %v807_v12 = vld [vmem:[%s1040_s1 + $0x58] sm:$0xff]   ;;  %v811_v16 = vld [vmem:[%s1040_s1 + $0x60] sm:$0xff]   ;;  %v815_v20 = vld [vmem:[%s1040_s1 + $0x68] sm:$0xff]  }
   0x6   :  { %757 = vmatprep.subr.bf16.mxu1 %v800_v5  ;;  %v808_v13 = vld [vmem:[%s1040_s1 + $0xd8] sm:$0xff]   ;;  %v812_v17 = vld [vmem:[%s1040_s1 + $0xe0] sm:$0xff]   ;;  %v816_v21 = vld [vmem:[%s1040_s1 + $0xe8] sm:$0xff]  }
   0x7   :  { %v809_v14 = vld [vmem:[%s1040_s1 + $0x18] sm:$0xff]   ;;  %v813_v18 = vld [vmem:[%s1040_s1 + $0x20] sm:$0xff]   ;;  %v817_v22 = vld [vmem:[%s1040_s1 + $0x28] sm:$0xff]  }
   0x8   :  { %718 = vmatpush3.bf16.msra.mxu0 %v801_v6  ;;  %v810_v15 = vld [vmem:[%s1040_s1 + $0x98] sm:$0xff]   ;;  %v814_v19 = vld [vmem:[%s1040_s1 + $0xa0] sm:$0xff]   ;;  %v818_v23 = vld [vmem:[%s1040_s1 + $0xa8] sm:$0xff]  }
   0x9   :  { %758 = vmatpush3.bf16.msra.mxu1 %v802_v7  ;;  %719 = vmatprep.subr.bf16.mxu0 %v803_v8  ;;  %v819_v24 = vld [vmem:[%s1040_s1 + $0x70] sm:$0xff]   ;;  %v823_v28 = vld [vmem:[%s1040_s1 + $0x78] sm:$0xff]   ;;  %v1018_v57 = vld [vmem:[%s1042_s2] ss:$0 sm:$0xff] }
   0xa   :  { %759 = vmatprep.subr.bf16.mxu1 %v804_v9  ;;  %v820_v25 = vld [vmem:[%s1040_s1 + $0xf0] sm:$0xff]   ;;  %v824_v29 = vld [vmem:[%s1040_s1 + $0xf8] sm:$0xff]  }
   0xb   :  { %v821_v26 = vld [vmem:[%s1040_s1 + $0x30] sm:$0xff]   ;;  %v825_v30 = vld [vmem:[%s1040_s1 + $0x38] sm:$0xff]  }
   0xc   :  { %720 = vmatpush3.bf16.msra.mxu0 %v805_v10  ;;  %v822_v27 = vld [vmem:[%s1040_s1 + $0xb0] sm:$0xff]   ;;  %v826_v31 = vld [vmem:[%s1040_s1 + $0xb8] sm:$0xff]  }
   0xd   :  { %760 = vmatpush3.bf16.msra.mxu1 %v806_v11  ;;  %721 = vmatprep.subr.bf16.mxu0 %v807_v12  ;;  %v827_v32 = vld [vmem:[%s1041_s0] ss:$16 sps:$4 sm:$0xff]   ;;  %v829_v33 = vld [vmem:[%s1041_s0 + $0x4] ss:$16 sps:$4 sm:$0xff]   ;;  %v830_v34 = vld [vmem:[%s1041_s0 + $0x8] ss:$16 sps:$4 sm:$0xff]  }
   0xe   :  { %761 = vmatprep.subr.bf16.mxu1 %v808_v13  ;;  %v832_v35 = vld [vmem:[%s1041_s0 + $0xc] ss:$16 sps:$4 sm:$0xff]   ;;  %419 = vmatprep.mubr.bf16.mxu0 %v829_v33  ;;  %v833_v36 = vld [vmem:[%s1041_s0 + $0x24] ss:$16 sps:$4 sm:$0xff]   ;;  %v837_v38 = vld [vmem:[%s1041_s0 + $0x20] ss:$16 sps:$4 sm:$0xff]  }
   0xf   :  { %484 = vmatprep.mubr.bf16.mxu1 %v832_v35  ;;  %v835_v37 = vld [vmem:[%s1041_s0 + $0x2c] ss:$16 sps:$4 sm:$0xff]   ;;  %v838_v39 = vld [vmem:[%s1041_s0 + $0x28] ss:$16 sps:$4 sm:$0xff]   ;;  %v839_v40 = vld [vmem:[%s1041_s0 + $0x44] ss:$16 sps:$4 sm:$0xff]  }
  0x10   :  { %722 = vmatpush3.bf16.msra.mxu0 %v809_v14  ;;  %v841_v41 = vld [vmem:[%s1041_s0 + $0x4c] ss:$16 sps:$4 sm:$0xff]   ;;  %v843_v42 = vld [vmem:[%s1041_s0 + $0x40] ss:$16 sps:$4 sm:$0xff]   ;;  %v844_v43 = vld [vmem:[%s1041_s0 + $0x48] ss:$16 sps:$4 sm:$0xff]  }
  0x11   :  { %762 = vmatpush3.bf16.msra.mxu1 %v810_v15  ;;  %723 = vmatprep.subr.bf16.mxu0 %v811_v16  ;;  %v845_v44 = vld [vmem:[%s1041_s0 + $0x64] ss:$16 sps:$4 sm:$0xff]   ;;  %v847_v45 = vld [vmem:[%s1041_s0 + $0x6c] ss:$16 sps:$4 sm:$0xff]   ;;  %v849_v46 = vld [vmem:[%s1041_s0 + $0x60] ss:$16 sps:$4 sm:$0xff]  }
  0x12   :  { %763 = vmatprep.subr.bf16.mxu1 %v812_v17  ;;  %v850_v47 = vld [vmem:[%s1041_s0 + $0x68] ss:$16 sps:$4 sm:$0xff]  }
  0x14   :  { %724 = vmatpush3.bf16.msra.mxu0 %v813_v18 }
  0x15   :  { %764 = vmatpush3.bf16.msra.mxu1 %v814_v19  ;;  %725 = vmatprep.subr.bf16.mxu0 %v815_v20 }
  0x16   :  { %765 = vmatprep.subr.bf16.mxu1 %v816_v21 }
  0x18   :  { %726 = vmatpush3.bf16.msra.mxu0 %v817_v22 }
  0x19   :  { %766 = vmatpush3.bf16.msra.mxu1 %v818_v23  ;;  %727 = vmatprep.subr.bf16.mxu0 %v819_v24 }
  0x1a   :  { %767 = vmatprep.subr.bf16.mxu1 %v820_v25 }
  0x1c   :  { %728 = vmatpush3.bf16.msra.mxu0 %v821_v26 }
  0x1d   :  { %768 = vmatpush3.bf16.msra.mxu1 %v822_v27  ;;  %729 = vmatprep.subr.bf16.mxu0 %v823_v28 }
  0x1e   :  { %769 = vmatprep.subr.bf16.mxu1 %v824_v29 }
  0x20   :  { %730 = vmatpush3.bf16.msra.mxu0 %v825_v30 }
  0x21   :  { %770 = vmatpush3.bf16.msra.mxu1 %v826_v31 }
  0x23   :  { %420 = vmatmul.mubr.bf16.vlgmr.msra.gmra.mrb[0].mxu0 %v827_v32 }
  0x24   :  { %485 = vmatmul.mubr.bf16.vlgmr.msra.gmra.mrb[0].mxu1 %v830_v34  ;;  %427 = vmatprep.mubr.bf16.mxu0 %v833_v36 }
  0x25   :  { %492 = vmatprep.mubr.bf16.mxu1 %v835_v37 }
  0x2b   :  { %428 = vmatmul.mubr.bf16.gmra.mrb[4].mxu0 %v837_v38 }
  0x2c   :  { %493 = vmatmul.mubr.bf16.gmra.mrb[4].mxu1 %v838_v39  ;;  %435 = vmatprep.mubr.bf16.mxu0 %v839_v40 }
  0x2d   :  { %500 = vmatprep.mubr.bf16.mxu1 %v841_v41 }
  0x33   :  { %436 = vmatmul.mubr.bf16.gmra.mrb[8].mxu0 %v843_v42 }
  0x34   :  { %501 = vmatmul.mubr.bf16.gmra.mrb[8].mxu1 %v844_v43  ;;  %443 = vmatprep.mubr.bf16.mxu0 %v845_v44 }
  0x35   :  { %508 = vmatprep.mubr.bf16.mxu1 %v847_v45 }
  0x3b   :  { %444 = vmatmul.mubr.bf16.gmra.mrb[12].mxu0 %v849_v46 }
  0x3c   :  { %509 = vmatmul.mubr.bf16.gmra.mrb[12].mxu1 %v850_v47 }
  0xf6   :  { %v731_v48 = vpop.f32.mrb[0].mxu0 }
  0xf7   :  { %v771_v49 = vpop.f32.mrb[0].mxu1  ;;  %v732_v50 = vpop.f32.mrb[1].mxu0 }
  0xf8   :  { %v733_v51 = vadd.f32 %v732_v50, %v731_v48  ;;  %v772_v52 = vpop.f32.mrb[1].mxu1  ;;  %v734_v53 = vpop.f32.mrb[2].mxu0 }
  0xf9   :  { %v773_v54 = vadd.f32 %v772_v52, %v771_v49  ;;  %v774_v55 = vpop.f32.mrb[2].mxu1  ;;  %v735_v56 = vpop.f32.mrb[3].mxu0 }
  0xfa   :  { %v736_v58 = vadd.f32 %v735_v56, %v734_v53  ;;  %v775_v59 = vpop.f32.mrb[3].mxu1 }
  0xfb   :  { %v487_v60 = vadd.f32 %v773_v54, %v733_v51  ;;  %v776_v61 = vadd.f32 %v775_v59, %v774_v55 }
  0xfd   :  { %v551_v62 = vadd.f32 %v1018_v57, %v487_v60  ;;  %v490_v63 = vadd.f32 %v776_v61, %v736_v58 }
  0xfe   :  { %v737_v0 = vpop.f32.mrb[4].mxu0 }
  0xff   :  { %v567_v1 = vmul.f32 0.01, %v551_v62  ;;  %v552_v2 = vadd.f32 %v1018_v57, %v490_v63  ;;  %v777_v3 = vpop.f32.mrb[4].mxu1  ;;  %v738_v4 = vpop.f32.mrb[5].mxu0  ;;  %vm559_vm0 = vcmp.ge.f32.partialorder %v551_v62, 0.0 }
 0x100   :  { %v739_v5 = vadd.f32 %v738_v4, %v737_v0  ;;  %v778_v6 = vpop.f32.mrb[5].mxu1  ;;  %v740_v7 = vpop.f32.mrb[6].mxu0 }
 0x101   :  { %vm560_vm1 = vcmp.ge.f32.partialorder %v552_v2, 0.0  ;;  %v568_v8 = vmul.f32 0.01, %v552_v2  ;;  %v779_v9 = vadd.f32 %v778_v6, %v777_v3  ;;  %v780_v10 = vpop.f32.mrb[6].mxu1  ;;  %v741_v11 = vpop.f32.mrb[7].mxu0  ;;  %v575_v14 = vsel %vm559_vm0, %v551_v62, %v567_v1 }
 0x102   :  { %v742_v12 = vadd.f32 %v741_v11, %v740_v7  ;;  %v781_v13 = vpop.f32.mrb[7].mxu1 }
 0x103   :  { %v576_v15 = vsel %vm560_vm1, %v552_v2, %v568_v8  ;;  %v495_v16 = vadd.f32 %v779_v9, %v739_v5  ;;  %v782_v17 = vadd.f32 %v781_v13, %v780_v10 }
 0x104   :  { %v695_v18 = vpack.c.bf16 %v576_v15, %v575_v14 }
 0x105   :  { %v553_v19 = vadd.f32 %v1018_v57, %v495_v16  ;;  %v498_v20 = vadd.f32 %v782_v17, %v742_v12 }
 0x106   :  { %696 = vst [vmem:[%s1043_s3] sm:$0xff] %v695_v18   ;;  %v743_v21 = vpop.f32.mrb[8].mxu0 }
 0x107   :  { %v569_v22 = vmul.f32 0.01, %v553_v19  ;;  %v554_v23 = vadd.f32 %v1018_v57, %v498_v20  ;;  %v783_v24 = vpop.f32.mrb[8].mxu1  ;;  %v744_v25 = vpop.f32.mrb[9].mxu0  ;;  %vm561_vm2 = vcmp.ge.f32.partialorder %v553_v19, 0.0 }
 0x108   :  { %v745_v26 = vadd.f32 %v744_v25, %v743_v21  ;;  %v784_v27 = vpop.f32.mrb[9].mxu1  ;;  %v746_v28 = vpop.f32.mrb[10].mxu0 }
 0x109   :  { %vm562_vm3 = vcmp.ge.f32.partialorder %v554_v23, 0.0  ;;  %v570_v29 = vmul.f32 0.01, %v554_v23  ;;  %v785_v30 = vadd.f32 %v784_v27, %v783_v24  ;;  %v786_v31 = vpop.f32.mrb[10].mxu1  ;;  %v747_v32 = vpop.f32.mrb[11].mxu0  ;;  %v577_v35 = vsel %vm561_vm2, %v553_v19, %v569_v22 }
 0x10a   :  { %v748_v33 = vadd.f32 %v747_v32, %v746_v28  ;;  %v787_v34 = vpop.f32.mrb[11].mxu1 }
 0x10b   :  { %v578_v36 = vsel %vm562_vm3, %v554_v23, %v570_v29  ;;  %v503_v37 = vadd.f32 %v785_v30, %v745_v26  ;;  %v788_v38 = vadd.f32 %v787_v34, %v786_v31 }
 0x10c   :  { %v700_v39 = vpack.c.bf16 %v578_v36, %v577_v35 }
 0x10d   :  { %v555_v40 = vadd.f32 %v1018_v57, %v503_v37  ;;  %v506_v41 = vadd.f32 %v788_v38, %v748_v33 }
 0x10e   :  { %712 = vst [vmem:[%s1043_s3 + $0x8] sm:$0xff] %v700_v39   ;;  %v749_v42 = vpop.f32.mrb[12].mxu0 }
 0x10f   :  { %v571_v43 = vmul.f32 0.01, %v555_v40  ;;  %v556_v44 = vadd.f32 %v1018_v57, %v506_v41  ;;  %v789_v45 = vpop.f32.mrb[12].mxu1  ;;  %v750_v46 = vpop.f32.mrb[13].mxu0  ;;  %vm563_vm4 = vcmp.ge.f32.partialorder %v555_v40, 0.0 }
 0x110   :  { %v751_v47 = vadd.f32 %v750_v46, %v749_v42  ;;  %v790_v48 = vpop.f32.mrb[13].mxu1  ;;  %v752_v49 = vpop.f32.mrb[14].mxu0 }
 0x111   :  { %vm564_vm5 = vcmp.ge.f32.partialorder %v556_v44, 0.0  ;;  %v572_v50 = vmul.f32 0.01, %v556_v44  ;;  %v791_v51 = vadd.f32 %v790_v48, %v789_v45  ;;  %v792_v52 = vpop.f32.mrb[14].mxu1  ;;  %v753_v53 = vpop.f32.mrb[15].mxu0  ;;  %v579_v56 = vsel %vm563_vm4, %v555_v40, %v571_v43 }
 0x112   :  { %v754_v54 = vadd.f32 %v753_v53, %v752_v49  ;;  %v793_v55 = vpop.f32.mrb[15].mxu1 }
 0x113   :  { %v580_v58 = vsel %vm564_vm5, %v556_v44, %v572_v50  ;;  %v511_v59 = vadd.f32 %v791_v51, %v751_v47  ;;  %v794_v60 = vadd.f32 %v793_v55, %v792_v52 }
 0x114   :  { %v705_v61 = vpack.c.bf16 %v580_v58, %v579_v56 }
 0x115   :  { %v557_v62 = vadd.f32 %v1018_v57, %v511_v59  ;;  %v514_v63 = vadd.f32 %v794_v60, %v754_v54 }
 0x116   :  { %713 = vst [vmem:[%s1043_s3 + $0x10] sm:$0xff] %v705_v61  }
 0x117   :  { %v573_v0 = vmul.f32 0.01, %v557_v62  ;;  %v558_v1 = vadd.f32 %v1018_v57, %v514_v63  ;;  %vm565_vm6 = vcmp.ge.f32.partialorder %v557_v62, 0.0 }
 0x119   :  { %vm566_vm7 = vcmp.ge.f32.partialorder %v558_v1, 0.0  ;;  %v574_v2 = vmul.f32 0.01, %v558_v1  ;;  %v581_v3 = vsel %vm565_vm6, %v557_v62, %v573_v0 }
 0x11b   :  { %v582_v4 = vsel %vm566_vm7, %v558_v1, %v574_v2 }
 0x11c   :  { %v710_v5 = vpack.c.bf16 %v582_v4, %v581_v3 }
 0x11e   :  { %714 = vst [vmem:[%s1043_s3 + $0x18] sm:$0xff] %v710_v5  }

// kernel: video_decoder_forward.8
= control target key start
LH: loop header
LB: loop body
LE: loop exit
PB: predicated region body
PF: predicated region fallthrough
CT: control target
= control target key end

     0   :  { %s2497_s12 = smov 0   ;;  %s2499_s13 = smov 0   ;;  %s2754_s0 = inlined_call_operand.vmem [shape: bf16[512,512], index: 0, kind: input, shape index: {}]   ;;  %s2755_s1 = inlined_call_operand.vmem [shape: bf16[512,128], index: 1, kind: input, shape index: {}]   ;;  %s2756_s2 = inlined_call_operand.vmem [shape: f32[1,128], index: 2, kind: input, shape index: {}]   ;;  %s2757_s3 = inlined_call_operand.vmem [shape: bf16[512,128], index: 3, kind: output, shape index: {}]  }
   0x1   :  { %s2501_s14 = smov 0  }
   0x2 LB: > { %s32_s15 = sadd.s32 1, %s2471_s13  ;;  %p1812_p0 = scmp.ge.s32.totalorder %s2475_s14, 1  ;;  %s2475_s14 = sphi %s2501_s14, %s13_s14   ;;  %s2471_s13 = sphi %s2499_s13, %s2759_s13   ;;  %s2467_s12 = sphi %s2497_s12, %s2758_s12  }
   0x3   : > { %p34_p1 = scmp.ge.s32.totalorder %s32_s15, 2  ;;  %p191_p2 = scmp.lt.s32.totalorder %s2475_s14, 3 }
   0x5   : > { %s2761_s15 = smov (%p34_p1, %s32_s15), 0  ;;  %p192_p3 = pnand %p1812_p0, %p191_p2 }
   0x6   : > { %v2325_v0 = vld [vmem:[%s2755_s1 + $0x40] sm:$0xff] (!%p192_p3)   ;;  %v2329_v4 = vld [vmem:[%s2755_s1 + $0x48] sm:$0xff] (!%p192_p3)   ;;  %v2333_v8 = vld [vmem:[%s2755_s1 + $0x50] sm:$0xff] (!%p192_p3)   ;;  %s1813_s25 = sshll.u32 (!%p192_p3), %s2467_s12, 5 }
   0x7   : > { %195 = sbr.rel (%p192_p3) target bundleno = 388 (0x184), region = 32  ;;  %v2326_v1 = vld [vmem:[%s2755_s1 + $0xc0] sm:$0xff] (!%p192_p3)   ;;  %2077 = vmatprep.subr.bf16.mxu0 (!%p192_p3), %v2325_v0  ;;  %v2330_v5 = vld [vmem:[%s2755_s1 + $0xc8] sm:$0xff] (!%p192_p3)   ;;  %v2334_v9 = vld [vmem:[%s2755_s1 + $0xd0] sm:$0xff] (!%p192_p3)   ;;  %p236_p4 = scmp.lt.s32.totalorder (!%p192_p3), %s1813_s25, 63 }
   0x8   : > { %v2327_v2 = vld [vmem:[%s2755_s1] sm:$0xff] (!%p192_p3)   ;;  %2189 = vmatprep.subr.bf16.mxu1 (!%p192_p3), %v2326_v1  ;;  %v2331_v6 = vld [vmem:[%s2755_s1 + $0x8] sm:$0xff] (!%p192_p3)   ;;  %v2335_v10 = vld [vmem:[%s2755_s1 + $0x10] sm:$0xff] (!%p192_p3)  }
   0x9   : > { %v2328_v3 = vld [vmem:[%s2755_s1 + $0x80] sm:$0xff] (!%p192_p3)   ;;  %2078 = vmatpush3.bf16.msra.mxu0 (!%p192_p3), %v2327_v2  ;;  %v2332_v7 = vld [vmem:[%s2755_s1 + $0x88] sm:$0xff] (!%p192_p3)   ;;  %v2336_v11 = vld [vmem:[%s2755_s1 + $0x90] sm:$0xff] (!%p192_p3)  }
   0xa   : > { %2190 = vmatpush3.bf16.msra.mxu1 (!%p192_p3), %v2328_v3  ;;  %2079 = vmatprep.subr.bf16.mxu0 (!%p192_p3), %v2329_v4  ;;  %v2337_v12 = vld [vmem:[%s2755_s1 + $0x58] sm:$0xff] (!%p192_p3)   ;;  %v2341_v16 = vld [vmem:[%s2755_s1 + $0x60] sm:$0xff] (!%p192_p3)   ;;  %v2345_v20 = vld [vmem:[%s2755_s1 + $0x68] sm:$0xff] (!%p192_p3)  }
   0xb   : > { %2191 = vmatprep.subr.bf16.mxu1 (!%p192_p3), %v2330_v5  ;;  %v2338_v13 = vld [vmem:[%s2755_s1 + $0xd8] sm:$0xff] (!%p192_p3)   ;;  %v2342_v17 = vld [vmem:[%s2755_s1 + $0xe0] sm:$0xff] (!%p192_p3)   ;;  %v2346_v21 = vld [vmem:[%s2755_s1 + $0xe8] sm:$0xff] (!%p192_p3)  }
   0xc   : > { %v2339_v14 = vld [vmem:[%s2755_s1 + $0x18] sm:$0xff] (!%p192_p3)   ;;  %v2343_v18 = vld [vmem:[%s2755_s1 + $0x20] sm:$0xff] (!%p192_p3)   ;;  %v2347_v22 = vld [vmem:[%s2755_s1 + $0x28] sm:$0xff] (!%p192_p3)  }
   0xd   : > { %2080 = vmatpush3.bf16.msra.mxu0 (!%p192_p3), %v2331_v6  ;;  %v2340_v15 = vld [vmem:[%s2755_s1 + $0x98] sm:$0xff] (!%p192_p3)   ;;  %v2344_v19 = vld [vmem:[%s2755_s1 + $0xa0] sm:$0xff] (!%p192_p3)   ;;  %v2348_v23 = vld [vmem:[%s2755_s1 + $0xa8] sm:$0xff] (!%p192_p3)  }
   0xe   : > { %2192 = vmatpush3.bf16.msra.mxu1 %v2332_v7  ;;  %2081 = vmatprep.subr.bf16.mxu0 %v2333_v8  ;;  %s2763_s25 = smov (!%p236_p4, %s1813_s25), 63  ;;  %v2349_v24 = vld [vmem:[%s2755_s1 + $0x70] sm:$0xff]   ;;  %v2353_v28 = vld [vmem:[%s2755_s1 + $0x78] sm:$0xff]  }
   0xf   : > { %2193 = vmatprep.subr.bf16.mxu1 %v2334_v9  ;;  %v2350_v25 = vld [vmem:[%s2755_s1 + $0xf0] sm:$0xff]   ;;  %s1949_s24 = sshll.u32 %s2763_s25, 4  ;;  %v2354_v29 = vld [vmem:[%s2755_s1 + $0xf8] sm:$0xff]   ;;  %s1817_s17 = sshll.u32 %s2763_s25, 2 }
  0x10   : > { %v2351_v26 = vld [vmem:[%s2755_s1 + $0x30] sm:$0xff]   ;;  %s2614_s12 = scalar_lea.vmem %s2754_s0, %s1949_s24  ;;  %v2355_v30 = vld [vmem:[%s2755_s1 + $0x38] sm:$0xff]   ;;  %s2697_s20 = scalar_lea.vmem %s2757_s3, %s1817_s17 }
  0x11   : > { %2082 = vmatpush3.bf16.msra.mxu0 %v2335_v10  ;;  %v2352_v27 = vld [vmem:[%s2755_s1 + $0xb0] sm:$0xff]   ;;  %v2356_v31 = vld [vmem:[%s2755_s1 + $0xb8] sm:$0xff]  }
  0x12   : > { %2194 = vmatpush3.bf16.msra.mxu1 %v2336_v11  ;;  %2083 = vmatprep.subr.bf16.mxu0 %v2337_v12  ;;  %v2357_v32 = vld [vmem:[%s2614_s12] ss:$16 sps:$4 sm:$0xff]   ;;  %v2359_v33 = vld [vmem:[%s2614_s12 + $0x4] ss:$16 sps:$4 sm:$0xff]   ;;  %v2360_v34 = vld [vmem:[%s2614_s12 + $0x8] ss:$16 sps:$4 sm:$0xff]  }
  0x13   : > { %2195 = vmatprep.subr.bf16.mxu1 %v2338_v13  ;;  %v2362_v35 = vld [vmem:[%s2614_s12 + $0xc] ss:$16 sps:$4 sm:$0xff]   ;;  %1008 = vmatprep.mubr.bf16.mxu0 %v2359_v33  ;;  %v2363_v36 = vld [vmem:[%s2614_s12 + $0x24] ss:$16 sps:$4 sm:$0xff]   ;;  %v2367_v38 = vld [vmem:[%s2614_s12 + $0x20] ss:$16 sps:$4 sm:$0xff]  }
  0x14   : > { %1169 = vmatprep.mubr.bf16.mxu1 %v2362_v35  ;;  %v2365_v37 = vld [vmem:[%s2614_s12 + $0x2c] ss:$16 sps:$4 sm:$0xff]   ;;  %v2368_v39 = vld [vmem:[%s2614_s12 + $0x28] ss:$16 sps:$4 sm:$0xff]   ;;  %v2369_v40 = vld [vmem:[%s2614_s12 + $0x44] ss:$16 sps:$4 sm:$0xff]  }
  0x15   : > { %2084 = vmatpush3.bf16.msra.mxu0 %v2339_v14  ;;  %v2371_v41 = vld [vmem:[%s2614_s12 + $0x4c] ss:$16 sps:$4 sm:$0xff]   ;;  %v2373_v42 = vld [vmem:[%s2614_s12 + $0x40] ss:$16 sps:$4 sm:$0xff]   ;;  %v2374_v43 = vld [vmem:[%s2614_s12 + $0x48] ss:$16 sps:$4 sm:$0xff]  }
  0x16   : > { %2196 = vmatpush3.bf16.msra.mxu1 %v2340_v15  ;;  %2085 = vmatprep.subr.bf16.mxu0 %v2341_v16  ;;  %v2375_v44 = vld [vmem:[%s2614_s12 + $0x64] ss:$16 sps:$4 sm:$0xff]   ;;  %v2377_v45 = vld [vmem:[%s2614_s12 + $0x6c] ss:$16 sps:$4 sm:$0xff]   ;;  %v2379_v46 = vld [vmem:[%s2614_s12 + $0x60] ss:$16 sps:$4 sm:$0xff]  }
  0x17   : > { %2197 = vmatprep.subr.bf16.mxu1 %v2342_v17  ;;  %v2380_v47 = vld [vmem:[%s2614_s12 + $0x68] ss:$16 sps:$4 sm:$0xff]   ;;  %v2381_v48 = vld [vmem:[%s2614_s12 + $0x84] ss:$16 sps:$4 sm:$0xff]   ;;  %v2383_v49 = vld [vmem:[%s2614_s12 + $0x8c] ss:$16 sps:$4 sm:$0xff]  }
  0x18   : > { %v2385_v50 = vld [vmem:[%s2614_s12 + $0x80] ss:$16 sps:$4 sm:$0xff]   ;;  %v2386_v51 = vld [vmem:[%s2614_s12 + $0x88] ss:$16 sps:$4 sm:$0xff]   ;;  %v2387_v52 = vld [vmem:[%s2614_s12 + $0xa4] ss:$16 sps:$4 sm:$0xff]  }
  0x19   : > { %2086 = vmatpush3.bf16.msra.mxu0 %v2343_v18  ;;  %v2389_v53 = vld [vmem:[%s2614_s12 + $0xac] ss:$16 sps:$4 sm:$0xff]   ;;  %v2391_v54 = vld [vmem:[%s2614_s12 + $0xa0] ss:$16 sps:$4 sm:$0xff]   ;;  %v2392_v55 = vld [vmem:[%s2614_s12 + $0xa8] ss:$16 sps:$4 sm:$0xff]  }
  0x1a   : > { %2198 = vmatpush3.bf16.msra.mxu1 %v2344_v19  ;;  %2087 = vmatprep.subr.bf16.mxu0 %v2345_v20  ;;  %v2393_v56 = vld [vmem:[%s2614_s12 + $0xc4] ss:$16 sps:$4 sm:$0xff]   ;;  %v2395_v57 = vld [vmem:[%s2614_s12 + $0xcc] ss:$16 sps:$4 sm:$0xff]   ;;  %v2397_v58 = vld [vmem:[%s2614_s12 + $0xc0] ss:$16 sps:$4 sm:$0xff]  }
  0x1b   : > { %2199 = vmatprep.subr.bf16.mxu1 %v2346_v21  ;;  %v2398_v59 = vld [vmem:[%s2614_s12 + $0xc8] ss:$16 sps:$4 sm:$0xff]   ;;  %v2399_v60 = vld [vmem:[%s2614_s12 + $0xe4] ss:$16 sps:$4 sm:$0xff]   ;;  %v2401_v61 = vld [vmem:[%s2614_s12 + $0xec] ss:$16 sps:$4 sm:$0xff]  }
  0x1c   : > { %v2403_v62 = vld [vmem:[%s2614_s12 + $0xe0] ss:$16 sps:$4 sm:$0xff]   ;;  %v2404_v63 = vld [vmem:[%s2614_s12 + $0xe8] ss:$16 sps:$4 sm:$0xff]   ;;  %v2405_v0 = vld [vmem:[%s2614_s12 + $0x104] ss:$16 sps:$4 sm:$0xff]  }
  0x1d   : > { %2088 = vmatpush3.bf16.msra.mxu0 %v2347_v22  ;;  %v2407_v1 = vld [vmem:[%s2614_s12 + $0x10c] ss:$16 sps:$4 sm:$0xff]   ;;  %v2409_v2 = vld [vmem:[%s2614_s12 + $0x100] ss:$16 sps:$4 sm:$0xff]   ;;  %v2410_v3 = vld [vmem:[%s2614_s12 + $0x108] ss:$16 sps:$4 sm:$0xff]  }
  0x1e   : > { %2200 = vmatpush3.bf16.msra.mxu1 %v2348_v23  ;;  %2089 = vmatprep.subr.bf16.mxu0 %v2349_v24  ;;  %v2411_v4 = vld [vmem:[%s2614_s12 + $0x124] ss:$16 sps:$4 sm:$0xff]   ;;  %v2413_v5 = vld [vmem:[%s2614_s12 + $0x12c] ss:$16 sps:$4 sm:$0xff]   ;;  %v2415_v6 = vld [vmem:[%s2614_s12 + $0x120] ss:$16 sps:$4 sm:$0xff]  }
  0x1f   : > { %2201 = vmatprep.subr.bf16.mxu1 %v2350_v25  ;;  %v2416_v7 = vld [vmem:[%s2614_s12 + $0x128] ss:$16 sps:$4 sm:$0xff]   ;;  %v2417_v8 = vld [vmem:[%s2614_s12 + $0x144] ss:$16 sps:$4 sm:$0xff]   ;;  %v2419_v9 = vld [vmem:[%s2614_s12 + $0x14c] ss:$16 sps:$4 sm:$0xff]  }
  0x20   : > { %v2421_v10 = vld [vmem:[%s2614_s12 + $0x140] ss:$16 sps:$4 sm:$0xff]   ;;  %v2422_v11 = vld [vmem:[%s2614_s12 + $0x148] ss:$16 sps:$4 sm:$0xff]   ;;  %v2423_v12 = vld [vmem:[%s2614_s12 + $0x164] ss:$16 sps:$4 sm:$0xff]  }
  0x21   : > { %2090 = vmatpush3.bf16.msra.mxu0 %v2351_v26  ;;  %v2425_v13 = vld [vmem:[%s2614_s12 + $0x16c] ss:$16 sps:$4 sm:$0xff]   ;;  %v2427_v14 = vld [vmem:[%s2614_s12 + $0x160] ss:$16 sps:$4 sm:$0xff]   ;;  %v2428_v15 = vld [vmem:[%s2614_s12 + $0x168] ss:$16 sps:$4 sm:$0xff]  }
  0x22   : > { %2202 = vmatpush3.bf16.msra.mxu1 %v2352_v27  ;;  %2091 = vmatprep.subr.bf16.mxu0 %v2353_v28  ;;  %v2429_v16 = vld [vmem:[%s2614_s12 + $0x184] ss:$16 sps:$4 sm:$0xff]   ;;  %v2431_v17 = vld [vmem:[%s2614_s12 + $0x18c] ss:$16 sps:$4 sm:$0xff]   ;;  %v2433_v18 = vld [vmem:[%s2614_s12 + $0x180] ss:$16 sps:$4 sm:$0xff]  }
  0x23   : > { %2203 = vmatprep.subr.bf16.mxu1 %v2354_v29  ;;  %v2434_v19 = vld [vmem:[%s2614_s12 + $0x188] ss:$16 sps:$4 sm:$0xff]   ;;  %v2435_v20 = vld [vmem:[%s2614_s12 + $0x1a4] ss:$16 sps:$4 sm:$0xff]   ;;  %v2437_v21 = vld [vmem:[%s2614_s12 + $0x1ac] ss:$16 sps:$4 sm:$0xff]  }
  0x24   : > { %v2439_v22 = vld [vmem:[%s2614_s12 + $0x1a0] ss:$16 sps:$4 sm:$0xff]   ;;  %v2440_v23 = vld [vmem:[%s2614_s12 + $0x1a8] ss:$16 sps:$4 sm:$0xff]   ;;  %v2441_v24 = vld [vmem:[%s2614_s12 + $0x1c4] ss:$16 sps:$4 sm:$0xff]  }
  0x25   : > { %2092 = vmatpush3.bf16.msra.mxu0 %v2355_v30  ;;  %v2443_v25 = vld [vmem:[%s2614_s12 + $0x1cc] ss:$16 sps:$4 sm:$0xff]   ;;  %v2445_v26 = vld [vmem:[%s2614_s12 + $0x1c0] ss:$16 sps:$4 sm:$0xff]   ;;  %v2446_v27 = vld [vmem:[%s2614_s12 + $0x1c8] ss:$16 sps:$4 sm:$0xff]  }
  0x26   : > { %2204 = vmatpush3.bf16.msra.mxu1 %v2356_v31  ;;  %v2447_v28 = vld [vmem:[%s2614_s12 + $0x1e4] ss:$16 sps:$4 sm:$0xff]   ;;  %v2449_v29 = vld [vmem:[%s2614_s12 + $0x1ec] ss:$16 sps:$4 sm:$0xff]   ;;  %v2451_v30 = vld [vmem:[%s2614_s12 + $0x1e0] ss:$16 sps:$4 sm:$0xff]  }
  0x27   : > { %v2452_v31 = vld [vmem:[%s2614_s12 + $0x1e8] ss:$16 sps:$4 sm:$0xff]  }
  0x28   : > { %1009 = vmatmul.mubr.bf16.vlgmr.msra.gmra.mrb[0].mxu0 %v2357_v32 }
  0x29   : > { %1170 = vmatmul.mubr.bf16.vlgmr.msra.gmra.mrb[0].mxu1 %v2360_v34  ;;  %1016 = vmatprep.mubr.bf16.mxu0 %v2363_v36 }
  0x2a   : > { %1177 = vmatprep.mubr.bf16.mxu1 %v2365_v37 }
  0x30   : > { %1017 = vmatmul.mubr.bf16.gmra.mrb[4].mxu0 %v2367_v38 }
  0x31   : > { %1178 = vmatmul.mubr.bf16.gmra.mrb[4].mxu1 %v2368_v39  ;;  %1024 = vmatprep.mubr.bf16.mxu0 %v2369_v40 }
  0x32   : > { %1185 = vmatprep.mubr.bf16.mxu1 %v2371_v41  ;;  %v2689_v41 = vld [vmem:[%s2756_s2] ss:$0 sm:$0xff] }
  0x38   : > { %1025 = vmatmul.mubr.bf16.gmra.mrb[8].mxu0 %v2373_v42 }
  0x39   : > { %1186 = vmatmul.mubr.bf16.gmra.mrb[8].mxu1 %v2374_v43  ;;  %1032 = vmatprep.mubr.bf16.mxu0 %v2375_v44 }
  0x3a   : > { %1193 = vmatprep.mubr.bf16.mxu1 %v2377_v45 }
  0x40   : > { %1033 = vmatmul.mubr.bf16.gmra.mrb[12].mxu0 %v2379_v46 }
  0x41   : > { %1194 = vmatmul.mubr.bf16.gmra.mrb[12].mxu1 %v2380_v47  ;;  %1040 = vmatprep.mubr.bf16.mxu0 %v2381_v48 }
  0x42   : > { %1201 = vmatprep.mubr.bf16.mxu1 %v2383_v49 }
  0x48   : > { %1041 = vmatmul.mubr.bf16.gmra.mrb[16].mxu0 %v2385_v50 }
  0x49   : > { %1202 = vmatmul.mubr.bf16.gmra.mrb[16].mxu1 %v2386_v51  ;;  %1048 = vmatprep.mubr.bf16.mxu0 %v2387_v52 }
  0x4a   : > { %1209 = vmatprep.mubr.bf16.mxu1 %v2389_v53 }
  0x50   : > { %1049 = vmatmul.mubr.bf16.gmra.mrb[20].mxu0 %v2391_v54 }
  0x51   : > { %1210 = vmatmul.mubr.bf16.gmra.mrb[20].mxu1 %v2392_v55  ;;  %1056 = vmatprep.mubr.bf16.mxu0 %v2393_v56 }
  0x52   : > { %1217 = vmatprep.mubr.bf16.mxu1 %v2395_v57 }
  0x58   : > { %1057 = vmatmul.mubr.bf16.gmra.mrb[24].mxu0 %v2397_v58 }
  0x59   : > { %1218 = vmatmul.mubr.bf16.gmra.mrb[24].mxu1 %v2398_v59  ;;  %1064 = vmatprep.mubr.bf16.mxu0 %v2399_v60 }
  0x5a   : > { %1225 = vmatprep.mubr.bf16.mxu1 %v2401_v61 }
  0x60   : > { %1065 = vmatmul.mubr.bf16.gmra.mrb[28].mxu0 %v2403_v62 }
  0x61   : > { %1226 = vmatmul.mubr.bf16.gmra.mrb[28].mxu1 %v2404_v63  ;;  %1072 = vmatprep.mubr.bf16.mxu0 %v2405_v0 }
  0x62   : > { %1233 = vmatprep.mubr.bf16.mxu1 %v2407_v1 }
  0x68   : > { %1073 = vmatmul.mubr.bf16.gmra.mrb[32].mxu0 %v2409_v2 }
  0x69   : > { %1234 = vmatmul.mubr.bf16.gmra.mrb[32].mxu1 %v2410_v3  ;;  %1080 = vmatprep.mubr.bf16.mxu0 %v2411_v4 }
  0x6a   : > { %1241 = vmatprep.mubr.bf16.mxu1 %v2413_v5 }
  0x70   : > { %1081 = vmatmul.mubr.bf16.gmra.mrb[36].mxu0 %v2415_v6 }
  0x71   : > { %1242 = vmatmul.mubr.bf16.gmra.mrb[36].mxu1 %v2416_v7  ;;  %1088 = vmatprep.mubr.bf16.mxu0 %v2417_v8 }
  0x72   : > { %1249 = vmatprep.mubr.bf16.mxu1 %v2419_v9 }
  0x78   : > { %1089 = vmatmul.mubr.bf16.gmra.mrb[40].mxu0 %v2421_v10 }
  0x79   : > { %1250 = vmatmul.mubr.bf16.gmra.mrb[40].mxu1 %v2422_v11  ;;  %1096 = vmatprep.mubr.bf16.mxu0 %v2423_v12 }
  0x7a   : > { %1257 = vmatprep.mubr.bf16.mxu1 %v2425_v13 }
  0x80   : > { %1097 = vmatmul.mubr.bf16.gmra.mrb[44].mxu0 %v2427_v14 }
  0x81   : > { %1258 = vmatmul.mubr.bf16.gmra.mrb[44].mxu1 %v2428_v15  ;;  %1104 = vmatprep.mubr.bf16.mxu0 %v2429_v16 }
  0x82   : > { %1265 = vmatprep.mubr.bf16.mxu1 %v2431_v17 }
  0x88   : > { %1105 = vmatmul.mubr.bf16.gmra.mrb[48].mxu0 %v2433_v18 }
  0x89   : > { %1266 = vmatmul.mubr.bf16.gmra.mrb[48].mxu1 %v2434_v19  ;;  %1112 = vmatprep.mubr.bf16.mxu0 %v2435_v20 }
  0x8a   : > { %1273 = vmatprep.mubr.bf16.mxu1 %v2437_v21 }
  0x90   : > { %1113 = vmatmul.mubr.bf16.gmra.mrb[52].mxu0 %v2439_v22 }
  0x91   : > { %1274 = vmatmul.mubr.bf16.gmra.mrb[52].mxu1 %v2440_v23  ;;  %1120 = vmatprep.mubr.bf16.mxu0 %v2441_v24 }
  0x92   : > { %1281 = vmatprep.mubr.bf16.mxu1 %v2443_v25 }
  0x98   : > { %1121 = vmatmul.mubr.bf16.gmra.mrb[56].mxu0 %v2445_v26 }
  0x99   : > { %1282 = vmatmul.mubr.bf16.gmra.mrb[56].mxu1 %v2446_v27  ;;  %1128 = vmatprep.mubr.bf16.mxu0 %v2447_v28 }
  0x9a   : > { %1289 = vmatprep.mubr.bf16.mxu1 %v2449_v29 }
  0xa0   : > { %1129 = vmatmul.mubr.bf16.gmra.mrb[60].mxu0 %v2451_v30 }
  0xa1   : > { %1290 = vmatmul.mubr.bf16.gmra.mrb[60].mxu1 %v2452_v31 }
  0xfb   : > { %v2093_v32 = vpop.f32.mrb[0].mxu0 }
  0xfc   : > { %v2205_v33 = vpop.f32.mrb[0].mxu1  ;;  %v2094_v34 = vpop.f32.mrb[1].mxu0 }
  0xfd   : > { %v2095_v35 = vadd.f32 %v2094_v34, %v2093_v32  ;;  %v2206_v36 = vpop.f32.mrb[1].mxu1  ;;  %v2096_v37 = vpop.f32.mrb[2].mxu0 }
  0xfe   : > { %v2207_v38 = vadd.f32 %v2206_v36, %v2205_v33  ;;  %v2208_v39 = vpop.f32.mrb[2].mxu1  ;;  %v2097_v40 = vpop.f32.mrb[3].mxu0 }
  0xff   : > { %v2098_v42 = vadd.f32 %v2097_v40, %v2096_v37  ;;  %v2209_v43 = vpop.f32.mrb[3].mxu1 }
 0x100   : > { %v1172_v44 = vadd.f32 %v2207_v38, %v2095_v35  ;;  %v2210_v45 = vadd.f32 %v2209_v43, %v2208_v39 }
 0x102   : > { %v1404_v46 = vadd.f32 %v2689_v41, %v1172_v44  ;;  %v1175_v47 = vadd.f32 %v2210_v45, %v2098_v42 }
 0x103   : > { %v2099_v48 = vpop.f32.mrb[4].mxu0 }
 0x104   : > { %v1468_v49 = vmul.f32 0.01, %v1404_v46  ;;  %v1405_v50 = vadd.f32 %v2689_v41, %v1175_v47  ;;  %v2211_v51 = vpop.f32.mrb[4].mxu1  ;;  %v2100_v52 = vpop.f32.mrb[5].mxu0  ;;  %vm1436_vm0 = vcmp.ge.f32.partialorder %v1404_v46, 0.0 }
 0x105   : > { %v2101_v53 = vadd.f32 %v2100_v52, %v2099_v48  ;;  %v2212_v54 = vpop.f32.mrb[5].mxu1  ;;  %v2102_v55 = vpop.f32.mrb[6].mxu0 }
 0x106   : > { %vm1437_vm1 = vcmp.ge.f32.partialorder %v1405_v50, 0.0  ;;  %v1469_v56 = vmul.f32 0.01, %v1405_v50  ;;  %v2213_v57 = vadd.f32 %v2212_v54, %v2211_v51  ;;  %v2214_v58 = vpop.f32.mrb[6].mxu1  ;;  %v2103_v59 = vpop.f32.mrb[7].mxu0  ;;  %v1500_v62 = vsel %vm1436_vm0, %v1404_v46, %v1468_v49 }
 0x107   : > { %v2104_v60 = vadd.f32 %v2103_v59, %v2102_v55  ;;  %v2215_v61 = vpop.f32.mrb[7].mxu1 }
 0x108   : > { %v1501_v63 = vsel %vm1437_vm1, %v1405_v50, %v1469_v56  ;;  %v1180_v0 = vadd.f32 %v2213_v57, %v2101_v53  ;;  %v2216_v1 = vadd.f32 %v2215_v61, %v2214_v58 }
 0x109   : > { %v1985_v2 = vpack.c.bf16 %v1501_v63, %v1500_v62 }
 0x10a   : > { %v1406_v3 = vadd.f32 %v2689_v41, %v1180_v0  ;;  %v1183_v4 = vadd.f32 %v2216_v1, %v2104_v60 }
 0x10b   : > { %1986 = vst [vmem:[%s2697_s20] sm:$0xff] %v1985_v2   ;;  %v2105_v5 = vpop.f32.mrb[8].mxu0 }
 0x10c   : > { %v1470_v6 = vmul.f32 0.01, %v1406_v3  ;;  %v1407_v7 = vadd.f32 %v2689_v41, %v1183_v4  ;;  %v2217_v8 = vpop.f32.mrb[8].mxu1  ;;  %v2106_v9 = vpop.f32.mrb[9].mxu0  ;;  %vm1438_vm2 = vcmp.ge.f32.partialorder %v1406_v3, 0.0 }
 0x10d   : > { %v2107_v10 = vadd.f32 %v2106_v9, %v2105_v5  ;;  %v2218_v11 = vpop.f32.mrb[9].mxu1  ;;  %v2108_v12 = vpop.f32.mrb[10].mxu0 }
 0x10e   : > { %vm1439_vm3 = vcmp.ge.f32.partialorder %v1407_v7, 0.0  ;;  %v1471_v13 = vmul.f32 0.01, %v1407_v7  ;;  %v2219_v14 = vadd.f32 %v2218_v11, %v2217_v8  ;;  %v2220_v15 = vpop.f32.mrb[10].mxu1  ;;  %v2109_v16 = vpop.f32.mrb[11].mxu0  ;;  %v1502_v19 = vsel %vm1438_vm2, %v1406_v3, %v1470_v6 }
 0x10f   : > { %v2110_v17 = vadd.f32 %v2109_v16, %v2108_v12  ;;  %v2221_v18 = vpop.f32.mrb[11].mxu1 }
 0x110   : > { %v1503_v20 = vsel %vm1439_vm3, %v1407_v7, %v1471_v13  ;;  %v1188_v21 = vadd.f32 %v2219_v14, %v2107_v10  ;;  %v2222_v22 = vadd.f32 %v2221_v18, %v2220_v15 }
 0x111   : > { %v1990_v23 = vpack.c.bf16 %v1503_v20, %v1502_v19 }
 0x112   : > { %v1408_v24 = vadd.f32 %v2689_v41, %v1188_v21  ;;  %v1191_v25 = vadd.f32 %v2222_v22, %v2110_v17 }
 0x113   : > { %2062 = vst [vmem:[%s2697_s20 + $0x8] sm:$0xff] %v1990_v23   ;;  %v2111_v26 = vpop.f32.mrb[12].mxu0 }
 0x114   : > { %v1472_v27 = vmul.f32 0.01, %v1408_v24  ;;  %v1409_v28 = vadd.f32 %v2689_v41, %v1191_v25  ;;  %v2223_v29 = vpop.f32.mrb[12].mxu1  ;;  %v2112_v30 = vpop.f32.mrb[13].mxu0  ;;  %vm1440_vm4 = vcmp.ge.f32.partialorder %v1408_v24, 0.0 }
 0x115   : > { %v2113_v31 = vadd.f32 %v2112_v30, %v2111_v26  ;;  %v2224_v32 = vpop.f32.mrb[13].mxu1  ;;  %v2114_v33 = vpop.f32.mrb[14].mxu0 }
 0x116   : > { %vm1441_vm5 = vcmp.ge.f32.partialorder %v1409_v28, 0.0  ;;  %v1473_v34 = vmul.f32 0.01, %v1409_v28  ;;  %v2225_v35 = vadd.f32 %v2224_v32, %v2223_v29  ;;  %v2226_v36 = vpop.f32.mrb[14].mxu1  ;;  %v2115_v37 = vpop.f32.mrb[15].mxu0  ;;  %v1504_v40 = vsel %vm1440_vm4, %v1408_v24, %v1472_v27 }
 0x117   : > { %v2116_v38 = vadd.f32 %v2115_v37, %v2114_v33  ;;  %v2227_v39 = vpop.f32.mrb[15].mxu1 }
 0x118   : > { %v1505_v42 = vsel %vm1441_vm5, %v1409_v28, %v1473_v34  ;;  %v1196_v43 = vadd.f32 %v2225_v35, %v2113_v31  ;;  %v2228_v44 = vadd.f32 %v2227_v39, %v2226_v36 }
 0x119   : > { %v1995_v45 = vpack.c.bf16 %v1505_v42, %v1504_v40 }
 0x11a   : > { %v1410_v46 = vadd.f32 %v2689_v41, %v1196_v43  ;;  %v1199_v47 = vadd.f32 %v2228_v44, %v2116_v38 }
 0x11b   : > { %2063 = vst [vmem:[%s2697_s20 + $0x10] sm:$0xff] %v1995_v45   ;;  %v2117_v48 = vpop.f32.mrb[16].mxu0 }
 0x11c   : > { %v1474_v49 = vmul.f32 0.01, %v1410_v46  ;;  %v1411_v50 = vadd.f32 %v2689_v41, %v1199_v47  ;;  %v2229_v51 = vpop.f32.mrb[16].mxu1  ;;  %v2118_v52 = vpop.f32.mrb[17].mxu0  ;;  %vm1442_vm6 = vcmp.ge.f32.partialorder %v1410_v46, 0.0 }
 0x11d   : > { %v2119_v53 = vadd.f32 %v2118_v52, %v2117_v48  ;;  %v2230_v54 = vpop.f32.mrb[17].mxu1  ;;  %v2120_v55 = vpop.f32.mrb[18].mxu0 }
 0x11e   : > { %vm1443_vm7 = vcmp.ge.f32.partialorder %v1411_v50, 0.0  ;;  %v1475_v56 = vmul.f32 0.01, %v1411_v50  ;;  %v2231_v57 = vadd.f32 %v2230_v54, %v2229_v51  ;;  %v2232_v58 = vpop.f32.mrb[18].mxu1  ;;  %v2121_v59 = vpop.f32.mrb[19].mxu0  ;;  %v1506_v62 = vsel %vm1442_vm6, %v1410_v46, %v1474_v49 }
 0x11f   : > { %v2122_v60 = vadd.f32 %v2121_v59, %v2120_v55  ;;  %v2233_v61 = vpop.f32.mrb[19].mxu1 }
 0x120   : > { %v1507_v63 = vsel %vm1443_vm7, %v1411_v50, %v1475_v56  ;;  %v1204_v0 = vadd.f32 %v2231_v57, %v2119_v53  ;;  %v2234_v1 = vadd.f32 %v2233_v61, %v2232_v58 }
 0x121   : > { %v2000_v2 = vpack.c.bf16 %v1507_v63, %v1506_v62 }
 0x122   : > { %v1412_v3 = vadd.f32 %v2689_v41, %v1204_v0  ;;  %v1207_v4 = vadd.f32 %v2234_v1, %v2122_v60 }
 0x123   : > { %2064 = vst [vmem:[%s2697_s20 + $0x18] sm:$0xff] %v2000_v2   ;;  %v2123_v5 = vpop.f32.mrb[20].mxu0 }
 0x124   : > { %v1476_v6 = vmul.f32 0.01, %v1412_v3  ;;  %v1413_v7 = vadd.f32 %v2689_v41, %v1207_v4  ;;  %v2235_v8 = vpop.f32.mrb[20].mxu1  ;;  %v2124_v9 = vpop.f32.mrb[21].mxu0  ;;  %vm1444_vm8 = vcmp.ge.f32.partialorder %v1412_v3, 0.0 }
 0x125   : > { %v2125_v10 = vadd.f32 %v2124_v9, %v2123_v5  ;;  %v2236_v11 = vpop.f32.mrb[21].mxu1  ;;  %v2126_v12 = vpop.f32.mrb[22].mxu0 }
 0x126   : > { %vm1445_vm9 = vcmp.ge.f32.partialorder %v1413_v7, 0.0  ;;  %v1477_v13 = vmul.f32 0.01, %v1413_v7  ;;  %v2237_v14 = vadd.f32 %v2236_v11, %v2235_v8  ;;  %v2238_v15 = vpop.f32.mrb[22].mxu1  ;;  %v2127_v16 = vpop.f32.mrb[23].mxu0  ;;  %v1508_v19 = vsel %vm1444_vm8, %v1412_v3, %v1476_v6 }
 0x127   : > { %v2128_v17 = vadd.f32 %v2127_v16, %v2126_v12  ;;  %v2239_v18 = vpop.f32.mrb[23].mxu1 }
 0x128   : > { %v1509_v20 = vsel %vm1445_vm9, %v1413_v7, %v1477_v13  ;;  %v1212_v21 = vadd.f32 %v2237_v14, %v2125_v10  ;;  %v2240_v22 = vadd.f32 %v2239_v18, %v2238_v15 }
 0x129   : > { %v2005_v23 = vpack.c.bf16 %v1509_v20, %v1508_v19 }
 0x12a   : > { %v1414_v24 = vadd.f32 %v2689_v41, %v1212_v21  ;;  %v1215_v25 = vadd.f32 %v2240_v22, %v2128_v17 }
 0x12b   : > { %2065 = vst [vmem:[%s2697_s20 + $0x20] sm:$0xff] %v2005_v23   ;;  %v2129_v26 = vpop.f32.mrb[24].mxu0 }
 0x12c   : > { %v1478_v27 = vmul.f32 0.01, %v1414_v24  ;;  %v1415_v28 = vadd.f32 %v2689_v41, %v1215_v25  ;;  %v2241_v29 = vpop.f32.mrb[24].mxu1  ;;  %v2130_v30 = vpop.f32.mrb[25].mxu0  ;;  %vm1446_vm10 = vcmp.ge.f32.partialorder %v1414_v24, 0.0 }
 0x12d   : > { %v2131_v31 = vadd.f32 %v2130_v30, %v2129_v26  ;;  %v2242_v32 = vpop.f32.mrb[25].mxu1  ;;  %v2132_v33 = vpop.f32.mrb[26].mxu0 }
 0x12e   : > { %vm1447_vm11 = vcmp.ge.f32.partialorder %v1415_v28, 0.0  ;;  %v1479_v34 = vmul.f32 0.01, %v1415_v28  ;;  %v2243_v35 = vadd.f32 %v2242_v32, %v2241_v29  ;;  %v2244_v36 = vpop.f32.mrb[26].mxu1  ;;  %v2133_v37 = vpop.f32.mrb[27].mxu0  ;;  %v1510_v40 = vsel %vm1446_vm10, %v1414_v24, %v1478_v27 }
 0x12f   : > { %v2134_v38 = vadd.f32 %v2133_v37, %v2132_v33  ;;  %v2245_v39 = vpop.f32.mrb[27].mxu1 }
 0x130   : > { %v1511_v42 = vsel %vm1447_vm11, %v1415_v28, %v1479_v34  ;;  %v1220_v43 = vadd.f32 %v2243_v35, %v2131_v31  ;;  %v2246_v44 = vadd.f32 %v2245_v39, %v2244_v36 }
 0x131   : > { %v2010_v45 = vpack.c.bf16 %v1511_v42, %v1510_v40 }
 0x132   : > { %v1416_v46 = vadd.f32 %v2689_v41, %v1220_v43  ;;  %v1223_v47 = vadd.f32 %v2246_v44, %v2134_v38 }
 0x133   : > { %2066 = vst [vmem:[%s2697_s20 + $0x28] sm:$0xff] %v2010_v45   ;;  %v2135_v48 = vpop.f32.mrb[28].mxu0 }
 0x134   : > { %v1480_v49 = vmul.f32 0.01, %v1416_v46  ;;  %v1417_v50 = vadd.f32 %v2689_v41, %v1223_v47  ;;  %v2247_v51 = vpop.f32.mrb[28].mxu1  ;;  %v2136_v52 = vpop.f32.mrb[29].mxu0  ;;  %vm1448_vm12 = vcmp.ge.f32.partialorder %v1416_v46, 0.0 }
 0x135   : > { %v2137_v53 = vadd.f32 %v2136_v52, %v2135_v48  ;;  %v2248_v54 = vpop.f32.mrb[29].mxu1  ;;  %v2138_v55 = vpop.f32.mrb[30].mxu0 }
 0x136   : > { %vm1449_vm13 = vcmp.ge.f32.partialorder %v1417_v50, 0.0  ;;  %v1481_v56 = vmul.f32 0.01, %v1417_v50  ;;  %v2249_v57 = vadd.f32 %v2248_v54, %v2247_v51  ;;  %v2250_v58 = vpop.f32.mrb[30].mxu1  ;;  %v2139_v59 = vpop.f32.mrb[31].mxu0  ;;  %v1512_v62 = vsel %vm1448_vm12, %v1416_v46, %v1480_v49 }
 0x137   : > { %v2140_v60 = vadd.f32 %v2139_v59, %v2138_v55  ;;  %v2251_v61 = vpop.f32.mrb[31].mxu1 }
 0x138   : > { %v1513_v63 = vsel %vm1449_vm13, %v1417_v50, %v1481_v56  ;;  %v1228_v0 = vadd.f32 %v2249_v57, %v2137_v53  ;;  %v2252_v1 = vadd.f32 %v2251_v61, %v2250_v58 }
 0x139   : > { %v2015_v2 = vpack.c.bf16 %v1513_v63, %v1512_v62 }
 0x13a   : > { %v1418_v3 = vadd.f32 %v2689_v41, %v1228_v0  ;;  %v1231_v4 = vadd.f32 %v2252_v1, %v2140_v60 }
 0x13b   : > { %2067 = vst [vmem:[%s2697_s20 + $0x30] sm:$0xff] %v2015_v2   ;;  %v2141_v5 = vpop.f32.mrb[32].mxu0 }
 0x13c   : > { %v1482_v6 = vmul.f32 0.01, %v1418_v3  ;;  %v1419_v7 = vadd.f32 %v2689_v41, %v1231_v4  ;;  %v2253_v8 = vpop.f32.mrb[32].mxu1  ;;  %v2142_v9 = vpop.f32.mrb[33].mxu0  ;;  %vm1450_vm14 = vcmp.ge.f32.partialorder %v1418_v3, 0.0 }
 0x13d   : > { %v2143_v10 = vadd.f32 %v2142_v9, %v2141_v5  ;;  %v2254_v11 = vpop.f32.mrb[33].mxu1  ;;  %v2144_v12 = vpop.f32.mrb[34].mxu0 }
 0x13e   : > { %vm1451_vm15 = vcmp.ge.f32.partialorder %v1419_v7, 0.0  ;;  %v1483_v13 = vmul.f32 0.01, %v1419_v7  ;;  %v2255_v14 = vadd.f32 %v2254_v11, %v2253_v8  ;;  %v2256_v15 = vpop.f32.mrb[34].mxu1  ;;  %v2145_v16 = vpop.f32.mrb[35].mxu0  ;;  %v1514_v19 = vsel %vm1450_vm14, %v1418_v3, %v1482_v6 }
 0x13f   : > { %v2146_v17 = vadd.f32 %v2145_v16, %v2144_v12  ;;  %v2257_v18 = vpop.f32.mrb[35].mxu1 }
 0x140   : > { %v1515_v20 = vsel %vm1451_vm15, %v1419_v7, %v1483_v13  ;;  %v1236_v21 = vadd.f32 %v2255_v14, %v2143_v10  ;;  %v2258_v22 = vadd.f32 %v2257_v18, %v2256_v15 }
 0x141   : > { %v2020_v23 = vpack.c.bf16 %v1515_v20, %v1514_v19 }
 0x142   : > { %v1420_v24 = vadd.f32 %v2689_v41, %v1236_v21  ;;  %v1239_v25 = vadd.f32 %v2258_v22, %v2146_v17 }
 0x143   : > { %2068 = vst [vmem:[%s2697_s20 + $0x38] sm:$0xff] %v2020_v23   ;;  %v2147_v26 = vpop.f32.mrb[36].mxu0 }
 0x144   : > { %v1484_v27 = vmul.f32 0.01, %v1420_v24  ;;  %v1421_v28 = vadd.f32 %v2689_v41, %v1239_v25  ;;  %v2259_v29 = vpop.f32.mrb[36].mxu1  ;;  %v2148_v30 = vpop.f32.mrb[37].mxu0  ;;  %vm1452_vm0 = vcmp.ge.f32.partialorder %v1420_v24, 0.0 }
 0x145   : > { %v2149_v31 = vadd.f32 %v2148_v30, %v2147_v26  ;;  %v2260_v32 = vpop.f32.mrb[37].mxu1  ;;  %v2150_v33 = vpop.f32.mrb[38].mxu0 }
 0x146   : > { %vm1453_vm1 = vcmp.ge.f32.partialorder %v1421_v28, 0.0  ;;  %v1485_v34 = vmul.f32 0.01, %v1421_v28  ;;  %v2261_v35 = vadd.f32 %v2260_v32, %v2259_v29  ;;  %v2262_v36 = vpop.f32.mrb[38].mxu1  ;;  %v2151_v37 = vpop.f32.mrb[39].mxu0  ;;  %v1516_v40 = vsel %vm1452_vm0, %v1420_v24, %v1484_v27 }
 0x147   : > { %v2152_v38 = vadd.f32 %v2151_v37, %v2150_v33  ;;  %v2263_v39 = vpop.f32.mrb[39].mxu1 }
 0x148   : > { %v1517_v42 = vsel %vm1453_vm1, %v1421_v28, %v1485_v34  ;;  %v1244_v43 = vadd.f32 %v2261_v35, %v2149_v31  ;;  %v2264_v44 = vadd.f32 %v2263_v39, %v2262_v36 }
 0x149   : > { %v2025_v45 = vpack.c.bf16 %v1517_v42, %v1516_v40 }
 0x14a   : > { %v1422_v46 = vadd.f32 %v2689_v41, %v1244_v43  ;;  %v1247_v47 = vadd.f32 %v2264_v44, %v2152_v38 }
 0x14b   : > { %2069 = vst [vmem:[%s2697_s20 + $0x40] sm:$0xff] %v2025_v45   ;;  %v2153_v48 = vpop.f32.mrb[40].mxu0 }
 0x14c   : > { %v1486_v49 = vmul.f32 0.01, %v1422_v46  ;;  %v1423_v50 = vadd.f32 %v2689_v41, %v1247_v47  ;;  %v2265_v51 = vpop.f32.mrb[40].mxu1  ;;  %v2154_v52 = vpop.f32.mrb[41].mxu0  ;;  %vm1454_vm2 = vcmp.ge.f32.partialorder %v1422_v46, 0.0 }
 0x14d   : > { %v2155_v53 = vadd.f32 %v2154_v52, %v2153_v48  ;;  %v2266_v54 = vpop.f32.mrb[41].mxu1  ;;  %v2156_v55 = vpop.f32.mrb[42].mxu0 }
 0x14e   : > { %vm1455_vm3 = vcmp.ge.f32.partialorder %v1423_v50, 0.0  ;;  %v1487_v56 = vmul.f32 0.01, %v1423_v50  ;;  %v2267_v57 = vadd.f32 %v2266_v54, %v2265_v51  ;;  %v2268_v58 = vpop.f32.mrb[42].mxu1  ;;  %v2157_v59 = vpop.f32.mrb[43].mxu0  ;;  %v1518_v62 = vsel %vm1454_vm2, %v1422_v46, %v1486_v49 }
 0x14f   : > { %v2158_v60 = vadd.f32 %v2157_v59, %v2156_v55  ;;  %v2269_v61 = vpop.f32.mrb[43].mxu1 }
 0x150   : > { %v1519_v63 = vsel %vm1455_vm3, %v1423_v50, %v1487_v56  ;;  %v1252_v0 = vadd.f32 %v2267_v57, %v2155_v53  ;;  %v2270_v1 = vadd.f32 %v2269_v61, %v2268_v58 }
 0x151   : > { %v2030_v2 = vpack.c.bf16 %v1519_v63, %v1518_v62 }
 0x152   : > { %v1424_v3 = vadd.f32 %v2689_v41, %v1252_v0  ;;  %v1255_v4 = vadd.f32 %v2270_v1, %v2158_v60 }
 0x153   : > { %2070 = vst [vmem:[%s2697_s20 + $0x48] sm:$0xff] %v2030_v2   ;;  %v2159_v5 = vpop.f32.mrb[44].mxu0 }
 0x154   : > { %v1488_v6 = vmul.f32 0.01, %v1424_v3  ;;  %v1425_v7 = vadd.f32 %v2689_v41, %v1255_v4  ;;  %v2271_v8 = vpop.f32.mrb[44].mxu1  ;;  %v2160_v9 = vpop.f32.mrb[45].mxu0  ;;  %vm1456_vm4 = vcmp.ge.f32.partialorder %v1424_v3, 0.0 }
 0x155   : > { %v2161_v10 = vadd.f32 %v2160_v9, %v2159_v5  ;;  %v2272_v11 = vpop.f32.mrb[45].mxu1  ;;  %v2162_v12 = vpop.f32.mrb[46].mxu0 }
 0x156   : > { %vm1457_vm5 = vcmp.ge.f32.partialorder %v1425_v7, 0.0  ;;  %v1489_v13 = vmul.f32 0.01, %v1425_v7  ;;  %v2273_v14 = vadd.f32 %v2272_v11, %v2271_v8  ;;  %v2274_v15 = vpop.f32.mrb[46].mxu1  ;;  %v2163_v16 = vpop.f32.mrb[47].mxu0  ;;  %v1520_v19 = vsel %vm1456_vm4, %v1424_v3, %v1488_v6 }
 0x157   : > { %v2164_v17 = vadd.f32 %v2163_v16, %v2162_v12  ;;  %v2275_v18 = vpop.f32.mrb[47].mxu1 }
 0x158   : > { %v1521_v20 = vsel %vm1457_vm5, %v1425_v7, %v1489_v13  ;;  %v1260_v21 = vadd.f32 %v2273_v14, %v2161_v10  ;;  %v2276_v22 = vadd.f32 %v2275_v18, %v2274_v15 }
 0x159   : > { %v2035_v23 = vpack.c.bf16 %v1521_v20, %v1520_v19 }
 0x15a   : > { %v1426_v24 = vadd.f32 %v2689_v41, %v1260_v21  ;;  %v1263_v25 = vadd.f32 %v2276_v22, %v2164_v17 }
 0x15b   : > { %2071 = vst [vmem:[%s2697_s20 + $0x50] sm:$0xff] %v2035_v23   ;;  %v2165_v26 = vpop.f32.mrb[48].mxu0 }
 0x15c   : > { %v1490_v27 = vmul.f32 0.01, %v1426_v24  ;;  %v1427_v28 = vadd.f32 %v2689_v41, %v1263_v25  ;;  %v2277_v29 = vpop.f32.mrb[48].mxu1  ;;  %v2166_v30 = vpop.f32.mrb[49].mxu0  ;;  %vm1458_vm6 = vcmp.ge.f32.partialorder %v1426_v24, 0.0 }
 0x15d   : > { %v2167_v31 = vadd.f32 %v2166_v30, %v2165_v26  ;;  %v2278_v32 = vpop.f32.mrb[49].mxu1  ;;  %v2168_v33 = vpop.f32.mrb[50].mxu0 }
 0x15e   : > { %vm1459_vm7 = vcmp.ge.f32.partialorder %v1427_v28, 0.0  ;;  %v1491_v34 = vmul.f32 0.01, %v1427_v28  ;;  %v2279_v35 = vadd.f32 %v2278_v32, %v2277_v29  ;;  %v2280_v36 = vpop.f32.mrb[50].mxu1  ;;  %v2169_v37 = vpop.f32.mrb[51].mxu0  ;;  %v1522_v40 = vsel %vm1458_vm6, %v1426_v24, %v1490_v27 }
 0x15f   : > { %v2170_v38 = vadd.f32 %v2169_v37, %v2168_v33  ;;  %v2281_v39 = vpop.f32.mrb[51].mxu1 }
 0x160   : > { %v1523_v42 = vsel %vm1459_vm7, %v1427_v28, %v1491_v34  ;;  %v1268_v43 = vadd.f32 %v2279_v35, %v2167_v31  ;;  %v2282_v44 = vadd.f32 %v2281_v39, %v2280_v36 }
 0x161   : > { %v2040_v45 = vpack.c.bf16 %v1523_v42, %v1522_v40 }
 0x162   : > { %v1428_v46 = vadd.f32 %v2689_v41, %v1268_v43  ;;  %v1271_v47 = vadd.f32 %v2282_v44, %v2170_v38 }
 0x163   : > { %2072 = vst [vmem:[%s2697_s20 + $0x58] sm:$0xff] %v2040_v45   ;;  %v2171_v48 = vpop.f32.mrb[52].mxu0 }
 0x164   : > { %v1492_v49 = vmul.f32 0.01, %v1428_v46  ;;  %v1429_v50 = vadd.f32 %v2689_v41, %v1271_v47  ;;  %v2283_v51 = vpop.f32.mrb[52].mxu1  ;;  %v2172_v52 = vpop.f32.mrb[53].mxu0  ;;  %vm1460_vm8 = vcmp.ge.f32.partialorder %v1428_v46, 0.0 }
 0x165   : > { %v2173_v53 = vadd.f32 %v2172_v52, %v2171_v48  ;;  %v2284_v54 = vpop.f32.mrb[53].mxu1  ;;  %v2174_v55 = vpop.f32.mrb[54].mxu0 }
 0x166   : > { %vm1461_vm9 = vcmp.ge.f32.partialorder %v1429_v50, 0.0  ;;  %v1493_v56 = vmul.f32 0.01, %v1429_v50  ;;  %v2285_v57 = vadd.f32 %v2284_v54, %v2283_v51  ;;  %v2286_v58 = vpop.f32.mrb[54].mxu1  ;;  %v2175_v59 = vpop.f32.mrb[55].mxu0  ;;  %v1524_v62 = vsel %vm1460_vm8, %v1428_v46, %v1492_v49 }
 0x167   : > { %v2176_v60 = vadd.f32 %v2175_v59, %v2174_v55  ;;  %v2287_v61 = vpop.f32.mrb[55].mxu1 }
 0x168   : > { %v1525_v63 = vsel %vm1461_vm9, %v1429_v50, %v1493_v56  ;;  %v1276_v0 = vadd.f32 %v2285_v57, %v2173_v53  ;;  %v2288_v1 = vadd.f32 %v2287_v61, %v2286_v58 }
 0x169   : > { %v2045_v2 = vpack.c.bf16 %v1525_v63, %v1524_v62 }
 0x16a   : > { %v1430_v3 = vadd.f32 %v2689_v41, %v1276_v0  ;;  %v1279_v4 = vadd.f32 %v2288_v1, %v2176_v60 }
 0x16b   : > { %2073 = vst [vmem:[%s2697_s20 + $0x60] sm:$0xff] %v2045_v2   ;;  %v2177_v5 = vpop.f32.mrb[56].mxu0 }
 0x16c   : > { %v1494_v6 = vmul.f32 0.01, %v1430_v3  ;;  %v1431_v7 = vadd.f32 %v2689_v41, %v1279_v4  ;;  %v2289_v8 = vpop.f32.mrb[56].mxu1  ;;  %v2178_v9 = vpop.f32.mrb[57].mxu0  ;;  %vm1462_vm10 = vcmp.ge.f32.partialorder %v1430_v3, 0.0 }
 0x16d   : > { %v2179_v10 = vadd.f32 %v2178_v9, %v2177_v5  ;;  %v2290_v11 = vpop.f32.mrb[57].mxu1  ;;  %v2180_v12 = vpop.f32.mrb[58].mxu0 }
 0x16e   : > { %vm1463_vm11 = vcmp.ge.f32.partialorder %v1431_v7, 0.0  ;;  %v1495_v13 = vmul.f32 0.01, %v1431_v7  ;;  %v2291_v14 = vadd.f32 %v2290_v11, %v2289_v8  ;;  %v2292_v15 = vpop.f32.mrb[58].mxu1  ;;  %v2181_v16 = vpop.f32.mrb[59].mxu0  ;;  %v1526_v19 = vsel %vm1462_vm10, %v1430_v3, %v1494_v6 }
 0x16f   : > { %v2182_v17 = vadd.f32 %v2181_v16, %v2180_v12  ;;  %v2293_v18 = vpop.f32.mrb[59].mxu1 }
 0x170   : > { %v1527_v20 = vsel %vm1463_vm11, %v1431_v7, %v1495_v13  ;;  %v1284_v21 = vadd.f32 %v2291_v14, %v2179_v10  ;;  %v2294_v22 = vadd.f32 %v2293_v18, %v2292_v15 }
 0x171   : > { %v2050_v23 = vpack.c.bf16 %v1527_v20, %v1526_v19 }
 0x172   : > { %v1432_v24 = vadd.f32 %v2689_v41, %v1284_v21  ;;  %v1287_v25 = vadd.f32 %v2294_v22, %v2182_v17 }
 0x173   : > { %2074 = vst [vmem:[%s2697_s20 + $0x68] sm:$0xff] %v2050_v23   ;;  %v2183_v26 = vpop.f32.mrb[60].mxu0 }
 0x174   : > { %v1496_v27 = vmul.f32 0.01, %v1432_v24  ;;  %v1433_v28 = vadd.f32 %v2689_v41, %v1287_v25  ;;  %v2295_v29 = vpop.f32.mrb[60].mxu1  ;;  %v2184_v30 = vpop.f32.mrb[61].mxu0  ;;  %vm1464_vm12 = vcmp.ge.f32.partialorder %v1432_v24, 0.0 }
 0x175   : > { %v2185_v31 = vadd.f32 %v2184_v30, %v2183_v26  ;;  %v2296_v32 = vpop.f32.mrb[61].mxu1  ;;  %v2186_v33 = vpop.f32.mrb[62].mxu0 }
 0x176   : > { %vm1465_vm13 = vcmp.ge.f32.partialorder %v1433_v28, 0.0  ;;  %v1497_v34 = vmul.f32 0.01, %v1433_v28  ;;  %v2297_v35 = vadd.f32 %v2296_v32, %v2295_v29  ;;  %v2298_v36 = vpop.f32.mrb[62].mxu1  ;;  %v2187_v37 = vpop.f32.mrb[63].mxu0  ;;  %v1528_v40 = vsel %vm1464_vm12, %v1432_v24, %v1496_v27 }
 0x177   : > { %v2188_v38 = vadd.f32 %v2187_v37, %v2186_v33  ;;  %v2299_v39 = vpop.f32.mrb[63].mxu1 }
 0x178   : > { %v1529_v42 = vsel %vm1465_vm13, %v1433_v28, %v1497_v34  ;;  %v1292_v43 = vadd.f32 %v2297_v35, %v2185_v31  ;;  %v2300_v44 = vadd.f32 %v2299_v39, %v2298_v36 }
 0x179   : > { %v2055_v45 = vpack.c.bf16 %v1529_v42, %v1528_v40 }
 0x17a   : > { %v1434_v46 = vadd.f32 %v2689_v41, %v1292_v43  ;;  %v1295_v47 = vadd.f32 %v2300_v44, %v2188_v38 }
 0x17b   : > { %2075 = vst [vmem:[%s2697_s20 + $0x70] sm:$0xff] %v2055_v45  }
 0x17c   : > { %v1498_v48 = vmul.f32 0.01, %v1434_v46  ;;  %v1435_v49 = vadd.f32 %v2689_v41, %v1295_v47  ;;  %vm1466_vm14 = vcmp.ge.f32.partialorder %v1434_v46, 0.0 }
 0x17e   : > { %vm1467_vm15 = vcmp.ge.f32.partialorder %v1435_v49, 0.0  ;;  %v1499_v50 = vmul.f32 0.01, %v1435_v49  ;;  %v1530_v51 = vsel %vm1466_vm14, %v1434_v46, %v1498_v48 }
 0x180   : > { %v1531_v52 = vsel %vm1467_vm15, %v1435_v49, %v1499_v50 }
 0x181   : > { %v2060_v53 = vpack.c.bf16 %v1531_v52, %v1530_v51 }
 0x183   : > { %2076 = vst [vmem:[%s2697_s20 + $0x78] sm:$0xff] %v2060_v53  }
 0x184 PF: > { %s13_s14 = sadd.s32 1, %s2475_s14   ;;  %s2758_s12 = smov %s2471_s13 }
 0x185   : > { %p10_p5 = scmp.ge.s32.totalorder %s13_s14, 4   ;;  %s2759_s13 = smov %s2761_s15 }
 0x187   :  { %12 = sbr.rel (!%p10_p5) target bundleno = 2 (0x2), region = 76 }

// kernel: video_decoder_forward.9
= control target key start
LH: loop header
LB: loop body
LE: loop exit
PB: predicated region body
PF: predicated region fallthrough
CT: control target
= control target key end

     0   :  { %s1777_s12 = smov 0   ;;  %s1779_s13 = smov 0   ;;  %s1970_s0 = inlined_call_operand.vmem [shape: bf16[4096,256], index: 0, kind: input, shape index: {}]   ;;  %s1971_s1 = inlined_call_operand.vmem [shape: bf16[256,128], index: 1, kind: input, shape index: {}]   ;;  %s1972_s2 = inlined_call_operand.vmem [shape: f32[1,128], index: 2, kind: input, shape index: {}]   ;;  %s1973_s3 = inlined_call_operand.vmem [shape: f32[4096,128], index: 3, kind: output, shape index: {}]  }
   0x1   :  { %s1781_s14 = smov 0  }
   0x2 LB: > { %s32_s15 = sadd.s32 1, %s1751_s13  ;;  %p1299_p0 = scmp.ge.s32.totalorder %s1755_s14, 1  ;;  %s1755_s14 = sphi %s1781_s14, %s13_s14   ;;  %s1751_s13 = sphi %s1779_s13, %s1975_s13   ;;  %s1747_s12 = sphi %s1777_s12, %s1974_s12  }
   0x3   : > { %p34_p1 = scmp.ge.s32.totalorder %s32_s15, 16  ;;  %p191_p2 = scmp.lt.s32.totalorder %s1755_s14, 17 }
   0x5   : > { %s1977_s15 = smov (%p34_p1, %s32_s15), 0  ;;  %p192_p3 = pnand %p1299_p0, %p191_p2 }
   0x6   : > { %v1541_v0 = vld [vmem:[%s1971_s1 + $0x40] sm:$0xff] (!%p192_p3)   ;;  %s1300_s18 = sshll.u32 (!%p192_p3), %s1747_s12, 5  ;;  %v1543_v2 = vld [vmem:[%s1971_s1 + $0x48] sm:$0xff] (!%p192_p3)   ;;  %v1545_v4 = vld [vmem:[%s1971_s1 + $0x50] sm:$0xff] (!%p192_p3)  }
   0x7   : > { %195 = sbr.rel (%p192_p3) target bundleno = 348 (0x15c), region = 32  ;;  %v1542_v1 = vld [vmem:[%s1971_s1] sm:$0xff] (!%p192_p3)   ;;  %1389 = vmatprep.subr.bf16.mxu0 (!%p192_p3), %v1541_v0  ;;  %1501 = vmatprep.subr.bf16.mxu1 (!%p192_p3), %v1541_v0  ;;  %v1544_v3 = vld [vmem:[%s1971_s1 + $0x8] sm:$0xff] (!%p192_p3)   ;;  %p236_p4 = scmp.lt.s32.totalorder (!%p192_p3), %s1300_s18, 511  ;;  %v1546_v5 = vld [vmem:[%s1971_s1 + $0x10] sm:$0xff] (!%p192_p3)  }
   0x8   : > { %1390 = vmatpush3.bf16.msra.mxu0 (!%p192_p3), %v1542_v1  ;;  %1509 = vmatpush3.bf16.msra.mxu1 (!%p192_p3), %v1542_v1  ;;  %v1547_v6 = vld [vmem:[%s1971_s1 + $0x58] sm:$0xff] (!%p192_p3)   ;;  %v1549_v8 = vld [vmem:[%s1971_s1 + $0x60] sm:$0xff] (!%p192_p3)   ;;  %v1551_v10 = vld [vmem:[%s1971_s1 + $0x68] sm:$0xff] (!%p192_p3)  }
   0x9   : > { %1391 = vmatprep.subr.bf16.mxu0 (!%p192_p3), %v1543_v2  ;;  %1502 = vmatprep.subr.bf16.mxu1 (!%p192_p3), %v1543_v2  ;;  %v1548_v7 = vld [vmem:[%s1971_s1 + $0x18] sm:$0xff] (!%p192_p3)   ;;  %v1550_v9 = vld [vmem:[%s1971_s1 + $0x20] sm:$0xff] (!%p192_p3)   ;;  %v1552_v13 = vld [vmem:[%s1971_s1 + $0x28] sm:$0xff] (!%p192_p3)  }
   0xa   : > { %v1553_v14 = vld [vmem:[%s1971_s1 + $0x70] sm:$0xff] (!%p192_p3)   ;;  %v1555_v16 = vld [vmem:[%s1971_s1 + $0x78] sm:$0xff] (!%p192_p3)   ;;  %v1888_v51 = vld [vmem:[%s1972_s2] ss:$0 sm:$0xff] (!%p192_p3) }
   0xb   : > { %v1554_v15 = vld [vmem:[%s1971_s1 + $0x30] sm:$0xff] (!%p192_p3)   ;;  %v1556_v17 = vld [vmem:[%s1971_s1 + $0x38] sm:$0xff] (!%p192_p3)  }
   0xc   : > { %1392 = vmatpush3.bf16.msra.mxu0 (!%p192_p3), %v1544_v3  ;;  %1510 = vmatpush3.bf16.msra.mxu1 (!%p192_p3), %v1544_v3 }
   0xd   : > { %1393 = vmatprep.subr.bf16.mxu0 (!%p192_p3), %v1545_v4  ;;  %1503 = vmatprep.subr.bf16.mxu1 (!%p192_p3), %v1545_v4 }
   0xe   : > { %s1979_s18 = smov (!%p236_p4, %s1300_s18), 511 }
   0xf   : > { %s1388_s6 = sshll.u32 %s1979_s18, 3 }
  0x10   : > { %1394 = vmatpush3.bf16.msra.mxu0 %v1546_v5  ;;  %1511 = vmatpush3.bf16.msra.mxu1 %v1546_v5  ;;  %s1830_s11 = scalar_lea.vmem %s1970_s0, %s1388_s6  ;;  %s1909_s8 = scalar_lea.vmem %s1973_s3, %s1388_s6 }
  0x11   : > { %1395 = vmatprep.subr.bf16.mxu0 %v1547_v6  ;;  %1504 = vmatprep.subr.bf16.mxu1 %v1547_v6  ;;  %v1559_v11 = vld [vmem:[%s1830_s11 + $0x4] ss:$8 sps:$4 sm:$0xff]   ;;  %v1557_v18 = vld [vmem:[%s1830_s11] ss:$8 sps:$4 sm:$0xff]   ;;  %v1563_v20 = vld [vmem:[%s1830_s11 + $0x14] ss:$8 sps:$4 sm:$0xff]  }
  0x12   : > { %v1562_v12 = vld [vmem:[%s1830_s11 + $0x84] ss:$8 sps:$4 sm:$0xff]   ;;  %688 = vmatprep.mubr.bf16.mxu0 %v1559_v11  ;;  %v1560_v19 = vld [vmem:[%s1830_s11 + $0x80] ss:$8 sps:$4 sm:$0xff]   ;;  %v1565_v21 = vld [vmem:[%s1830_s11 + $0x94] ss:$8 sps:$4 sm:$0xff]  }
  0x13   : > { %752 = vmatprep.mubr.bf16.mxu1 %v1562_v12  ;;  %v1567_v22 = vld [vmem:[%s1830_s11 + $0x10] ss:$8 sps:$4 sm:$0xff]   ;;  %v1569_v24 = vld [vmem:[%s1830_s11 + $0x24] ss:$8 sps:$4 sm:$0xff]   ;;  %v1573_v26 = vld [vmem:[%s1830_s11 + $0x20] ss:$8 sps:$4 sm:$0xff]  }
  0x14   : > { %1396 = vmatpush3.bf16.msra.mxu0 %v1548_v7  ;;  %1512 = vmatpush3.bf16.msra.mxu1 %v1548_v7  ;;  %v1568_v23 = vld [vmem:[%s1830_s11 + $0x90] ss:$8 sps:$4 sm:$0xff]   ;;  %v1571_v25 = vld [vmem:[%s1830_s11 + $0xa4] ss:$8 sps:$4 sm:$0xff]   ;;  %v1574_v27 = vld [vmem:[%s1830_s11 + $0xa0] ss:$8 sps:$4 sm:$0xff]  }
  0x15   : > { %1397 = vmatprep.subr.bf16.mxu0 %v1549_v8  ;;  %1505 = vmatprep.subr.bf16.mxu1 %v1549_v8  ;;  %v1575_v28 = vld [vmem:[%s1830_s11 + $0x34] ss:$8 sps:$4 sm:$0xff]   ;;  %v1579_v30 = vld [vmem:[%s1830_s11 + $0x30] ss:$8 sps:$4 sm:$0xff]   ;;  %v1581_v32 = vld [vmem:[%s1830_s11 + $0x44] ss:$8 sps:$4 sm:$0xff]  }
  0x16   : > { %v1577_v29 = vld [vmem:[%s1830_s11 + $0xb4] ss:$8 sps:$4 sm:$0xff]   ;;  %v1580_v31 = vld [vmem:[%s1830_s11 + $0xb0] ss:$8 sps:$4 sm:$0xff]   ;;  %v1583_v33 = vld [vmem:[%s1830_s11 + $0xc4] ss:$8 sps:$4 sm:$0xff]  }
  0x17   : > { %v1585_v34 = vld [vmem:[%s1830_s11 + $0x40] ss:$8 sps:$4 sm:$0xff]   ;;  %v1587_v36 = vld [vmem:[%s1830_s11 + $0x54] ss:$8 sps:$4 sm:$0xff]   ;;  %v1591_v38 = vld [vmem:[%s1830_s11 + $0x50] ss:$8 sps:$4 sm:$0xff]  }
  0x18   : > { %1398 = vmatpush3.bf16.msra.mxu0 %v1550_v9  ;;  %1513 = vmatpush3.bf16.msra.mxu1 %v1550_v9  ;;  %v1586_v35 = vld [vmem:[%s1830_s11 + $0xc0] ss:$8 sps:$4 sm:$0xff]   ;;  %v1589_v37 = vld [vmem:[%s1830_s11 + $0xd4] ss:$8 sps:$4 sm:$0xff]   ;;  %v1592_v39 = vld [vmem:[%s1830_s11 + $0xd0] ss:$8 sps:$4 sm:$0xff]  }
  0x19   : > { %1399 = vmatprep.subr.bf16.mxu0 %v1551_v10  ;;  %1506 = vmatprep.subr.bf16.mxu1 %v1551_v10  ;;  %v1593_v40 = vld [vmem:[%s1830_s11 + $0x64] ss:$8 sps:$4 sm:$0xff]   ;;  %v1597_v42 = vld [vmem:[%s1830_s11 + $0x60] ss:$8 sps:$4 sm:$0xff]   ;;  %v1599_v44 = vld [vmem:[%s1830_s11 + $0x74] ss:$8 sps:$4 sm:$0xff]  }
  0x1a   : > { %v1595_v41 = vld [vmem:[%s1830_s11 + $0xe4] ss:$8 sps:$4 sm:$0xff]   ;;  %v1598_v43 = vld [vmem:[%s1830_s11 + $0xe0] ss:$8 sps:$4 sm:$0xff]   ;;  %v1601_v45 = vld [vmem:[%s1830_s11 + $0xf4] ss:$8 sps:$4 sm:$0xff]  }
  0x1b   : > { %v1603_v46 = vld [vmem:[%s1830_s11 + $0x70] ss:$8 sps:$4 sm:$0xff]  }
  0x1c   : > { %1400 = vmatpush3.bf16.msra.mxu0 %v1552_v13  ;;  %1514 = vmatpush3.bf16.msra.mxu1 %v1552_v13  ;;  %v1604_v47 = vld [vmem:[%s1830_s11 + $0xf0] ss:$8 sps:$4 sm:$0xff]  }
  0x1d   : > { %1401 = vmatprep.subr.bf16.mxu0 %v1553_v14  ;;  %1507 = vmatprep.subr.bf16.mxu1 %v1553_v14 }
  0x20   : > { %1402 = vmatpush3.bf16.msra.mxu0 %v1554_v15  ;;  %1515 = vmatpush3.bf16.msra.mxu1 %v1554_v15 }
  0x21   : > { %1403 = vmatprep.subr.bf16.mxu0 %v1555_v16  ;;  %1508 = vmatprep.subr.bf16.mxu1 %v1555_v16 }
  0x24   : > { %1404 = vmatpush3.bf16.msra.mxu0 %v1556_v17  ;;  %1516 = vmatpush3.bf16.msra.mxu1 %v1556_v17 }
  0x27   : > { %689 = vmatmul.mubr.bf16.vlgmr.msra.gmra.mrb[0].mxu0 %v1557_v18  ;;  %753 = vmatmul.mubr.bf16.vlgmr.msra.gmra.mrb[0].mxu1 %v1560_v19 }
  0x28   : > { %696 = vmatprep.mubr.bf16.mxu0 %v1563_v20  ;;  %760 = vmatprep.mubr.bf16.mxu1 %v1565_v21 }
  0x2f   : > { %697 = vmatmul.mubr.bf16.gmra.mrb[4].mxu0 %v1567_v22  ;;  %761 = vmatmul.mubr.bf16.gmra.mrb[4].mxu1 %v1568_v23 }
  0x30   : > { %704 = vmatprep.mubr.bf16.mxu0 %v1569_v24  ;;  %768 = vmatprep.mubr.bf16.mxu1 %v1571_v25 }
  0x37   : > { %705 = vmatmul.mubr.bf16.gmra.mrb[8].mxu0 %v1573_v26  ;;  %769 = vmatmul.mubr.bf16.gmra.mrb[8].mxu1 %v1574_v27 }
  0x38   : > { %712 = vmatprep.mubr.bf16.mxu0 %v1575_v28  ;;  %776 = vmatprep.mubr.bf16.mxu1 %v1577_v29 }
  0x3f   : > { %713 = vmatmul.mubr.bf16.gmra.mrb[12].mxu0 %v1579_v30  ;;  %777 = vmatmul.mubr.bf16.gmra.mrb[12].mxu1 %v1580_v31 }
  0x40   : > { %720 = vmatprep.mubr.bf16.mxu0 %v1581_v32  ;;  %784 = vmatprep.mubr.bf16.mxu1 %v1583_v33 }
  0x47   : > { %721 = vmatmul.mubr.bf16.gmra.mrb[16].mxu0 %v1585_v34  ;;  %785 = vmatmul.mubr.bf16.gmra.mrb[16].mxu1 %v1586_v35 }
  0x48   : > { %728 = vmatprep.mubr.bf16.mxu0 %v1587_v36  ;;  %792 = vmatprep.mubr.bf16.mxu1 %v1589_v37 }
  0x4f   : > { %729 = vmatmul.mubr.bf16.gmra.mrb[20].mxu0 %v1591_v38  ;;  %793 = vmatmul.mubr.bf16.gmra.mrb[20].mxu1 %v1592_v39 }
  0x50   : > { %736 = vmatprep.mubr.bf16.mxu0 %v1593_v40  ;;  %800 = vmatprep.mubr.bf16.mxu1 %v1595_v41 }
  0x57   : > { %737 = vmatmul.mubr.bf16.gmra.mrb[24].mxu0 %v1597_v42  ;;  %801 = vmatmul.mubr.bf16.gmra.mrb[24].mxu1 %v1598_v43 }
  0x58   : > { %744 = vmatprep.mubr.bf16.mxu0 %v1599_v44  ;;  %808 = vmatprep.mubr.bf16.mxu1 %v1601_v45 }
  0x5f   : > { %745 = vmatmul.mubr.bf16.gmra.mrb[28].mxu0 %v1603_v46  ;;  %809 = vmatmul.mubr.bf16.gmra.mrb[28].mxu1 %v1604_v47 }
  0xfa   : > { %v1405_v48 = vpop.f32.mrb[0].mxu0  ;;  %v1453_v49 = vpop.f32.mrb[0].mxu1 }
  0xfb   : > { %v1406_v50 = vpop.f32.mrb[1].mxu0  ;;  %v1454_v52 = vpop.f32.mrb[1].mxu1 }
  0xfc   : > { %v1407_v53 = vadd.f32 %v1406_v50, %v1405_v48  ;;  %v1455_v54 = vadd.f32 %v1454_v52, %v1453_v49  ;;  %v1408_v55 = vpop.f32.mrb[2].mxu0  ;;  %v1456_v56 = vpop.f32.mrb[2].mxu1 }
  0xfd   : > { %v1409_v57 = vpop.f32.mrb[3].mxu0  ;;  %v1457_v58 = vpop.f32.mrb[3].mxu1 }
  0xfe   : > { %v923_v59 = vadd.f32 %v1407_v53, %v1888_v51  ;;  %v939_v60 = vadd.f32 %v1455_v54, %v1888_v51  ;;  %v1410_v61 = vadd.f32 %v1409_v57, %v1408_v55  ;;  %v1458_v62 = vadd.f32 %v1457_v58, %v1456_v56 }
 0x100   : > { %v1354_v63 = vmul.f32 -1.442695, %v923_v59  ;;  %v1370_v0 = vmul.f32 -1.442695, %v939_v60  ;;  %v924_v1 = vadd.f32 %v1410_v61, %v1888_v51  ;;  %v940_v2 = vadd.f32 %v1458_v62, %v1888_v51 }
 0x102   : > { %1605 = vpow2.f32 %v1354_v63  ;;  %v1355_v3 = vmul.f32 -1.442695, %v924_v1  ;;  %v1371_v4 = vmul.f32 -1.442695, %v940_v2  ;;  %v1411_v5 = vpop.f32.mrb[4].mxu0  ;;  %v1459_v6 = vpop.f32.mrb[4].mxu1 }
 0x103   : > { %1607 = vpow2.f32 %v1370_v0  ;;  %v1412_v7 = vpop.f32.mrb[5].mxu0  ;;  %v1460_v8 = vpop.f32.mrb[5].mxu1 }
 0x104   : > { %1609 = vpow2.f32 %v1355_v3  ;;  %v1413_v9 = vadd.f32 %v1412_v7, %v1411_v5  ;;  %v1461_v10 = vadd.f32 %v1460_v8, %v1459_v6  ;;  %v1414_v11 = vpop.f32.mrb[6].mxu0  ;;  %v1462_v12 = vpop.f32.mrb[6].mxu1 }
 0x105   : > { %1611 = vpow2.f32 %v1371_v4  ;;  %v1415_v13 = vpop.f32.mrb[7].mxu0  ;;  %v1463_v14 = vpop.f32.mrb[7].mxu1 }
 0x106   : > { %v925_v15 = vadd.f32 %v1413_v9, %v1888_v51  ;;  %v941_v16 = vadd.f32 %v1461_v10, %v1888_v51  ;;  %v1416_v17 = vadd.f32 %v1415_v13, %v1414_v11  ;;  %v1464_v18 = vadd.f32 %v1463_v14, %v1462_v12 }
 0x108   : > { %v1356_v19 = vmul.f32 -1.442695, %v925_v15  ;;  %v1372_v20 = vmul.f32 -1.442695, %v941_v16  ;;  %v926_v21 = vadd.f32 %v1416_v17, %v1888_v51  ;;  %v942_v22 = vadd.f32 %v1464_v18, %v1888_v51 }
 0x10a   : > { %1613 = vpow2.f32 %v1356_v19  ;;  %v1357_v23 = vmul.f32 -1.442695, %v926_v21  ;;  %v1373_v24 = vmul.f32 -1.442695, %v942_v22  ;;  %v1417_v25 = vpop.f32.mrb[8].mxu0  ;;  %v1465_v26 = vpop.f32.mrb[8].mxu1 }
 0x10b   : > { %1615 = vpow2.f32 %v1372_v20  ;;  %v1418_v27 = vpop.f32.mrb[9].mxu0  ;;  %v1466_v28 = vpop.f32.mrb[9].mxu1 }
 0x10c   : > { %v1606_v29 = vpop.eup %1605  ;;  %1617 = vpow2.f32 %v1357_v23  ;;  %v1419_v30 = vadd.f32 %v1418_v27, %v1417_v25  ;;  %v1467_v31 = vadd.f32 %v1466_v28, %v1465_v26  ;;  %v1420_v32 = vpop.f32.mrb[10].mxu0 }
 0x10d   : > { %v1468_v33 = vpop.f32.mrb[10].mxu1  ;;  %v1608_v34 = vpop.eup %1607  ;;  %v1051_v35 = vadd.f32 1.0, %v1606_v29  ;;  %1619 = vpow2.f32 %v1373_v24 }
 0x10e   : > { %v1421_v36 = vpop.f32.mrb[11].mxu0  ;;  %v1469_v37 = vpop.f32.mrb[11].mxu1  ;;  %v1067_v39 = vadd.f32 1.0, %v1608_v34  ;;  %v927_v40 = vadd.f32 %v1419_v30, %v1888_v51  ;;  %v943_v41 = vadd.f32 %v1467_v31, %v1888_v51 }
 0x10f   : > { %v1610_v38 = vpop.eup %1609  ;;  %v1422_v42 = vadd.f32 %v1421_v36, %v1420_v32  ;;  %1621 = vrcp.f32 %v1051_v35  ;;  %v1470_v45 = vadd.f32 %v1469_v37, %v1468_v33 }
 0x110   : > { %v1612_v43 = vpop.eup %1611  ;;  %v1052_v44 = vadd.f32 1.0, %v1610_v38  ;;  %1623 = vrcp.f32 %v1067_v39  ;;  %v1358_v47 = vmul.f32 -1.442695, %v927_v40  ;;  %v1374_v48 = vmul.f32 -1.442695, %v943_v41 }
 0x111   : > { %v1068_v46 = vadd.f32 1.0, %v1612_v43  ;;  %v928_v49 = vadd.f32 %v1422_v42, %v1888_v51  ;;  %v944_v50 = vadd.f32 %v1470_v45, %v1888_v51 }
 0x112   : > { %1625 = vrcp.f32 %v1052_v44  ;;  %v1423_v52 = vpop.f32.mrb[12].mxu0  ;;  %v1471_v53 = vpop.f32.mrb[12].mxu1 }
 0x113   : > { %1627 = vrcp.f32 %v1068_v46  ;;  %v1359_v54 = vmul.f32 -1.442695, %v928_v49  ;;  %v1375_v55 = vmul.f32 -1.442695, %v944_v50  ;;  %v1424_v56 = vpop.f32.mrb[13].mxu0  ;;  %v1472_v57 = vpop.f32.mrb[13].mxu1 }
 0x114   : > { %1629 = vpow2.f32 %v1358_v47  ;;  %v1614_v58 = vpop.eup %1613  ;;  %v1425_v59 = vadd.f32 %v1424_v56, %v1423_v52  ;;  %v1473_v60 = vadd.f32 %v1472_v57, %v1471_v53  ;;  %v1426_v61 = vpop.f32.mrb[14].mxu0 }
 0x115   : > { %1631 = vpow2.f32 %v1374_v48  ;;  %v1474_v62 = vpop.f32.mrb[14].mxu1  ;;  %v1616_v63 = vpop.eup %1615  ;;  %v1053_v0 = vadd.f32 1.0, %v1614_v58 }
 0x116   : > { %1633 = vpow2.f32 %v1359_v54  ;;  %v1427_v1 = vpop.f32.mrb[15].mxu0  ;;  %v1475_v2 = vpop.f32.mrb[15].mxu1  ;;  %v1069_v4 = vadd.f32 1.0, %v1616_v63  ;;  %v929_v5 = vadd.f32 %v1425_v59, %v1888_v51  ;;  %v945_v6 = vadd.f32 %v1473_v60, %v1888_v51 }
 0x117   : > { %v1618_v3 = vpop.eup %1617  ;;  %1635 = vpow2.f32 %v1375_v55  ;;  %v1428_v9 = vadd.f32 %v1427_v1, %v1426_v61  ;;  %v1476_v10 = vadd.f32 %v1475_v2, %v1474_v62 }
 0x118   : > { %v1620_v7 = vpop.eup %1619  ;;  %1637 = vrcp.f32 %v1053_v0  ;;  %v1054_v8 = vadd.f32 1.0, %v1618_v3  ;;  %v1360_v12 = vmul.f32 -1.442695, %v929_v5  ;;  %v1376_v13 = vmul.f32 -1.442695, %v945_v6 }
 0x119   : > { %1639 = vrcp.f32 %v1069_v4  ;;  %v1070_v11 = vadd.f32 1.0, %v1620_v7  ;;  %v1622_v14 = vpop.eup %1621  ;;  %v930_v15 = vadd.f32 %v1428_v9, %v1888_v51  ;;  %v946_v16 = vadd.f32 %v1476_v10, %v1888_v51 }
 0x11a   : > { %1641 = vrcp.f32 %v1054_v8  ;;  %v1624_v17 = vpop.eup %1623  ;;  %1147 = vst [vmem:[%s1909_s8] sm:$0xff] %v1622_v14  ;;  %v1429_v18 = vpop.f32.mrb[16].mxu0 }
 0x11b   : > { %1643 = vrcp.f32 %v1070_v11  ;;  %v1477_v19 = vpop.f32.mrb[16].mxu1  ;;  %1163 = vst [vmem:[%s1909_s8 + $0x80] sm:$0xff] %v1624_v17  ;;  %v1361_v21 = vmul.f32 -1.442695, %v930_v15  ;;  %v1377_v22 = vmul.f32 -1.442695, %v946_v16 }
 0x11c   : > { %v1626_v20 = vpop.eup %1625  ;;  %1645 = vpow2.f32 %v1360_v12  ;;  %v1430_v23 = vpop.f32.mrb[17].mxu0 }
 0x11d   : > { %v1478_v24 = vpop.f32.mrb[17].mxu1  ;;  %v1628_v25 = vpop.eup %1627  ;;  %1148 = vst [vmem:[%s1909_s8 + $0x8] sm:$0xff] %v1626_v20  ;;  %1647 = vpow2.f32 %v1376_v13  ;;  %v1431_v26 = vadd.f32 %v1430_v23, %v1429_v18 }
 0x11e   : > { %v1479_v27 = vadd.f32 %v1478_v24, %v1477_v19  ;;  %v1432_v28 = vpop.f32.mrb[18].mxu0  ;;  %v1480_v29 = vpop.f32.mrb[18].mxu1  ;;  %1164 = vst [vmem:[%s1909_s8 + $0x88] sm:$0xff] %v1628_v25  ;;  %1649 = vpow2.f32 %v1361_v21 }
 0x11f   : > { %v1630_v30 = vpop.eup %1629  ;;  %v1433_v31 = vpop.f32.mrb[19].mxu0  ;;  %1651 = vpow2.f32 %v1377_v22  ;;  %v931_v35 = vadd.f32 %v1431_v26, %v1888_v51 }
 0x120   : > { %v1481_v32 = vpop.f32.mrb[19].mxu1  ;;  %v1632_v33 = vpop.eup %1631  ;;  %v1055_v34 = vadd.f32 1.0, %v1630_v30  ;;  %v947_v36 = vadd.f32 %v1479_v27, %v1888_v51  ;;  %v1434_v39 = vadd.f32 %v1433_v31, %v1432_v28 }
 0x121   : > { %v1634_v37 = vpop.eup %1633  ;;  %v1071_v38 = vadd.f32 1.0, %v1632_v33  ;;  %v1482_v40 = vadd.f32 %v1481_v32, %v1480_v29  ;;  %v1362_v43 = vmul.f32 -1.442695, %v931_v35 }
 0x122   : > { %v1636_v41 = vpop.eup %1635  ;;  %1653 = vrcp.f32 %v1055_v34  ;;  %v1056_v42 = vadd.f32 1.0, %v1634_v37  ;;  %v1378_v44 = vmul.f32 -1.442695, %v947_v36  ;;  %v932_v47 = vadd.f32 %v1434_v39, %v1888_v51  ;;  %v1435_v50 = vpop.f32.mrb[20].mxu0 }
 0x123   : > { %v1638_v45 = vpop.eup %1637  ;;  %1655 = vrcp.f32 %v1071_v38  ;;  %v1072_v46 = vadd.f32 1.0, %v1636_v41  ;;  %v948_v48 = vadd.f32 %v1482_v40, %v1888_v51  ;;  %v1483_v52 = vpop.f32.mrb[20].mxu1 }
 0x124   : > { %v1640_v49 = vpop.eup %1639  ;;  %1149 = vst [vmem:[%s1909_s8 + $0x10] sm:$0xff] %v1638_v45  ;;  %1657 = vrcp.f32 %v1056_v42  ;;  %v1363_v54 = vmul.f32 -1.442695, %v932_v47  ;;  %v1436_v56 = vpop.f32.mrb[21].mxu0 }
 0x125   : > { %v1642_v53 = vpop.eup %1641  ;;  %1165 = vst [vmem:[%s1909_s8 + $0x90] sm:$0xff] %v1640_v49  ;;  %1659 = vrcp.f32 %v1072_v46  ;;  %v1379_v55 = vmul.f32 -1.442695, %v948_v48  ;;  %v1484_v57 = vpop.f32.mrb[21].mxu1  ;;  %v1437_v59 = vadd.f32 %v1436_v56, %v1435_v50 }
 0x126   : > { %v1644_v58 = vpop.eup %1643  ;;  %1150 = vst [vmem:[%s1909_s8 + $0x18] sm:$0xff] %v1642_v53  ;;  %1661 = vpow2.f32 %v1362_v43  ;;  %v1485_v60 = vadd.f32 %v1484_v57, %v1483_v52  ;;  %v1438_v61 = vpop.f32.mrb[22].mxu0 }
 0x127   : > { %v1486_v62 = vpop.f32.mrb[22].mxu1  ;;  %v1646_v63 = vpop.eup %1645  ;;  %1166 = vst [vmem:[%s1909_s8 + $0x98] sm:$0xff] %v1644_v58  ;;  %1663 = vpow2.f32 %v1378_v44  ;;  %v933_v4 = vadd.f32 %v1437_v59, %v1888_v51 }
 0x128   : > { %v1439_v0 = vpop.f32.mrb[23].mxu0  ;;  %v1487_v1 = vpop.f32.mrb[23].mxu1  ;;  %v1057_v3 = vadd.f32 1.0, %v1646_v63  ;;  %1665 = vpow2.f32 %v1363_v54  ;;  %v949_v5 = vadd.f32 %v1485_v60, %v1888_v51 }
 0x129   : > { %v1648_v2 = vpop.eup %1647  ;;  %1667 = vpow2.f32 %v1379_v55  ;;  %v1440_v8 = vadd.f32 %v1439_v0, %v1438_v61  ;;  %v1488_v9 = vadd.f32 %v1487_v1, %v1486_v62  ;;  %v1364_v12 = vmul.f32 -1.442695, %v933_v4 }
 0x12a   : > { %v1650_v6 = vpop.eup %1649  ;;  %v1073_v7 = vadd.f32 1.0, %v1648_v2  ;;  %1669 = vrcp.f32 %v1057_v3  ;;  %v1380_v13 = vmul.f32 -1.442695, %v949_v5  ;;  %v1441_v18 = vpop.f32.mrb[24].mxu0 }
 0x12b   : > { %v1652_v10 = vpop.eup %1651  ;;  %v1058_v11 = vadd.f32 1.0, %v1650_v6  ;;  %v934_v15 = vadd.f32 %v1440_v8, %v1888_v51  ;;  %v950_v16 = vadd.f32 %v1488_v9, %v1888_v51  ;;  %v1489_v19 = vpop.f32.mrb[24].mxu1 }
 0x12c   : > { %1671 = vrcp.f32 %v1073_v7  ;;  %v1074_v14 = vadd.f32 1.0, %v1652_v10  ;;  %v1654_v17 = vpop.eup %1653  ;;  %v1442_v23 = vpop.f32.mrb[25].mxu0 }
 0x12d   : > { %1673 = vrcp.f32 %v1058_v11  ;;  %v1656_v20 = vpop.eup %1655  ;;  %1151 = vst [vmem:[%s1909_s8 + $0x20] sm:$0xff] %v1654_v17  ;;  %v1365_v21 = vmul.f32 -1.442695, %v934_v15  ;;  %v1381_v22 = vmul.f32 -1.442695, %v950_v16  ;;  %v1490_v24 = vpop.f32.mrb[25].mxu1  ;;  %v1443_v26 = vadd.f32 %v1442_v23, %v1441_v18 }
 0x12e   : > { %1675 = vrcp.f32 %v1074_v14  ;;  %v1658_v25 = vpop.eup %1657  ;;  %1167 = vst [vmem:[%s1909_s8 + $0xa0] sm:$0xff] %v1656_v20  ;;  %v1491_v27 = vadd.f32 %v1490_v24, %v1489_v19  ;;  %v1444_v28 = vpop.f32.mrb[26].mxu0 }
 0x12f   : > { %1677 = vpow2.f32 %v1364_v12  ;;  %v1492_v29 = vpop.f32.mrb[26].mxu1  ;;  %v1660_v30 = vpop.eup %1659  ;;  %1152 = vst [vmem:[%s1909_s8 + $0x28] sm:$0xff] %v1658_v25  ;;  %v935_v34 = vadd.f32 %v1443_v26, %v1888_v51 }
 0x130   : > { %1679 = vpow2.f32 %v1380_v13  ;;  %v1445_v31 = vpop.f32.mrb[27].mxu0  ;;  %v1493_v32 = vpop.f32.mrb[27].mxu1  ;;  %1168 = vst [vmem:[%s1909_s8 + $0xa8] sm:$0xff] %v1660_v30  ;;  %v951_v35 = vadd.f32 %v1491_v27, %v1888_v51 }
 0x131   : > { %v1662_v33 = vpop.eup %1661  ;;  %1681 = vpow2.f32 %v1365_v21  ;;  %v1446_v36 = vadd.f32 %v1445_v31, %v1444_v28  ;;  %v1494_v39 = vadd.f32 %v1493_v32, %v1492_v29  ;;  %v1366_v45 = vmul.f32 -1.442695, %v935_v34 }
 0x132   : > { %v1664_v37 = vpop.eup %1663  ;;  %v1059_v38 = vadd.f32 1.0, %v1662_v33  ;;  %1683 = vpow2.f32 %v1381_v22  ;;  %v1382_v49 = vmul.f32 -1.442695, %v951_v35  ;;  %v1447_v50 = vpop.f32.mrb[28].mxu0 }
 0x133   : > { %v1666_v40 = vpop.eup %1665  ;;  %v1075_v41 = vadd.f32 1.0, %v1664_v37  ;;  %v936_v42 = vadd.f32 %v1446_v36, %v1888_v51  ;;  %v952_v46 = vadd.f32 %v1494_v39, %v1888_v51  ;;  %v1495_v52 = vpop.f32.mrb[28].mxu1 }
 0x134   : > { %v1668_v43 = vpop.eup %1667  ;;  %1685 = vrcp.f32 %v1059_v38  ;;  %v1060_v44 = vadd.f32 1.0, %v1666_v40  ;;  %v1448_v55 = vpop.f32.mrb[29].mxu0 }
 0x135   : > { %v1670_v47 = vpop.eup %1669  ;;  %1687 = vrcp.f32 %v1075_v41  ;;  %v1076_v48 = vadd.f32 1.0, %v1668_v43  ;;  %v1367_v54 = vmul.f32 -1.442695, %v936_v42  ;;  %v1496_v56 = vpop.f32.mrb[29].mxu1  ;;  %v1383_v58 = vmul.f32 -1.442695, %v952_v46 }
 0x136   : > { %v1672_v53 = vpop.eup %1671  ;;  %1153 = vst [vmem:[%s1909_s8 + $0x30] sm:$0xff] %v1670_v47  ;;  %1689 = vrcp.f32 %v1060_v44  ;;  %v1449_v59 = vadd.f32 %v1448_v55, %v1447_v50  ;;  %v1497_v60 = vadd.f32 %v1496_v56, %v1495_v52  ;;  %v1450_v61 = vpop.f32.mrb[30].mxu0 }
 0x137   : > { %v1674_v57 = vpop.eup %1673  ;;  %1169 = vst [vmem:[%s1909_s8 + $0xb0] sm:$0xff] %v1672_v53  ;;  %1691 = vrcp.f32 %v1076_v48  ;;  %v1498_v62 = vpop.f32.mrb[30].mxu1 }
 0x138   : > { %v1676_v63 = vpop.eup %1675  ;;  %1154 = vst [vmem:[%s1909_s8 + $0x38] sm:$0xff] %v1674_v57  ;;  %1693 = vpow2.f32 %v1366_v45  ;;  %v1451_v0 = vpop.f32.mrb[31].mxu0  ;;  %v937_v3 = vadd.f32 %v1449_v59, %v1888_v51  ;;  %v953_v4 = vadd.f32 %v1497_v60, %v1888_v51 }
 0x139   : > { %v1499_v1 = vpop.f32.mrb[31].mxu1  ;;  %v1678_v2 = vpop.eup %1677  ;;  %1170 = vst [vmem:[%s1909_s8 + $0xb8] sm:$0xff] %v1676_v63  ;;  %1695 = vpow2.f32 %v1382_v49  ;;  %v1452_v5 = vadd.f32 %v1451_v0, %v1450_v61 }
 0x13a   : > { %v1680_v6 = vpop.eup %1679  ;;  %v1061_v7 = vadd.f32 1.0, %v1678_v2  ;;  %1697 = vpow2.f32 %v1367_v54  ;;  %v1500_v8 = vadd.f32 %v1499_v1, %v1498_v62  ;;  %v1368_v11 = vmul.f32 -1.442695, %v937_v3 }
 0x13b   : > { %v1682_v9 = vpop.eup %1681  ;;  %v1077_v10 = vadd.f32 1.0, %v1680_v6  ;;  %1699 = vpow2.f32 %v1383_v58  ;;  %v938_v14 = vadd.f32 %v1452_v5, %v1888_v51  ;;  %v1384_v17 = vmul.f32 -1.442695, %v953_v4 }
 0x13c   : > { %v1684_v12 = vpop.eup %1683  ;;  %1701 = vrcp.f32 %v1061_v7  ;;  %v1062_v13 = vadd.f32 1.0, %v1682_v9  ;;  %v954_v15 = vadd.f32 %v1500_v8, %v1888_v51 }
 0x13d   : > { %1703 = vrcp.f32 %v1077_v10  ;;  %v1078_v16 = vadd.f32 1.0, %v1684_v12  ;;  %v1369_v19 = vmul.f32 -1.442695, %v938_v14 }
 0x13e   : > { %v1686_v18 = vpop.eup %1685  ;;  %1705 = vrcp.f32 %v1062_v13  ;;  %v1385_v21 = vmul.f32 -1.442695, %v954_v15 }
 0x13f   : > { %v1688_v20 = vpop.eup %1687  ;;  %1155 = vst [vmem:[%s1909_s8 + $0x40] sm:$0xff] %v1686_v18  ;;  %1707 = vrcp.f32 %v1078_v16 }
 0x140   : > { %v1690_v22 = vpop.eup %1689  ;;  %1171 = vst [vmem:[%s1909_s8 + $0xc0] sm:$0xff] %v1688_v20  ;;  %1709 = vpow2.f32 %v1368_v11 }
 0x141   : > { %v1692_v23 = vpop.eup %1691  ;;  %1156 = vst [vmem:[%s1909_s8 + $0x48] sm:$0xff] %v1690_v22  ;;  %1711 = vpow2.f32 %v1384_v17 }
 0x142   : > { %v1694_v24 = vpop.eup %1693  ;;  %1172 = vst [vmem:[%s1909_s8 + $0xc8] sm:$0xff] %v1692_v23  ;;  %1713 = vpow2.f32 %v1369_v19 }
 0x143   : > { %v1696_v51 = vpop.eup %1695  ;;  %v1063_v25 = vadd.f32 1.0, %v1694_v24  ;;  %1715 = vpow2.f32 %v1385_v21 }
 0x144   : > { %v1698_v26 = vpop.eup %1697  ;;  %v1079_v27 = vadd.f32 1.0, %v1696_v51 }
 0x145   : > { %v1700_v28 = vpop.eup %1699  ;;  %1717 = vrcp.f32 %v1063_v25  ;;  %v1064_v29 = vadd.f32 1.0, %v1698_v26 }
 0x146   : > { %v1702_v30 = vpop.eup %1701  ;;  %1719 = vrcp.f32 %v1079_v27  ;;  %v1080_v31 = vadd.f32 1.0, %v1700_v28 }
 0x147   : > { %v1704_v32 = vpop.eup %1703  ;;  %1157 = vst [vmem:[%s1909_s8 + $0x50] sm:$0xff] %v1702_v30  ;;  %1721 = vrcp.f32 %v1064_v29 }
 0x148   : > { %v1706_v33 = vpop.eup %1705  ;;  %1173 = vst [vmem:[%s1909_s8 + $0xd0] sm:$0xff] %v1704_v32  ;;  %1723 = vrcp.f32 %v1080_v31 }
 0x149   : > { %v1708_v34 = vpop.eup %1707  ;;  %1158 = vst [vmem:[%s1909_s8 + $0x58] sm:$0xff] %v1706_v33 }
 0x14a   : > { %v1710_v35 = vpop.eup %1709  ;;  %1174 = vst [vmem:[%s1909_s8 + $0xd8] sm:$0xff] %v1708_v34 }
 0x14b   : > { %v1712_v36 = vpop.eup %1711  ;;  %v1065_v37 = vadd.f32 1.0, %v1710_v35 }
 0x14c   : > { %v1714_v38 = vpop.eup %1713  ;;  %v1081_v39 = vadd.f32 1.0, %v1712_v36 }
 0x14d   : > { %v1716_v40 = vpop.eup %1715  ;;  %1725 = vrcp.f32 %v1065_v37  ;;  %v1066_v41 = vadd.f32 1.0, %v1714_v38 }
 0x14e   : > { %1727 = vrcp.f32 %v1081_v39  ;;  %v1082_v42 = vadd.f32 1.0, %v1716_v40 }
 0x14f   : > { %v1718_v43 = vpop.eup %1717  ;;  %1729 = vrcp.f32 %v1066_v41 }
 0x150   : > { %v1720_v44 = vpop.eup %1719  ;;  %1159 = vst [vmem:[%s1909_s8 + $0x60] sm:$0xff] %v1718_v43  ;;  %1731 = vrcp.f32 %v1082_v42 }
 0x151   : > { %v1722_v45 = vpop.eup %1721  ;;  %1175 = vst [vmem:[%s1909_s8 + $0xe0] sm:$0xff] %v1720_v44 }
 0x152   : > { %v1724_v46 = vpop.eup %1723  ;;  %1160 = vst [vmem:[%s1909_s8 + $0x68] sm:$0xff] %v1722_v45 }
 0x153   : > { %1176 = vst [vmem:[%s1909_s8 + $0xe8] sm:$0xff] %v1724_v46 }
 0x157   : > { %v1726_v47 = vpop.eup %1725 }
 0x158   : > { %v1728_v48 = vpop.eup %1727  ;;  %1161 = vst [vmem:[%s1909_s8 + $0x70] sm:$0xff] %v1726_v47 }
 0x159   : > { %v1730_v49 = vpop.eup %1729  ;;  %1177 = vst [vmem:[%s1909_s8 + $0xf0] sm:$0xff] %v1728_v48 }
 0x15a   : > { %v1732_v50 = vpop.eup %1731  ;;  %1162 = vst [vmem:[%s1909_s8 + $0x78] sm:$0xff] %v1730_v49 }
 0x15b   : > { %1178 = vst [vmem:[%s1909_s8 + $0xf8] sm:$0xff] %v1732_v50 }
 0x15c PF: > { %s13_s14 = sadd.s32 1, %s1755_s14   ;;  %s1974_s12 = smov %s1751_s13 }
 0x15d   : > { %p10_p5 = scmp.ge.s32.totalorder %s13_s14, 18   ;;  %s1975_s13 = smov %s1977_s15 }
 0x15f   :  { %12 = sbr.rel (!%p10_p5) target bundleno = 2 (0x2), region = 76 }

</bundles_post_ra>
